<compile_context>
chip_gen: v5e
topology: v5e:2x2
jax: 0.10.0
libtpu: 0.0.40
codegen_flags: <defaults>
</compile_context>

<pallas_src>
import functools

import jax
import jax.numpy as jnp
from jax.experimental import pallas as pl
from jax.experimental.pallas import tpu as pltpu


# ----------------------------------------------------------------------------
# Fused Pallas kernel: all DDIM steps for one (batch, token-block).
#   per step s (statically unrolled):
#     h   = W1^T @ x + (b1 + temb_s)          (MXU + lane-broadcast bias)
#     h   = SiLU(h) [+ resid]                 (VPU/EUP)
#     eps = W2^T @ h                          (MXU)
#     x   = c_x[s] * x + c_eps[s] * eps + c_eps[s]*b2   (folded DDIM update)
# x is carried in vregs across the unrolled loop and stored once at the end.
# ----------------------------------------------------------------------------
def _fused_ddim_kernel(cx_ref,      # SMEM (steps,)     f32
                       ceps_ref,    # SMEM (steps,)     f32
                       x0_ref,      # VMEM (C, TN)      initial latent block
                       w1t_ref,     # VMEM (HID, C)     bf16  W1^T
                       w2t_ref,     # VMEM (C, HID)     bf16  W2^T
                       bias_ref,    # VMEM (HID, steps) f32   b1 + temb per step
                       dtab_ref,    # VMEM (C, steps)   f32   c_eps[s] * b2
                       *rest,       # [resid_ref (HID, TN)], out_ref (C, TN)
                       num_steps, has_resid):
    if has_resid:
        resid_ref, out_ref = rest
        resid = resid_ref[...]
    else:
        (out_ref,) = rest
        resid = None

    x = x0_ref[...].astype(jnp.float32)       # (C, TN) carried in f32
    w1t = w1t_ref[...]                        # bf16
    w2t = w2t_ref[...]                        # bf16
    bias = bias_ref[...]                      # (HID, steps) f32
    dtab = dtab_ref[...]                      # (C, steps)   f32

    for s in range(num_steps):                # static unroll, static indices
        # --- denoiser model (per-token MLP) ---
        h = jnp.dot(w1t, x.astype(jnp.bfloat16),
                    preferred_element_type=jnp.float32)        # (HID, TN)
        h = h + bias[:, s:s + 1]                               # lane broadcast
        h = h * jax.nn.sigmoid(h)                              # SiLU
        # TODO(synk): abstract interface doesn't pin pre-/post-activation for
        # additional residuals; keep post-SiLU as in the reference version.
        if has_resid:
            h = h + resid
        eps = jnp.dot(w2t, h.astype(jnp.bfloat16),
                      preferred_element_type=jnp.float32)      # (C, TN)
        # --- folded DDIM elementwise update (b2 folded into dtab) ---
        x = cx_ref[s] * x + ceps_ref[s] * eps + dtab[:, s:s + 1]

    out_ref[...] = x


# ----------------------------------------------------------------------------
# VMEM budgeting helpers (generation-aware: v7x has 64 MiB, v5e/v6e 128 MiB)
# ----------------------------------------------------------------------------
def _vmem_limit_bytes():
    try:
        cap = int(pltpu.get_tpu_info().vmem_capacity_bytes)
    except Exception:
        cap = 64 * 1024 * 1024          # conservative (v7x-sized) fallback
    return max(16 * 1024 * 1024, (cap * 3) // 4)


def _pick_token_tile(n_hw, c, hid, has_resid, vmem_limit):
    """Largest 128-multiple token tile that fits the VMEM budget (or full N)."""
    # f32 bytes per token: x0 + out double-buffered, x/eps live, h, resid x2.
    per_tok = 4 * (6 * c + 2 * hid + (2 * hid if has_resid else 0))
    budget = vmem_limit // 2
    max_tn = max(128, (budget // max(per_tok, 1)) // 128 * 128)
    if n_hw <= max_tn:
        return n_hw
    t = max_tn
    while t >= 128:
        if n_hw % t == 0:
            return t
        t -= 128
    return n_hw


def ddim_sample_fused(x3d, resid3d, cx, ceps, bias_t, dtab, w1t, w2t):
    """Run the whole DDIM trajectory in a single pallas_call.

    x3d: (B, C, N), resid3d: (B, HID, N) or None, cx/ceps: (steps,),
    bias_t: (HID, steps), dtab: (C, steps), w1t: (HID, C) bf16,
    w2t: (C, HID) bf16.  Returns (B, C, N) f32.
    """
    b, c, n_hw = x3d.shape
    hid = w1t.shape[0]
    steps = int(cx.shape[0])
    has_resid = resid3d is not None

    vmem_limit = _vmem_limit_bytes()
    tn = _pick_token_tile(n_hw, c, hid, has_resid, vmem_limit)
    nb = n_hw // tn

    smem = pl.BlockSpec(memory_space=pltpu.MemorySpace.SMEM)
    in_specs = [
        smem,                                                    # cx
        smem,                                                    # ceps
        pl.BlockSpec((None, c, tn), lambda bb, j: (bb, 0, j)),   # x0
        pl.BlockSpec((hid, c),      lambda bb, j: (0, 0)),       # W1^T
        pl.BlockSpec((c, hid),      lambda bb, j: (0, 0)),       # W2^T
        pl.BlockSpec((hid, steps),  lambda bb, j: (0, 0)),       # bias table
        pl.BlockSpec((c, steps),    lambda bb, j: (0, 0)),       # c_eps*b2 table
    ]
    args = [cx, ceps, x3d, w1t, w2t, bias_t, dtab]
    if has_resid:
        in_specs.append(
            pl.BlockSpec((None, hid, tn), lambda bb, j: (bb, 0, j)))
        args.append(resid3d)

    kernel = functools.partial(_fused_ddim_kernel,
                               num_steps=steps, has_resid=has_resid)

    return pl.pallas_call(
        kernel,
        grid=(b, nb),                      # both axes independent -> parallel
        out_shape=jax.ShapeDtypeStruct((b, c, n_hw), jnp.float32),
        in_specs=in_specs,
        out_specs=pl.BlockSpec((None, c, tn), lambda bb, j: (bb, 0, j)),
        compiler_params=pltpu.CompilerParams(
            dimension_semantics=("parallel", "parallel"),
            vmem_limit_bytes=int(vmem_limit)),
    )(*args)


# ----------------------------------------------------------------------------
# Plain-JAX glue: parameters, noise schedule, jitted sampling entry point
# ----------------------------------------------------------------------------
class PallasDDIMSampler:
    """DDIM sampler whose full denoising trajectory runs in one Pallas kernel."""

    def __init__(self, channels, hidden, num_train_steps=1000,
                 num_sample_steps=8, seed=42):
        self.channels = channels
        self.hidden = hidden
        self.num_sample_steps = num_sample_steps

        # Deterministic synthetic "model" parameters, stored pre-transposed
        # for the tokens-on-lanes layout; weights in bf16 (MXU-native).
        k = jax.random.PRNGKey(seed)
        k1, k2, k3 = jax.random.split(k, 3)
        w1 = (jax.random.normal(k1, (channels, hidden), jnp.float32)
              * (1.0 / jnp.sqrt(channels)))
        w2 = (jax.random.normal(k2, (hidden, channels), jnp.float32)
              * (1.0 / jnp.sqrt(hidden)))
        self.w1t = jnp.transpose(w1).astype(jnp.bfloat16)   # (HID, C)
        self.w2t = jnp.transpose(w2).astype(jnp.bfloat16)   # (C, HID)
        self.b1 = jnp.zeros((1, hidden), jnp.float32)
        self.b2 = jnp.zeros((channels,), jnp.float32)
        # Time-embedding projection (sinusoidal features -> hidden).
        self.w_t = (jax.random.normal(k3, (8, hidden), jnp.float32)
                    * (1.0 / jnp.sqrt(8.0)))

        # Linear beta schedule -> cumulative alphas (DDPM/DDIM).
        betas = jnp.linspace(1e-4, 2e-2, num_train_steps, dtype=jnp.float32)
        self.alphas_cumprod = jnp.cumprod(1.0 - betas)
        # Evenly spaced timesteps for the DDIM trajectory (ascending).
        self.timesteps = jnp.linspace(
            0, num_train_steps - 1, num_sample_steps).astype(jnp.int32)

        self._sample = self._build_sample_fn()

    def _build_sample_fn(self):
        acp = self.alphas_cumprod
        timesteps = self.timesteps
        w_t, b1, b2 = self.w_t, self.b1, self.b2
        w1t, w2t = self.w1t, self.w2t

        def sample(x3d, resid3d, t_start):
            # Step order: i = t_start-1, ..., 0  (reverse diffusion).
            idx = jnp.arange(t_start - 1, -1, -1)
            t = timesteps[idx]
            a_t = acp[t]
            a_prev = jnp.where(
                idx > 0, acp[timesteps[jnp.maximum(idx - 1, 0)]],
                jnp.float32(1.0))
            rs_at = jax.lax.rsqrt(a_t)
            # Folded DDIM (eta=0) scalars:  x' = c_x * x + c_eps * eps
            c_x = jnp.sqrt(a_prev) * rs_at
            c_eps = (jnp.sqrt(1.0 - a_prev)
                     - jnp.sqrt(a_prev) * jnp.sqrt(1.0 - a_t) * rs_at)
            # All time embeddings in one (steps, 8) @ (8, HID) matmul,
            # pre-added with b1 -> single resident lane-dense bias table.
            tf = t.astype(jnp.float32)[:, None]
            freqs = jnp.exp(-jnp.arange(4, dtype=jnp.float32))[None, :]
            feats = jnp.concatenate(
                [jnp.sin(tf * freqs), jnp.cos(tf * freqs)], axis=1)
            bias_t = jnp.transpose(feats @ w_t + b1)          # (HID, steps)
            dtab = b2[:, None] * c_eps[None, :]               # (C, steps)
            return ddim_sample_fused(
                x3d, resid3d,
                c_x.astype(jnp.float32), c_eps.astype(jnp.float32),
                bias_t.astype(jnp.float32), dtab.astype(jnp.float32),
                w1t, w2t)

        return jax.jit(sample, static_argnames="t_start")

    def __call__(self, x_T, *cond, additional_residuals=None,
                 initial_state=None, strength=0.8, repeat_noise=False):
        # TODO(synk): conditioning inputs (*cond) have no defined semantics in
        # the abstract DiffusionSampler interface; accepted and ignored.
        b, c, h, w = x_T.shape
        n_hw = h * w
        acp = self.alphas_cumprod

        if initial_state is not None:
            # img2img-style start: noise `initial_state` up to `strength`.
            t_start = max(1, min(self.num_sample_steps,
                                 int(self.num_sample_steps * strength)))
            t_noise = self.timesteps[t_start - 1]
            # TODO(synk): interface provides no user PRNG key; fixed key keeps
            # the noise deterministic across calls.
            key = jax.random.PRNGKey(1)
            if repeat_noise:
                noise = jax.random.normal(key, (1, c, h, w), jnp.float32)
                noise = jnp.broadcast_to(noise, (b, c, h, w))
            else:
                noise = jax.random.normal(key, (b, c, h, w), jnp.float32)
            a_s = acp[t_noise]
            x = jnp.sqrt(a_s) * initial_state + jnp.sqrt(1.0 - a_s) * noise
        else:
            t_start = self.num_sample_steps
            x = x_T

        # Free reshapes (tokens already on the last axis) -- no transposes.
        x3d = x.astype(jnp.float32).reshape(b, c, n_hw)

        if additional_residuals is not None and len(additional_residuals) > 0:
            resid3d = additional_residuals[0].astype(jnp.float32).reshape(
                b, self.hidden, n_hw)
        else:
            resid3d = None          # static no-residual kernel variant

        out3d = self._sample(x3d, resid3d, t_start=t_start)
        return out3d.reshape(b, c, h, w)


class DiffusionModelSampler:
    """JAX/Pallas equivalent of the PyTorch DiffusionModelSampler wrapper."""

    def __init__(self, model, sampler):
        self.model = model      # model params are owned by the sampler here
        self.sampler = sampler

    def __call__(self, x_T, *cond, additional_residuals=None,
                 initial_state=None, strength=0.8, repeat_noise=False):
        return self.sampler(x_T, *cond,
                            additional_residuals=additional_residuals,
                            initial_state=initial_state,
                            strength=strength,
                            repeat_noise=repeat_noise)


if __name__ == "__main__":
    B, C, H, W, HID = 2, 4, 16, 16, 32

    key = jax.random.PRNGKey(0)
    k_x, k_init, k_res = jax.random.split(key, 3)
    x_T = jax.random.normal(k_x, (B, C, H, W), jnp.float32)
    initial_state = jax.random.normal(k_init, (B, C, H, W), jnp.float32)
    residual = 0.1 * jax.random.normal(k_res, (B, HID, H, W), jnp.float32)

    sampler = PallasDDIMSampler(channels=C, hidden=HID,
                                num_train_steps=1000, num_sample_steps=8)
    module = DiffusionModelSampler(model=None, sampler=sampler)

    # Pure-noise sampling path (no residual -> no-resid kernel variant).
    out1 = module(x_T)
    # img2img path with residuals / strength / repeat_noise.
    out2 = module(x_T, additional_residuals=[residual],
                  initial_state=initial_state, strength=0.8,
                  repeat_noise=True)

    jax.block_until_ready((out1, out2))
    assert out1.shape == (B, C, H, W) and out2.shape == (B, C, H, W)
    assert bool(jnp.all(jnp.isfinite(out1))) and bool(jnp.all(jnp.isfinite(out2)))
    print("KERNEL_OK")
</pallas_src>

<mosaic_0001>
module attributes {stable_mosaic.version = 11 : i64} {
  func.func @_fused_ddim_kernel(%arg0: i32, %arg1: i32, %arg2: memref<8xf32, #tpu.memory_space<smem>>, %arg3: memref<8xf32, #tpu.memory_space<smem>>, %arg4: memref<1x4x256xf32, #tpu.memory_space<vmem>>, %arg5: memref<32x4xbf16, #tpu.memory_space<vmem>>, %arg6: memref<4x32xbf16, #tpu.memory_space<vmem>>, %arg7: memref<32x8xf32, #tpu.memory_space<vmem>>, %arg8: memref<4x8xf32, #tpu.memory_space<vmem>>, %arg9: memref<1x4x256xf32, #tpu.memory_space<vmem>>) attributes {dimension_semantics = [#tpu.dimension_semantics<parallel>, #tpu.dimension_semantics<parallel>], iteration_bounds = array<i64: 2, 1>, scalar_prefetch = 0 : i64, scratch_operands = 0 : i64, tpu.core_type = #tpu.core_type<tc>, window_params = [{transform_indices = @transform_0, window_bounds = array<i64: 8>}, {transform_indices = @transform_1, window_bounds = array<i64: 8>}, {transform_indices = @transform_2, window_bounds = array<i64: 1, 4, 256>}, {pipeline_mode = #tpu.pipeline_mode<synchronous>, transform_indices = @transform_3, window_bounds = array<i64: 32, 4>}, {pipeline_mode = #tpu.pipeline_mode<synchronous>, transform_indices = @transform_4, window_bounds = array<i64: 4, 32>}, {pipeline_mode = #tpu.pipeline_mode<synchronous>, transform_indices = @transform_5, window_bounds = array<i64: 32, 8>}, {pipeline_mode = #tpu.pipeline_mode<synchronous>, transform_indices = @transform_6, window_bounds = array<i64: 4, 8>}, {transform_indices = @transform_7, window_bounds = array<i64: 1, 4, 256>}]} {
    %c0 = arith.constant 0 : index
    %c0_0 = arith.constant 0 : index
    %c0_1 = arith.constant 0 : index
    %0 = vector.load %arg4[%c0, %c0_0, %c0_1] : memref<1x4x256xf32, #tpu.memory_space<vmem>>, vector<1x4x256xf32>
    %1 = vector.shape_cast %0 : vector<1x4x256xf32> to vector<4x256xf32>
    %c0_2 = arith.constant 0 : index
    %c0_3 = arith.constant 0 : index
    %2 = vector.load %arg5[%c0_2, %c0_3] : memref<32x4xbf16, #tpu.memory_space<vmem>>, vector<32x4xbf16>
    %c0_4 = arith.constant 0 : index
    %c0_5 = arith.constant 0 : index
    %3 = vector.load %arg6[%c0_4, %c0_5] : memref<4x32xbf16, #tpu.memory_space<vmem>>, vector<4x32xbf16>
    %c0_6 = arith.constant 0 : index
    %c0_7 = arith.constant 0 : index
    %4 = vector.load %arg7[%c0_6, %c0_7] : memref<32x8xf32, #tpu.memory_space<vmem>>, vector<32x8xf32>
    %c0_8 = arith.constant 0 : index
    %c0_9 = arith.constant 0 : index
    %5 = vector.load %arg8[%c0_8, %c0_9] : memref<4x8xf32, #tpu.memory_space<vmem>>, vector<4x8xf32>
    %6 = arith.truncf %1 : vector<4x256xf32> to vector<4x256xbf16>
    %cst = arith.constant dense<0.000000e+00> : vector<32x256xf32>
    %7 = tpu.matmul %2, %6, %cst {dimension_numbers = #tpu.dot_dimension_numbers<[1], [0], [0], [1], [0, 0, 1, 1], [], []>} : vector<32x4xbf16>, vector<4x256xbf16>, vector<32x256xf32> -> vector<32x256xf32>
    %8 = vector.extract_strided_slice %4 {offsets = [0, 0], sizes = [32, 1], strides = [1, 1]} : vector<32x8xf32> to vector<32x1xf32>
    %9 = vector.broadcast %8 : vector<32x1xf32> to vector<32x256xf32>
    %10 = arith.addf %7, %9 : vector<32x256xf32>
    %11 = arith.negf %10 : vector<32x256xf32>
    %12 = math.exp %11 : vector<32x256xf32>
    %cst_10 = arith.constant 1.000000e+00 : f32
    %13 = vector.broadcast %cst_10 : f32 to vector<32x256xf32>
    %14 = arith.addf %13, %12 : vector<32x256xf32>
    %15 = arith.divf %13, %14 : vector<32x256xf32>
    %16 = arith.mulf %10, %15 : vector<32x256xf32>
    %17 = arith.truncf %16 : vector<32x256xf32> to vector<32x256xbf16>
    %cst_11 = arith.constant dense<0.000000e+00> : vector<4x256xf32>
    %18 = tpu.matmul %3, %17, %cst_11 {dimension_numbers = #tpu.dot_dimension_numbers<[1], [0], [0], [1], [0, 0, 1, 1], [], []>} : vector<4x32xbf16>, vector<32x256xbf16>, vector<4x256xf32> -> vector<4x256xf32>
    %c0_12 = arith.constant 0 : index
    %19 = memref.load %arg2[%c0_12] : memref<8xf32, #tpu.memory_space<smem>>
    %20 = vector.broadcast %19 : f32 to vector<4x256xf32>
    %21 = arith.mulf %20, %1 : vector<4x256xf32>
    %c0_13 = arith.constant 0 : index
    %22 = memref.load %arg3[%c0_13] : memref<8xf32, #tpu.memory_space<smem>>
    %23 = vector.broadcast %22 : f32 to vector<4x256xf32>
    %24 = arith.mulf %23, %18 : vector<4x256xf32>
    %25 = arith.addf %21, %24 : vector<4x256xf32>
    %26 = vector.extract_strided_slice %5 {offsets = [0, 0], sizes = [4, 1], strides = [1, 1]} : vector<4x8xf32> to vector<4x1xf32>
    %27 = vector.broadcast %26 : vector<4x1xf32> to vector<4x256xf32>
    %28 = arith.addf %25, %27 : vector<4x256xf32>
    %29 = arith.truncf %28 : vector<4x256xf32> to vector<4x256xbf16>
    %cst_14 = arith.constant dense<0.000000e+00> : vector<32x256xf32>
    %30 = tpu.matmul %2, %29, %cst_14 {dimension_numbers = #tpu.dot_dimension_numbers<[1], [0], [0], [1], [0, 0, 1, 1], [], []>} : vector<32x4xbf16>, vector<4x256xbf16>, vector<32x256xf32> -> vector<32x256xf32>
    %31 = vector.extract_strided_slice %4 {offsets = [0, 1], sizes = [32, 1], strides = [1, 1]} : vector<32x8xf32> to vector<32x1xf32>
    %32 = vector.broadcast %31 : vector<32x1xf32> to vector<32x256xf32>
    %33 = arith.addf %30, %32 : vector<32x256xf32>
    %34 = arith.negf %33 : vector<32x256xf32>
    %35 = math.exp %34 : vector<32x256xf32>
    %cst_15 = arith.constant 1.000000e+00 : f32
    %36 = vector.broadcast %cst_15 : f32 to vector<32x256xf32>
    %37 = arith.addf %36, %35 : vector<32x256xf32>
    %38 = arith.divf %36, %37 : vector<32x256xf32>
    %39 = arith.mulf %33, %38 : vector<32x256xf32>
    %40 = arith.truncf %39 : vector<32x256xf32> to vector<32x256xbf16>
    %cst_16 = arith.constant dense<0.000000e+00> : vector<4x256xf32>
    %41 = tpu.matmul %3, %40, %cst_16 {dimension_numbers = #tpu.dot_dimension_numbers<[1], [0], [0], [1], [0, 0, 1, 1], [], []>} : vector<4x32xbf16>, vector<32x256xbf16>, vector<4x256xf32> -> vector<4x256xf32>
    %c1 = arith.constant 1 : index
    %42 = memref.load %arg2[%c1] : memref<8xf32, #tpu.memory_space<smem>>
    %43 = vector.broadcast %42 : f32 to vector<4x256xf32>
    %44 = arith.mulf %43, %28 : vector<4x256xf32>
    %c1_17 = arith.constant 1 : index
    %45 = memref.load %arg3[%c1_17] : memref<8xf32, #tpu.memory_space<smem>>
    %46 = vector.broadcast %45 : f32 to vector<4x256xf32>
    %47 = arith.mulf %46, %41 : vector<4x256xf32>
    %48 = arith.addf %44, %47 : vector<4x256xf32>
    %49 = vector.extract_strided_slice %5 {offsets = [0, 1], sizes = [4, 1], strides = [1, 1]} : vector<4x8xf32> to vector<4x1xf32>
    %50 = vector.broadcast %49 : vector<4x1xf32> to vector<4x256xf32>
    %51 = arith.addf %48, %50 : vector<4x256xf32>
    %52 = arith.truncf %51 : vector<4x256xf32> to vector<4x256xbf16>
    %cst_18 = arith.constant dense<0.000000e+00> : vector<32x256xf32>
    %53 = tpu.matmul %2, %52, %cst_18 {dimension_numbers = #tpu.dot_dimension_numbers<[1], [0], [0], [1], [0, 0, 1, 1], [], []>} : vector<32x4xbf16>, vector<4x256xbf16>, vector<32x256xf32> -> vector<32x256xf32>
    %54 = vector.extract_strided_slice %4 {offsets = [0, 2], sizes = [32, 1], strides = [1, 1]} : vector<32x8xf32> to vector<32x1xf32>
    %55 = vector.broadcast %54 : vector<32x1xf32> to vector<32x256xf32>
    %56 = arith.addf %53, %55 : vector<32x256xf32>
    %57 = arith.negf %56 : vector<32x256xf32>
    %58 = math.exp %57 : vector<32x256xf32>
    %cst_19 = arith.constant 1.000000e+00 : f32
    %59 = vector.broadcast %cst_19 : f32 to vector<32x256xf32>
    %60 = arith.addf %59, %58 : vector<32x256xf32>
    %61 = arith.divf %59, %60 : vector<32x256xf32>
    %62 = arith.mulf %56, %61 : vector<32x256xf32>
    %63 = arith.truncf %62 : vector<32x256xf32> to vector<32x256xbf16>
    %cst_20 = arith.constant dense<0.000000e+00> : vector<4x256xf32>
    %64 = tpu.matmul %3, %63, %cst_20 {dimension_numbers = #tpu.dot_dimension_numbers<[1], [0], [0], [1], [0, 0, 1, 1], [], []>} : vector<4x32xbf16>, vector<32x256xbf16>, vector<4x256xf32> -> vector<4x256xf32>
    %c2 = arith.constant 2 : index
    %65 = memref.load %arg2[%c2] : memref<8xf32, #tpu.memory_space<smem>>
    %66 = vector.broadcast %65 : f32 to vector<4x256xf32>
    %67 = arith.mulf %66, %51 : vector<4x256xf32>
    %c2_21 = arith.constant 2 : index
    %68 = memref.load %arg3[%c2_21] : memref<8xf32, #tpu.memory_space<smem>>
    %69 = vector.broadcast %68 : f32 to vector<4x256xf32>
    %70 = arith.mulf %69, %64 : vector<4x256xf32>
    %71 = arith.addf %67, %70 : vector<4x256xf32>
    %72 = vector.extract_strided_slice %5 {offsets = [0, 2], sizes = [4, 1], strides = [1, 1]} : vector<4x8xf32> to vector<4x1xf32>
    %73 = vector.broadcast %72 : vector<4x1xf32> to vector<4x256xf32>
    %74 = arith.addf %71, %73 : vector<4x256xf32>
    %75 = arith.truncf %74 : vector<4x256xf32> to vector<4x256xbf16>
    %cst_22 = arith.constant dense<0.000000e+00> : vector<32x256xf32>
    %76 = tpu.matmul %2, %75, %cst_22 {dimension_numbers = #tpu.dot_dimension_numbers<[1], [0], [0], [1], [0, 0, 1, 1], [], []>} : vector<32x4xbf16>, vector<4x256xbf16>, vector<32x256xf32> -> vector<32x256xf32>
    %77 = vector.extract_strided_slice %4 {offsets = [0, 3], sizes = [32, 1], strides = [1, 1]} : vector<32x8xf32> to vector<32x1xf32>
    %78 = vector.broadcast %77 : vector<32x1xf32> to vector<32x256xf32>
    %79 = arith.addf %76, %78 : vector<32x256xf32>
    %80 = arith.negf %79 : vector<32x256xf32>
    %81 = math.exp %80 : vector<32x256xf32>
    %cst_23 = arith.constant 1.000000e+00 : f32
    %82 = vector.broadcast %cst_23 : f32 to vector<32x256xf32>
    %83 = arith.addf %82, %81 : vector<32x256xf32>
    %84 = arith.divf %82, %83 : vector<32x256xf32>
    %85 = arith.mulf %79, %84 : vector<32x256xf32>
    %86 = arith.truncf %85 : vector<32x256xf32> to vector<32x256xbf16>
    %cst_24 = arith.constant dense<0.000000e+00> : vector<4x256xf32>
    %87 = tpu.matmul %3, %86, %cst_24 {dimension_numbers = #tpu.dot_dimension_numbers<[1], [0], [0], [1], [0, 0, 1, 1], [], []>} : vector<4x32xbf16>, vector<32x256xbf16>, vector<4x256xf32> -> vector<4x256xf32>
    %c3 = arith.constant 3 : index
    %88 = memref.load %arg2[%c3] : memref<8xf32, #tpu.memory_space<smem>>
    %89 = vector.broadcast %88 : f32 to vector<4x256xf32>
    %90 = arith.mulf %89, %74 : vector<4x256xf32>
    %c3_25 = arith.constant 3 : index
    %91 = memref.load %arg3[%c3_25] : memref<8xf32, #tpu.memory_space<smem>>
    %92 = vector.broadcast %91 : f32 to vector<4x256xf32>
    %93 = arith.mulf %92, %87 : vector<4x256xf32>
    %94 = arith.addf %90, %93 : vector<4x256xf32>
    %95 = vector.extract_strided_slice %5 {offsets = [0, 3], sizes = [4, 1], strides = [1, 1]} : vector<4x8xf32> to vector<4x1xf32>
    %96 = vector.broadcast %95 : vector<4x1xf32> to vector<4x256xf32>
    %97 = arith.addf %94, %96 : vector<4x256xf32>
    %98 = arith.truncf %97 : vector<4x256xf32> to vector<4x256xbf16>
    %cst_26 = arith.constant dense<0.000000e+00> : vector<32x256xf32>
    %99 = tpu.matmul %2, %98, %cst_26 {dimension_numbers = #tpu.dot_dimension_numbers<[1], [0], [0], [1], [0, 0, 1, 1], [], []>} : vector<32x4xbf16>, vector<4x256xbf16>, vector<32x256xf32> -> vector<32x256xf32>
    %100 = vector.extract_strided_slice %4 {offsets = [0, 4], sizes = [32, 1], strides = [1, 1]} : vector<32x8xf32> to vector<32x1xf32>
    %101 = vector.broadcast %100 : vector<32x1xf32> to vector<32x256xf32>
    %102 = arith.addf %99, %101 : vector<32x256xf32>
    %103 = arith.negf %102 : vector<32x256xf32>
    %104 = math.exp %103 : vector<32x256xf32>
    %cst_27 = arith.constant 1.000000e+00 : f32
    %105 = vector.broadcast %cst_27 : f32 to vector<32x256xf32>
    %106 = arith.addf %105, %104 : vector<32x256xf32>
    %107 = arith.divf %105, %106 : vector<32x256xf32>
    %108 = arith.mulf %102, %107 : vector<32x256xf32>
    %109 = arith.truncf %108 : vector<32x256xf32> to vector<32x256xbf16>
    %cst_28 = arith.constant dense<0.000000e+00> : vector<4x256xf32>
    %110 = tpu.matmul %3, %109, %cst_28 {dimension_numbers = #tpu.dot_dimension_numbers<[1], [0], [0], [1], [0, 0, 1, 1], [], []>} : vector<4x32xbf16>, vector<32x256xbf16>, vector<4x256xf32> -> vector<4x256xf32>
    %c4 = arith.constant 4 : index
    %111 = memref.load %arg2[%c4] : memref<8xf32, #tpu.memory_space<smem>>
    %112 = vector.broadcast %111 : f32 to vector<4x256xf32>
    %113 = arith.mulf %112, %97 : vector<4x256xf32>
    %c4_29 = arith.constant 4 : index
    %114 = memref.load %arg3[%c4_29] : memref<8xf32, #tpu.memory_space<smem>>
    %115 = vector.broadcast %114 : f32 to vector<4x256xf32>
    %116 = arith.mulf %115, %110 : vector<4x256xf32>
    %117 = arith.addf %113, %116 : vector<4x256xf32>
    %118 = vector.extract_strided_slice %5 {offsets = [0, 4], sizes = [4, 1], strides = [1, 1]} : vector<4x8xf32> to vector<4x1xf32>
    %119 = vector.broadcast %118 : vector<4x1xf32> to vector<4x256xf32>
    %120 = arith.addf %117, %119 : vector<4x256xf32>
    %121 = arith.truncf %120 : vector<4x256xf32> to vector<4x256xbf16>
    %cst_30 = arith.constant dense<0.000000e+00> : vector<32x256xf32>
    %122 = tpu.matmul %2, %121, %cst_30 {dimension_numbers = #tpu.dot_dimension_numbers<[1], [0], [0], [1], [0, 0, 1, 1], [], []>} : vector<32x4xbf16>, vector<4x256xbf16>, vector<32x256xf32> -> vector<32x256xf32>
    %123 = vector.extract_strided_slice %4 {offsets = [0, 5], sizes = [32, 1], strides = [1, 1]} : vector<32x8xf32> to vector<32x1xf32>
    %124 = vector.broadcast %123 : vector<32x1xf32> to vector<32x256xf32>
    %125 = arith.addf %122, %124 : vector<32x256xf32>
    %126 = arith.negf %125 : vector<32x256xf32>
    %127 = math.exp %126 : vector<32x256xf32>
    %cst_31 = arith.constant 1.000000e+00 : f32
    %128 = vector.broadcast %cst_31 : f32 to vector<32x256xf32>
    %129 = arith.addf %128, %127 : vector<32x256xf32>
    %130 = arith.divf %128, %129 : vector<32x256xf32>
    %131 = arith.mulf %125, %130 : vector<32x256xf32>
    %132 = arith.truncf %131 : vector<32x256xf32> to vector<32x256xbf16>
    %cst_32 = arith.constant dense<0.000000e+00> : vector<4x256xf32>
    %133 = tpu.matmul %3, %132, %cst_32 {dimension_numbers = #tpu.dot_dimension_numbers<[1], [0], [0], [1], [0, 0, 1, 1], [], []>} : vector<4x32xbf16>, vector<32x256xbf16>, vector<4x256xf32> -> vector<4x256xf32>
    %c5 = arith.constant 5 : index
    %134 = memref.load %arg2[%c5] : memref<8xf32, #tpu.memory_space<smem>>
    %135 = vector.broadcast %134 : f32 to vector<4x256xf32>
    %136 = arith.mulf %135, %120 : vector<4x256xf32>
    %c5_33 = arith.constant 5 : index
    %137 = memref.load %arg3[%c5_33] : memref<8xf32, #tpu.memory_space<smem>>
    %138 = vector.broadcast %137 : f32 to vector<4x256xf32>
    %139 = arith.mulf %138, %133 : vector<4x256xf32>
    %140 = arith.addf %136, %139 : vector<4x256xf32>
    %141 = vector.extract_strided_slice %5 {offsets = [0, 5], sizes = [4, 1], strides = [1, 1]} : vector<4x8xf32> to vector<4x1xf32>
    %142 = vector.broadcast %141 : vector<4x1xf32> to vector<4x256xf32>
    %143 = arith.addf %140, %142 : vector<4x256xf32>
    %144 = arith.truncf %143 : vector<4x256xf32> to vector<4x256xbf16>
    %cst_34 = arith.constant dense<0.000000e+00> : vector<32x256xf32>
    %145 = tpu.matmul %2, %144, %cst_34 {dimension_numbers = #tpu.dot_dimension_numbers<[1], [0], [0], [1], [0, 0, 1, 1], [], []>} : vector<32x4xbf16>, vector<4x256xbf16>, vector<32x256xf32> -> vector<32x256xf32>
    %146 = vector.extract_strided_slice %4 {offsets = [0, 6], sizes = [32, 1], strides = [1, 1]} : vector<32x8xf32> to vector<32x1xf32>
    %147 = vector.broadcast %146 : vector<32x1xf32> to vector<32x256xf32>
    %148 = arith.addf %145, %147 : vector<32x256xf32>
    %149 = arith.negf %148 : vector<32x256xf32>
    %150 = math.exp %149 : vector<32x256xf32>
    %cst_35 = arith.constant 1.000000e+00 : f32
    %151 = vector.broadcast %cst_35 : f32 to vector<32x256xf32>
    %152 = arith.addf %151, %150 : vector<32x256xf32>
    %153 = arith.divf %151, %152 : vector<32x256xf32>
    %154 = arith.mulf %148, %153 : vector<32x256xf32>
    %155 = arith.truncf %154 : vector<32x256xf32> to vector<32x256xbf16>
    %cst_36 = arith.constant dense<0.000000e+00> : vector<4x256xf32>
    %156 = tpu.matmul %3, %155, %cst_36 {dimension_numbers = #tpu.dot_dimension_numbers<[1], [0], [0], [1], [0, 0, 1, 1], [], []>} : vector<4x32xbf16>, vector<32x256xbf16>, vector<4x256xf32> -> vector<4x256xf32>
    %c6 = arith.constant 6 : index
    %157 = memref.load %arg2[%c6] : memref<8xf32, #tpu.memory_space<smem>>
    %158 = vector.broadcast %157 : f32 to vector<4x256xf32>
    %159 = arith.mulf %158, %143 : vector<4x256xf32>
    %c6_37 = arith.constant 6 : index
    %160 = memref.load %arg3[%c6_37] : memref<8xf32, #tpu.memory_space<smem>>
    %161 = vector.broadcast %160 : f32 to vector<4x256xf32>
    %162 = arith.mulf %161, %156 : vector<4x256xf32>
    %163 = arith.addf %159, %162 : vector<4x256xf32>
    %164 = vector.extract_strided_slice %5 {offsets = [0, 6], sizes = [4, 1], strides = [1, 1]} : vector<4x8xf32> to vector<4x1xf32>
    %165 = vector.broadcast %164 : vector<4x1xf32> to vector<4x256xf32>
    %166 = arith.addf %163, %165 : vector<4x256xf32>
    %167 = arith.truncf %166 : vector<4x256xf32> to vector<4x256xbf16>
    %cst_38 = arith.constant dense<0.000000e+00> : vector<32x256xf32>
    %168 = tpu.matmul %2, %167, %cst_38 {dimension_numbers = #tpu.dot_dimension_numbers<[1], [0], [0], [1], [0, 0, 1, 1], [], []>} : vector<32x4xbf16>, vector<4x256xbf16>, vector<32x256xf32> -> vector<32x256xf32>
    %169 = vector.extract_strided_slice %4 {offsets = [0, 7], sizes = [32, 1], strides = [1, 1]} : vector<32x8xf32> to vector<32x1xf32>
    %170 = vector.broadcast %169 : vector<32x1xf32> to vector<32x256xf32>
    %171 = arith.addf %168, %170 : vector<32x256xf32>
    %172 = arith.negf %171 : vector<32x256xf32>
    %173 = math.exp %172 : vector<32x256xf32>
    %cst_39 = arith.constant 1.000000e+00 : f32
    %174 = vector.broadcast %cst_39 : f32 to vector<32x256xf32>
    %175 = arith.addf %174, %173 : vector<32x256xf32>
    %176 = arith.divf %174, %175 : vector<32x256xf32>
    %177 = arith.mulf %171, %176 : vector<32x256xf32>
    %178 = arith.truncf %177 : vector<32x256xf32> to vector<32x256xbf16>
    %cst_40 = arith.constant dense<0.000000e+00> : vector<4x256xf32>
    %179 = tpu.matmul %3, %178, %cst_40 {dimension_numbers = #tpu.dot_dimension_numbers<[1], [0], [0], [1], [0, 0, 1, 1], [], []>} : vector<4x32xbf16>, vector<32x256xbf16>, vector<4x256xf32> -> vector<4x256xf32>
    %c7 = arith.constant 7 : index
    %180 = memref.load %arg2[%c7] : memref<8xf32, #tpu.memory_space<smem>>
    %181 = vector.broadcast %180 : f32 to vector<4x256xf32>
    %182 = arith.mulf %181, %166 : vector<4x256xf32>
    %c7_41 = arith.constant 7 : index
    %183 = memref.load %arg3[%c7_41] : memref<8xf32, #tpu.memory_space<smem>>
    %184 = vector.broadcast %183 : f32 to vector<4x256xf32>
    %185 = arith.mulf %184, %179 : vector<4x256xf32>
    %186 = arith.addf %182, %185 : vector<4x256xf32>
    %187 = vector.extract_strided_slice %5 {offsets = [0, 7], sizes = [4, 1], strides = [1, 1]} : vector<4x8xf32> to vector<4x1xf32>
    %188 = vector.broadcast %187 : vector<4x1xf32> to vector<4x256xf32>
    %189 = arith.addf %186, %188 : vector<4x256xf32>
    %c0_42 = arith.constant 0 : index
    %c0_43 = arith.constant 0 : index
    %c0_44 = arith.constant 0 : index
    %190 = vector.load %arg9[%c0_42, %c0_43, %c0_44] : memref<1x4x256xf32, #tpu.memory_space<vmem>>, vector<1x4x256xf32>
    %191 = vector.shape_cast %190 : vector<1x4x256xf32> to vector<4x256xf32>
    %192 = vector.shape_cast %189 : vector<4x256xf32> to vector<1x4x256xf32>
    tpu.vector_store %arg9[%c0_42, %c0_43, %c0_44], %192 {strides = array<i32>} : memref<1x4x256xf32, #tpu.memory_space<vmem>>, vector<1x4x256xf32>,
    return
  }
  func.func @transform_0(%arg0: i32, %arg1: i32) -> i32 {
    %c0_i32 = arith.constant 0 : i32
    %c0_i32_0 = arith.constant 0 : i32
    return %c0_i32 : i32
  }
  func.func @transform_1(%arg0: i32, %arg1: i32) -> i32 {
    %c0_i32 = arith.constant 0 : i32
    %c0_i32_0 = arith.constant 0 : i32
    return %c0_i32 : i32
  }
  func.func @transform_2(%arg0: i32, %arg1: i32) -> (i32, i32, i32) {
    %c0_i32 = arith.constant 0 : i32
    %c0_i32_0 = arith.constant 0 : i32
    return %arg0, %c0_i32, %arg1 : i32, i32, i32
  }
  func.func @transform_3(%arg0: i32, %arg1: i32) -> (i32, i32) {
    %c0_i32 = arith.constant 0 : i32
    %c0_i32_0 = arith.constant 0 : i32
    %c0_i32_1 = arith.constant 0 : i32
    return %c0_i32, %c0_i32_0 : i32, i32
  }
  func.func @transform_4(%arg0: i32, %arg1: i32) -> (i32, i32) {
    %c0_i32 = arith.constant 0 : i32
    %c0_i32_0 = arith.constant 0 : i32
    %c0_i32_1 = arith.constant 0 : i32
    return %c0_i32, %c0_i32_0 : i32, i32
  }
  func.func @transform_5(%arg0: i32, %arg1: i32) -> (i32, i32) {
    %c0_i32 = arith.constant 0 : i32
    %c0_i32_0 = arith.constant 0 : i32
    %c0_i32_1 = arith.constant 0 : i32
    return %c0_i32, %c0_i32_0 : i32, i32
  }
  func.func @transform_6(%arg0: i32, %arg1: i32) -> (i32, i32) {
    %c0_i32 = arith.constant 0 : i32
    %c0_i32_0 = arith.constant 0 : i32
    %c0_i32_1 = arith.constant 0 : i32
    return %c0_i32, %c0_i32_0 : i32, i32
  }
  func.func @transform_7(%arg0: i32, %arg1: i32) -> (i32, i32, i32) {
    %c0_i32 = arith.constant 0 : i32
    %c0_i32_0 = arith.constant 0 : i32
    return %arg0, %c0_i32, %arg1 : i32, i32, i32
  }
}

</mosaic_0001>

<bundles_post_ra>
// kernel: sample.1
= control target key start
LH: loop header
LB: loop body
LE: loop exit
PB: predicated region body
PF: predicated region fallthrough
CT: control target
= control target key end

     0   :  { %12 = vsyncpa [#allocation4], 0  ;;  %s5722_s0 = inlined_call_operand.vmem [shape: f32[8], index: 0, kind: input, shape index: {}]   ;;  %s5723_s1 = inlined_call_operand.vmem [shape: f32[8], index: 1, kind: input, shape index: {}]   ;;  %s5724_s2 = inlined_call_operand.vmem [shape: f32[2,4,256], index: 2, kind: input, shape index: {}]   ;;  %s5725_s3 = inlined_call_operand.vmem [shape: bf16[32,4], index: 3, kind: input, shape index: {}]   ;;  %s5726_s4 = inlined_call_operand.vmem [shape: bf16[4,32], index: 4, kind: input, shape index: {}]   ;;  %s5727_s5 = inlined_call_operand.vmem [shape: f32[32,8], index: 5, kind: input, shape index: {}]   ;;  %s5728_s6 = inlined_call_operand.vmem [shape: f32[4,8], index: 6, kind: input, shape index: {}]   ;;  %s5729_s7 = inlined_call_operand.hbm [shape: f32[2,4,256], index: 7, kind: output, shape index: {}]  }
   0x1   :  { %13 = vsyncpa [#allocation6], 0 }
   0x2   :  { %14 = vsyncpa [#allocation3], 0 }
   0x3   :  { %16 = vsyncpa [#allocation3 + $0x1], 0  ;;  %s3438_s24 = smov 0   ;;  %s3440_s25 = smov 0  }
   0x4   :  { %s3442_s26 = smov 0   ;;  %s3444_s27 = smov 0  }
   0x5   :  { %s3446_s28 = smov 0   ;;  %s3448_s29 = smov 0  }
   0x6 LB: > { %s2733_s30 = sadd.s32 4294967295, %s3385_s29   ;;  %s2734_s8 = sadd.s32 4294967294, %s3385_s29   ;;  %s3385_s29 = sphi %s3448_s29, %s22_s29   ;;  %s3381_s28 = sphi %s3446_s28, %s5982_s28   ;;  %s3377_s27 = sphi %s3444_s27, %s5981_s27   ;;  %s3373_s26 = sphi %s3442_s26, %s5980_s26   ;;  %s3369_s25 = sphi %s3440_s25, %s5979_s25   ;;  %s3365_s24 = sphi %s3438_s24, %s5978_s24  }
   0x7   : > { %s34_s9 = sadd.s32 1, %s3381_s28  ;;  %s197_s10 = sadd.s32 1, %s3373_s26 }
   0x8   : > { %p36_p0 = scmp.ge.s32.totalorder %s34_s9, 2  ;;  %p207_p1 = scmp.ne.s32.totalorder %s3373_s26, %s3369_s25 }
   0x9   : > { %p208_p2 = scmp.eq.s32.totalorder %s2733_s30, 1  ;;  %p213_p3 = scmp.ne.s32.totalorder %s3369_s25, %s3365_s24 }
   0xa   : > { %s5984_s9 = smov (%p36_p0, %s34_s9), 0  ;;  %p214_p5 = scmp.eq.s32.totalorder %s2734_s8, 1 }
   0xb   : > { %p3478_p4 = por %p208_p2, %p207_p1  ;;  %s192_s12 = ssub.s32 %s3381_s28, %s5984_s9 }
   0xc   : > { %p2735_p6 = scmp.ge.s32.totalorder %s3385_s29, 1  ;;  %p195_p7 = scmp.eq.s32.totalorder %s192_s12, 0 }
   0xd   : > { %p3485_p8 = por %p214_p5, %p213_p3  ;;  %p221_p9 = scmp.lt.s32.totalorder %s3385_s29, 3 }
   0xe   : > { %s3491_s14 = scalar_select %p195_p7, %s3373_s26, %s197_s10  }
   0xf   : > { %p222_p10 = pnand %p2735_p6, %p221_p9  ;;  %p3493_p11 = scmp.eq.s32.totalorder %s2733_s30, 0 }
  0x10   : > { %s233_s18 = sshll.u32 %s5722_s0, 4  ;;  %s243_s21 = sshll.u32 %s5723_s1, 4  ;;  %s234_s18 = int_to_ptr.vmem [resolvable:$true] %s233_s18  ;;  %s244_s21 = int_to_ptr.vmem [resolvable:$true] %s243_s21 }
  0x11   : > { %p2898_p12 = pneg %p222_p10  ;;  %s3387_s22 = smov [#allocation2]  }
  0x12   : > { %s3388_s23 = smov [#allocation5]   ;;  %281 = sbr.rel (%p222_p10) target bundleno = 2845 (0xb1d), region = 48 }
  0x13   : > { %p2899_p13 = pnand %p3493_p11, %p2898_p12 }
  0x15   : > { %2901 = dma.vmem_to_smem (!%p2899_p13), %s234_s18, 16, %s3387_s22, [#allocation4]  }
  0x16   : > { %2904 = dma.vmem_to_smem (!%p2899_p13), %s244_s21, 16, %s3388_s23, [#allocation6]  }
  0x17   : > { %3352 = dma.done.wait (%p3493_p11), [#allocation4], 16  }
  0x18   : > { %3354 = vsyncadd (%p3493_p11), [#allocation4], 4294967280 }
  0x19   : > { %3356 = dma.done.wait (%p3493_p11), [#allocation6], 16  }
  0x1a   : > { %3358 = vsyncadd (%p3493_p11), [#allocation6], 4294967280 }
  0x1b   : > { %293 = sfence }
  0x1c   : > { %p325_p0 = scmp.lt.s32.totalorder %s3377_s27, 1  ;;  %v3517_v0 = vld [vmem:[%s5727_s5] sm:$0xff]  ;;  %v3389_v1 = vmov 0   ;;  %v3527_v2 = vld [vmem:[%s5727_s5 + $0x10] sm:$0xff]  ;;  %v3536_v4 = vld [vmem:[%s5727_s5 + $0x8] sm:$0xff]  ;;  %vm5731_vm0 = vcmask 1041408  }
  0x1d   : > { %2974 = vset.pattern.permute.xlu1 %v3389_v1  ;;  %2973 = vset.pattern.permute.xlu0 %v3389_v1  ;;  %v3542_v5 = vld [vmem:[%s5727_s5 + $0x18] sm:$0xff]  ;;  %v3550_v12 = vld [vmem:[%s5725_s3] sm:$0xff]  ;;  %vm5730_vm1 = vcmask 31744   ;;  %v3559_v13 = vld [vmem:[%s5725_s3 + $0x8] sm:$0xff]  ;;  %s634_s19 = sld [smem:[#allocation5]] }
  0x1e   : > { %s326_s10 = scalar_select %p325_p0, %s3377_s27, 1  ;;  %357 = vperm.xlu1 %2974, %v3517_v0   ;;  %2975 = vset.pattern.permute.xlu2 %v3389_v1 }
  0x1f   : > { %367 = vperm.xlu0 %2973, %v3527_v2   ;;  %s631_s20 = sld [smem:[#allocation2]] }
  0x20   : > { %s2884_s12 = sshll.u32 %s326_s10, 3  ;;  %s2782_s21 = sld [smem:[#allocation5 + $0x1]] }
  0x21   : > { %s332_s17 = scalar_lea.vmem %s5724_s2, %s2884_s12  ;;  %s2781_s22 = sld [smem:[#allocation2 + $0x1]] }
  0x22   : > { %v3529_v3 = vld [vmem:[%s332_s17] sm:$0xff]  ;;  %s2798_s23 = sld [smem:[#allocation5 + $0x2]] }
  0x23   : > { %348 = vst [vmem:[#allocation1] ss:$2 sm:$0xff] %v3529_v3  ;;  %s2797_s30 = sld [smem:[#allocation2 + $0x2]] }
  0x24   : > { %s2814_s16 = sld [smem:[#allocation5 + $0x3]] }
  0x25   : > { %s2813_s15 = sld [smem:[#allocation2 + $0x3]] }
  0x26   : > { %362 = vperm.xlu1 %2974, %v3536_v4   ;;  %s2830_s17 = sld [smem:[#allocation5 + $0x4]] }
  0x27   : > { %372 = vperm.xlu0 %2973, %v3542_v5   ;;  %s2829_s18 = sld [smem:[#allocation2 + $0x4]] }
  0x28   : > { %s2861_s8 = sld [smem:[#allocation2 + $0x6]] }
  0x29   : > { %s2878_s10 = sld [smem:[#allocation5 + $0x7]] }
  0x2a   : > { %v349_v6 = vld.sshfl [vmem:[#allocation1] sm:$0xff pattern:$0x75316420]  ;;  %v350_v7 = vld.sshfl [vmem:[#allocation1 + $0x8] sm:$0xff pattern:$0x75316420] }
  0x2b   : > { %v353_v8 = vpack.c.bf16 %v349_v6, %v349_v6  ;;  %v354_v9 = vpack.c.bf16 %v350_v7, %v350_v7  ;;  %s2877_s12 = sld [smem:[#allocation2 + $0x7]] }
  0x2d   : > { %v394_v10 = vsel %vm5731_vm0, %v353_v8, 0  ;;  %v397_v11 = vsel %vm5731_vm0, %v354_v9, 0 }
  0x2e   : > { %406 = vmatpush.bf16.msra.mxu0 %v394_v10  ;;  %425 = vmatpush.bf16.msra.mxu1 %v397_v11 }
  0x31   : > { %2753 = vmatmul.msk.bf16.vlgmr.msra.gmra.mxu0 %vm5730_vm1, %v3550_v12  ;;  %2755 = vmatmul.msk.bf16.vlgmr.msra.gmra.mxu1 %vm5730_vm1, %v3550_v12 }
  0x41   : > { %2754 = vmatmul.msk.bf16.gmra.mxu0 %vm5730_vm1, %v3559_v13  ;;  %2756 = vmatmul.msk.bf16.gmra.mxu1 %vm5730_vm1, %v3559_v13 }
  0x90   : > { %v358_v14 = vpop.permute.xlu1 %357 }
  0x91   : > { %v368_v31 = vpop.permute.xlu0 %367 }
  0x98   : > { %v363_v21 = vpop.permute.xlu1 %362 }
  0x99   : > { %v373_v47 = vpop.permute.xlu0 %372 }
  0xae   : > { %v408_v15 = vpop.f32.mrf.mxu0  ;;  %v427_v16 = vpop.f32.mrf.mxu1 }
  0xaf   : > { %v3565_v17 = vadd.f32 %v408_v15, %v358_v14  ;;  %v3567_v18 = vadd.f32 %v427_v16, %v358_v14 }
  0xb1   : > { %v2757_v19 = vmul.f32 -1.442695, %v3565_v17  ;;  %v2758_v20 = vmul.f32 -1.442695, %v3567_v18 }
  0xb3   : > { %2997 = vpow2.f32 %v2757_v19 }
  0xb4   : > { %2999 = vpow2.f32 %v2758_v20  ;;  %v3641_v20 = vld [vmem:[%s5728_s6] sm:$0xf] }
  0xb5   : > { %647 = vperm.xlu2 %2975, %v3641_v20  }
  0xb6   : > { %v410_v22 = vpop.f32.mrf.mxu0  ;;  %v429_v23 = vpop.f32.mrf.mxu1 }
  0xb7   : > { %v3571_v24 = vadd.f32 %v410_v22, %v363_v21  ;;  %v3573_v25 = vadd.f32 %v429_v23, %v363_v21 }
  0xb9   : > { %v2759_v26 = vmul.f32 -1.442695, %v3571_v24  ;;  %v2998_v27 = vpop.eup %2997  ;;  %v2760_v28 = vmul.f32 -1.442695, %v3573_v25 }
  0xba   : > { %v3000_v29 = vpop.eup %2999  ;;  %v3577_v30 = vadd.f32 1.0, %v2998_v27 }
  0xbb   : > { %3001 = vpow2.f32 %v2759_v26  ;;  %v3579_v32 = vadd.f32 1.0, %v3000_v29 }
  0xbc   : > { %3003 = vpow2.f32 %v2760_v28  ;;  %vm474_vm2 = vweird.f32 %v3577_v30  ;;  %v478_v1 = vand.u32 2147483647, %v3577_v30  ;;  %v480_v9 = vand.u32 2147483648, %v3577_v30 }
  0xbd   : > { %3005 = vrcp.f32 %v3577_v30  ;;  %vm489_vm3 = vweird.f32 %v3579_v32  ;;  %v493_v14 = vand.u32 2147483647, %v3579_v32  ;;  %v495_v22 = vand.u32 2147483648, %v3579_v32 }
  0xbe   : > { %v413_v33 = vpop.f32.mrf.mxu0  ;;  %v432_v34 = vpop.f32.mrf.mxu1  ;;  %3007 = vrcp.f32 %v3579_v32 }
  0xbf   : > { %v3581_v35 = vadd.f32 %v413_v33, %v368_v31  ;;  %v3583_v36 = vadd.f32 %v432_v34, %v368_v31  ;;  %v3656_v33 = vor.u32 1.1754944e-38, %v480_v9 }
  0xc1   : > { %v3002_v37 = vpop.eup %3001  ;;  %v2761_v38 = vmul.f32 -1.442695, %v3581_v35  ;;  %v2762_v39 = vmul.f32 -1.442695, %v3583_v36 }
  0xc2   : > { %v3004_v40 = vpop.eup %3003  ;;  %v3589_v41 = vadd.f32 1.0, %v3002_v37 }
  0xc3   : > { %3009 = vpow2.f32 %v2761_v38  ;;  %v3591_v44 = vpop.eup %3005  ;;  %v3593_v45 = vadd.f32 1.0, %v3004_v40 }
  0xc4   : > { %3011 = vpow2.f32 %v2762_v39  ;;  %v3595_v46 = vpop.eup %3007  ;;  %v470_v54 = vmul.f32 %v3591_v44, %v3577_v30  ;;  %v510_v23 = vand.u32 2147483648, %v3589_v41  ;;  %vm475_vm4 = vweird.f32 %v3591_v44 }
  0xc5   : > { %3013 = vrcp.f32 %v3589_v41  ;;  %v485_v55 = vmul.f32 %v3595_v46, %v3579_v32  ;;  %v525_v28 = vand.u32 2147483648, %v3593_v45  ;;  %vm490_vm5 = vweird.f32 %v3595_v46  ;;  %vm3666_vm6 = vmor %vm474_vm2, %vm475_vm4 }
  0xc6   : > { %v415_v42 = vpop.f32.mrf.mxu0  ;;  %v434_v43 = vpop.f32.mrf.mxu1  ;;  %3015 = vrcp.f32 %v3593_v45  ;;  %v471_v59 = vsub.f32 1.0, %v470_v54  ;;  %vm504_vm7 = vweird.f32 %v3589_v41  ;;  %vm3677_vm8 = vmor %vm489_vm3, %vm490_vm5  ;;  %vm519_vm9 = vweird.f32 %v3593_v45 }
  0xc7   : > { %v3598_v49 = vadd.f32 %v415_v42, %v373_v47  ;;  %v3600_v50 = vadd.f32 %v434_v43, %v373_v47  ;;  %v486_v60 = vsub.f32 1.0, %v485_v55  ;;  %v508_v42 = vand.u32 2147483647, %v3589_v41 }
  0xc8   : > { %v472_v8 = vmul.f32 %v3591_v44, %v471_v59  ;;  %v3672_v43 = vor.u32 1.1754944e-38, %v510_v23  ;;  %v523_v30 = vand.u32 2147483647, %v3593_v45  ;;  %vm3715_vm3 = vcmp.eq.f32.partialorder %v478_v1, 8.507059e+37 }
  0xc9   : > { %v3010_v48 = vpop.eup %3009  ;;  %v2763_v52 = vmul.f32 -1.442695, %v3598_v49  ;;  %v2764_v56 = vmul.f32 -1.442695, %v3600_v50  ;;  %v487_v10 = vmul.f32 %v3595_v46, %v486_v60  ;;  %vm3701_vm13 = vcmp.eq.f32.partialorder %v508_v42, 8.507059e+37 }
  0xca   : > { %v3602_v51 = vadd.f32 1.0, %v3010_v48  ;;  %v3012_v53 = vpop.eup %3011  ;;  %v3654_v31 = vadd.f32 %v3591_v44, %v472_v8  ;;  %vm3727_vm5 = vcmp.eq.f32.partialorder %v523_v30, 8.507059e+37  ;;  %v632_v48 = vstv %s631_s20  ;;  %s2845_s20 = sld [smem:[#allocation2 + $0x5]] }
  0xcb   : > { %v3612_v57 = vadd.f32 1.0, %v3012_v53  ;;  %v3614_v58 = vpop.eup %3013  ;;  %v3659_v34 = vadd.f32 %v3595_v46, %v487_v10 }
  0xcc   : > { %3017 = vrcp.f32 %v3602_v51  ;;  %v3617_v61 = vpop.eup %3015  ;;  %v500_v62 = vmul.f32 %v3614_v58, %v3589_v41  ;;  %v538_v53 = vand.u32 2147483647, %v3602_v51  ;;  %v540_v54 = vand.u32 2147483648, %v3602_v51 }
  0xcd   : > { %3019 = vpow2.f32 %v2763_v52  ;;  %v515_v16 = vmul.f32 %v3617_v61, %v3593_v45  ;;  %v3683_v52 = vor.u32 1.1754944e-38, %v525_v28  ;;  %v477_v55 = vsel %vm3666_vm6, %v3591_v44, %v3654_v31 }
  0xce   : > { %3021 = vrcp.f32 %v3612_v57  ;;  %v501_v15 = vsub.f32 1.0, %v500_v62  ;;  %vm505_vm10 = vweird.f32 %v3614_v58  ;;  %vm520_vm11 = vweird.f32 %v3617_v61 }
  0xcf   : > { %3023 = vpow2.f32 %v2764_v56  ;;  %v516_v38 = vsub.f32 1.0, %v515_v16  ;;  %v492_v56 = vsel %vm3677_vm8, %v3595_v46, %v3659_v34  ;;  %vm534_vm12 = vweird.f32 %v3602_v51  ;;  %vm3723_vm4 = vmor %vm504_vm7, %vm505_vm10 }
  0xd0   : > { %v502_v37 = vmul.f32 %v3614_v58, %v501_v15  ;;  %vm549_vm15 = vweird.f32 %v3612_v57  ;;  %vm3709_vm2 = vcmp.eq.f32.partialorder %v538_v53, 8.507059e+37  ;;  %v541_v16 = vor.u32 1.1754944e-38, %v540_v54 }
  0xd1   : > { %v555_v23 = vand.u32 2147483648, %v3612_v57  ;;  %vm3750_vm10 = vcmp.eq.f32.partialorder %v493_v14, 8.507059e+37  ;;  %v635_v34 = vstv %s634_s19  ;;  %vm5732_vm6 = vcmask 1043456   ;;  %s2846_s19 = sld [smem:[#allocation5 + $0x5]] }
  0xd2   : > { %v3621_v63 = vpop.eup %3017  ;;  %v503_v62 = vadd.f32 %v3614_v58, %v502_v37  ;;  %vm5761_vm8 = vcmask 1041408  }
  0xd3   : > { %v530_v6 = vmul.f32 %v3621_v63, %v3602_v51  ;;  %v3020_v7 = vpop.eup %3019  ;;  %vm535_vm14 = vweird.f32 %v3621_v63 }
  0xd4   : > { %v3631_v11 = vpop.eup %3021  ;;  %v3636_v19 = vadd.f32 1.0, %v3020_v7  ;;  %vm3742_vm7 = vmor %vm534_vm12, %vm535_vm14 }
  0xd5   : > { %v3024_v21 = vpop.eup %3023  ;;  %v531_v26 = vsub.f32 1.0, %v530_v6  ;;  %v545_v27 = vmul.f32 %v3631_v11, %v3612_v57  ;;  %v517_v6 = vmul.f32 %v3617_v61, %v516_v38  ;;  %vm550_vm1 = vweird.f32 %v3631_v11 }
  0xd6   : > { %3025 = vrcp.f32 %v3636_v19  ;;  %v3651_v29 = vadd.f32 1.0, %v3024_v21  ;;  %v553_v21 = vand.u32 2147483647, %v3612_v57  ;;  %v570_v30 = vand.u32 2147483648, %v3636_v19  ;;  %vm3760_vm14 = vmor %vm549_vm15, %vm550_vm1 }
  0xd7   : > { %v546_v39 = vsub.f32 1.0, %v545_v27  ;;  %v532_v47 = vmul.f32 %v3621_v63, %v531_v26  ;;  %v518_v41 = vadd.f32 %v3617_v61, %v517_v6  ;;  %vm564_vm12 = vweird.f32 %v3636_v19 }
  0xd8   : > { %3027 = vrcp.f32 %v3651_v29  ;;  %vm3764_vm0 = vcmp.eq.f32.partialorder %v553_v21, 8.507059e+37  ;;  %v585_v6 = vand.u32 2147483648, %v3651_v29  ;;  %v571_v45 = vor.u32 1.1754944e-38, %v570_v30 }
  0xd9   : > { %v547_v59 = vmul.f32 %v3631_v11, %v546_v39  ;;  %v533_v8 = vadd.f32 %v3621_v63, %v532_v47  ;;  %v507_v39 = vsel %vm3723_vm4, %v3614_v58, %v503_v62  ;;  %v568_v47 = vand.u32 2147483647, %v3636_v19 }
  0xda   : > { %v583_v62 = vand.u32 2147483647, %v3651_v29  ;;  %v556_v27 = vor.u32 1.1754944e-38, %v555_v23 }
  0xdb   : > { %v548_v38 = vadd.f32 %v3631_v11, %v547_v59  ;;  %v537_v58 = vsel %vm3742_vm7, %v3621_v63, %v533_v8  ;;  %vm3774_vm7 = vmor %vm519_vm9, %vm520_vm11  ;;  %vm569_vm9 = vcmp.eq.f32.partialorder %v568_v47, 8.507059e+37  ;;  %vm579_vm11 = vweird.f32 %v3651_v29 }
  0xdc   : > { %v3026_v60 = vpop.eup %3025  ;;  %v542_v21 = vsel %vm3709_vm2, %v541_v16, %v537_v58  ;;  %vm584_vm2 = vcmp.eq.f32.partialorder %v583_v62, 8.507059e+37 }
  0xdd   : > { %v560_v9 = vmul.f32 %v3026_v60, %v3636_v19  ;;  %vm565_vm4 = vweird.f32 %v3026_v60  ;;  %v552_v19 = vsel %vm3760_vm14, %v3631_v11, %v548_v38  ;;  %v512_v11 = vsel %vm3701_vm13, %v3672_v43, %v507_v39  ;;  %vm5762_vm13 = vmmov %vm5761_vm8 }
  0xde   : > { %v3028_v10 = vpop.eup %3027  ;;  %vm566_vm15 = vmor %vm564_vm12, %vm565_vm4  ;;  %v557_v42 = vsel %vm3764_vm0, %v556_v27, %v552_v19  ;;  %v593_v15 = vmul.f32 %v542_v21, %v3581_v35  ;;  %v496_v43 = vor.u32 1.1754944e-38, %v495_v22  ;;  %vm5733_vm0 = vcmask 261120  }
  0xdf   : > { %v561_v37 = vsub.f32 1.0, %v560_v9  ;;  %v575_v1 = vmul.f32 %v3028_v10, %v3651_v29  ;;  %vm580_vm1 = vweird.f32 %v3028_v10  ;;  %v522_v9 = vsel %vm3774_vm7, %v3617_v61, %v518_v41 }
  0xe0   : > { %vm581_vm14 = vmor %vm579_vm11, %vm580_vm1  ;;  %v586_v61 = vor.u32 1.1754944e-38, %v585_v6  ;;  %v482_v29 = vsel %vm3715_vm3, %v3656_v33, %v477_v55  ;;  %v527_v35 = vsel %vm3727_vm5, %v3683_v52, %v522_v9  ;;  %v594_v40 = vmul.f32 %v557_v42, %v3583_v36  ;;  %v3823_v33 = vld [vmem:[%s5726_s4] sm:$0x3] }
  0xe1   : > { %v562_v54 = vmul.f32 %v3026_v60, %v561_v37  ;;  %v576_v51 = vsub.f32 1.0, %v575_v1  ;;  %v497_v32 = vsel %vm3750_vm10, %v496_v43, %v492_v56  ;;  %v589_v44 = vmul.f32 %v482_v29, %v3565_v17 }
  0xe2   : > { %v592_v22 = vmul.f32 %v527_v35, %v3573_v25  ;;  %v3390_v17 = vmov 1   ;;  %v633_v39 = vmul.f32 %v632_v48, %v3529_v3  ;;  %vm5763_vm3 = vcmask 31744  }
  0xe3   : > { %v563_v57 = vadd.f32 %v3026_v60, %v562_v54  ;;  %v577_v8 = vmul.f32 %v3028_v10, %v576_v51  ;;  %2978 = vset.pattern.permute.xlu1 %v3390_v17  ;;  %2976 = vset.pattern.permute.xlu2 %v3390_v17  ;;  %vm5764_vm5 = vmmov %vm5763_vm3 }
  0xe4   : > { %664 = vperm.xlu1 %2978, %v3517_v0   ;;  %2977 = vset.pattern.permute.xlu0 %v3390_v17  ;;  %vm5765_vm10 = vmmov %vm5763_vm3 }
  0xe5   : > { %v567_v37 = vsel %vm566_vm15, %v3026_v60, %v563_v57  ;;  %v578_v1 = vadd.f32 %v3028_v10, %v577_v8  ;;  %672 = vperm.xlu2 %2976, %v3527_v2   ;;  %676 = vperm.xlu0 %2977, %v3542_v5   ;;  %vm5766_vm4 = vmmov %vm5763_vm3 }
  0xe6   : > { %v572_v38 = vsel %vm569_vm9, %v571_v45, %v567_v37 }
  0xe7   : > { %v595_v16 = vmul.f32 %v572_v38, %v3598_v49  ;;  %v582_v23 = vsel %vm581_vm14, %v3028_v10, %v578_v1  ;;  %v591_v49 = vmul.f32 %v512_v11, %v3571_v24  ;;  %v590_v24 = vmul.f32 %v497_v32, %v3567_v18 }
  0xe8   : > { %v587_v60 = vsel %vm584_vm2, %v586_v61, %v582_v23  ;;  %v3391_v18 = vmov 839922192  }
  0xe9   : > { %v599_v7 = vpack.c.bf16 %v595_v16, %v593_v15  ;;  %v596_v10 = vmul.f32 %v587_v60, %v3600_v50  ;;  %v597_v36 = vpack.c.bf16 %v591_v49, %v589_v44  ;;  %v598_v50 = vpack.c.bf16 %v592_v22, %v590_v24 }
  0xea   : > { %v650_v25 = vunpack.c.l.s4 %v3391_v18 }
  0xeb   : > { %611 = vmatpush.bf16.msra.mxu2 %v599_v7  ;;  %v600_v31 = vpack.c.bf16 %v596_v10, %v594_v40 }
  0xec   : > { %v3832_v55 = vunpack.c.0.s8 %v650_v25  ;;  %927 = vperm.xlu1 %2978, %v3641_v20  }
  0xed   : > { %624 = vmatpush.bf16.msra.mxu3 %v600_v31  ;;  %668 = vperm.xlu2 %2976, %v3536_v4  }
  0xef   : > { %612 = vmatpush.bf16.msra.mxu2 %v597_v36 }
  0xf1   : > { %625 = vmatpush.bf16.msra.mxu3 %v598_v50 }
  0xf2   : > { %2765 = vmatmul.msk.bf16.vlgmr.msra.gmra.mxu2 %vm5733_vm0, %v3823_v33 }
  0xf4   : > { %2766 = vmatmul.msk.bf16.vlgmr.msra.gmra.mxu3 %vm5733_vm0, %v3823_v33 }
 0x10f   : > { %v648_v28 = vpop.permute.xlu2 %647 }
 0x110   : > { %v652_v47 = vperm.slane %v648_v28, %v3832_v55 }
 0x13f   : > { %v673_v57 = vpop.permute.xlu2 %672 }
 0x147   : > { %v669_v37 = vpop.permute.xlu2 %668 }
 0x156   : > { %v665_v19 = vpop.permute.xlu1 %664 }
 0x157   : > { %v677_v22 = vpop.permute.xlu0 %676 }
 0x175   : > { %v614_v46 = vpop.f32.mrf.mxu2 }
 0x176   : > { %v636_v56 = vmul.f32 %v635_v34, %v614_v46 }
 0x177   : > { %v627_v52 = vpop.f32.mrf.mxu3 }
 0x178   : > { %v637_v26 = vmul.f32 %v635_v34, %v627_v52 }
 0x17a   : > { %v640_v41 = vrot.slane %v637_v26, 4 }
 0x17c   : > { %v642_v30 = vsel %vm5732_vm6, %v636_v56, %v640_v41 }
 0x17d   : > { %v644_v53 = vadd.f32 %v642_v30, %v633_v39  ;;  %v616_v58 = vpop.f32.mrf.mxu2 }
 0x17f   : > { %v3839_v54 = vadd.f32 %v652_v47, %v644_v53  ;;  %v629_v51 = vpop.f32.mrf.mxu3 }
 0x181   : > { %656 = vst [vmem:[#allocation1] ss:$2 sm:$0xff] %v3839_v54 }
 0x188   : > { %v657_v59 = vld.sshfl [vmem:[#allocation1] sm:$0xff pattern:$0x75316420]  ;;  %v658_v14 = vld.sshfl [vmem:[#allocation1 + $0x8] sm:$0xff pattern:$0x75316420] }
 0x189   : > { %v661_v62 = vpack.c.bf16 %v657_v59, %v657_v59  ;;  %v662_v3 = vpack.c.bf16 %v658_v14, %v658_v14 }
 0x18b   : > { %v680_v6 = vsel %vm5761_vm8, %v661_v62, 0  ;;  %v683_v63 = vsel %vm5762_vm13, %v662_v3, 0 }
 0x18c   : > { %692 = vmatpush.bf16.msrb.mxu2 %v680_v6  ;;  %711 = vmatpush.bf16.msrb.mxu3 %v683_v63 }
 0x18f   : > { %2767 = vmatmul.msk.bf16.vlgmr.msrb.gmra.mxu2 %vm5763_vm3, %v3550_v12  ;;  %2769 = vmatmul.msk.bf16.vlgmr.msrb.gmra.mxu3 %vm5764_vm5, %v3550_v12 }
 0x19f   : > { %2768 = vmatmul.msk.bf16.gmra.mxu2 %vm5765_vm10, %v3559_v13  ;;  %2770 = vmatmul.msk.bf16.gmra.mxu3 %vm5766_vm4, %v3559_v13 }
 0x212   : > { %v694_v8 = vpop.f32.mrf.mxu2  ;;  %v713_v9 = vpop.f32.mrf.mxu3 }
 0x213   : > { %v3852_v21 = vadd.f32 %v694_v8, %v665_v19  ;;  %v3854_v45 = vadd.f32 %v713_v9, %v665_v19 }
 0x215   : > { %v2771_v27 = vmul.f32 -1.442695, %v3852_v21  ;;  %v2772_v38 = vmul.f32 -1.442695, %v3854_v45 }
 0x217   : > { %3029 = vpow2.f32 %v2771_v27 }
 0x218   : > { %3031 = vpow2.f32 %v2772_v38 }
 0x21a   : > { %v696_v1 = vpop.f32.mrf.mxu2  ;;  %v715_v11 = vpop.f32.mrf.mxu3 }
 0x21b   : > { %v3858_v42 = vadd.f32 %v696_v1, %v669_v37  ;;  %v3860_v61 = vadd.f32 %v715_v11, %v669_v37 }
 0x21d   : > { %v2773_v15 = vmul.f32 -1.442695, %v3858_v42  ;;  %v2774_v16 = vmul.f32 -1.442695, %v3860_v61  ;;  %v3030_v23 = vpop.eup %3029 }
 0x21e   : > { %v3032_v49 = vpop.eup %3031  ;;  %v3868_v7 = vadd.f32 1.0, %v3030_v23 }
 0x21f   : > { %3033 = vpow2.f32 %v2773_v15  ;;  %v3872_v44 = vadd.f32 1.0, %v3032_v49 }
 0x220   : > { %3035 = vpow2.f32 %v2774_v16  ;;  %vm760_vm12 = vweird.f32 %v3868_v7  ;;  %v764_v8 = vand.u32 2147483647, %v3868_v7  ;;  %v766_v9 = vand.u32 2147483648, %v3868_v7 }
 0x221   : > { %v779_v16 = vand.u32 2147483647, %v3872_v44  ;;  %v781_v23 = vand.u32 2147483648, %v3872_v44  ;;  %vm775_vm3 = vweird.f32 %v3872_v44 }
 0x222   : > { %v699_v29 = vpop.f32.mrf.mxu2  ;;  %v718_v43 = vpop.f32.mrf.mxu3  ;;  %vm3980_vm10 = vcmp.eq.f32.partialorder %v764_v8, 8.507059e+37 }
 0x223   : > { %v3864_v35 = vadd.f32 %v699_v29, %v673_v57  ;;  %v3866_v60 = vadd.f32 %v718_v43, %v673_v57 }
 0x225   : > { %v2775_v40 = vmul.f32 -1.442695, %v3864_v35  ;;  %v2776_v10 = vmul.f32 -1.442695, %v3866_v60  ;;  %v3034_v32 = vpop.eup %3033 }
 0x226   : > { %v3036_v24 = vpop.eup %3035  ;;  %v3875_v36 = vadd.f32 1.0, %v3034_v32 }
 0x227   : > { %3037 = vpow2.f32 %v2775_v40  ;;  %v3880_v25 = vadd.f32 1.0, %v3036_v24 }
 0x228   : > { %3039 = vrcp.f32 %v3868_v7  ;;  %v796_v27 = vand.u32 2147483648, %v3875_v36  ;;  %vm790_vm1 = vweird.f32 %v3875_v36  ;;  %v794_v32 = vand.u32 2147483647, %v3875_v36 }
 0x229   : > { %3041 = vpow2.f32 %v2776_v10  ;;  %v811_v43 = vand.u32 2147483648, %v3880_v25  ;;  %v3937_v10 = vor.u32 1.1754944e-38, %v766_v9  ;;  %vm805_vm11 = vweird.f32 %v3880_v25 }
 0x22a   : > { %v701_v31 = vpop.f32.mrf.mxu2  ;;  %3043 = vrcp.f32 %v3872_v44  ;;  %v720_v18 = vpop.f32.mrf.mxu3  ;;  %v797_v24 = vor.u32 1.1754944e-38, %v796_v27  ;;  %vm3968_vm8 = vcmp.eq.f32.partialorder %v794_v32, 8.507059e+37 }
 0x22b   : > { %v3878_v17 = vadd.f32 %v701_v31, %v677_v22  ;;  %3045 = vrcp.f32 %v3875_v36  ;;  %v3889_v56 = vadd.f32 %v720_v18, %v677_v22 }
 0x22d   : > { %v3038_v50 = vpop.eup %3037  ;;  %v2777_v48 = vmul.f32 -1.442695, %v3878_v17  ;;  %v2778_v41 = vmul.f32 -1.442695, %v3889_v56 }
 0x22e   : > { %v3882_v46 = vadd.f32 1.0, %v3038_v50  ;;  %v3884_v34 = vpop.eup %3039 }
 0x22f   : > { %v3042_v52 = vpop.eup %3041  ;;  %v756_v28 = vmul.f32 %v3884_v34, %v3868_v7  ;;  %vm761_vm7 = vweird.f32 %v3884_v34  ;;  %v3963_v7 = vor.u32 1.1754944e-38, %v811_v43 }
 0x230   : > { %3047 = vrcp.f32 %v3882_v46  ;;  %v3891_v26 = vpop.eup %3043  ;;  %v3896_v39 = vadd.f32 1.0, %v3042_v52  ;;  %vm3947_vm15 = vmor %vm760_vm12, %vm761_vm7  ;;  %v809_v52 = vand.u32 2147483647, %v3880_v25  ;;  %vm820_vm13 = vweird.f32 %v3882_v46 }
 0x231   : > { %3049 = vrcp.f32 %v3880_v25  ;;  %v3899_v47 = vpop.eup %3045  ;;  %v771_v30 = vmul.f32 %v3891_v26, %v3872_v44  ;;  %v757_v58 = vsub.f32 1.0, %v756_v28  ;;  %v824_v28 = vand.u32 2147483647, %v3882_v46 }
 0x232   : > { %3051 = vpow2.f32 %v2777_v48  ;;  %v786_v14 = vmul.f32 %v3899_v47, %v3875_v36  ;;  %vm776_vm9 = vweird.f32 %v3891_v26  ;;  %vm791_vm2 = vweird.f32 %v3899_v47 }
 0x233   : > { %3053 = vrcp.f32 %v3896_v39  ;;  %v772_v3 = vsub.f32 1.0, %v771_v30  ;;  %v758_v6 = vmul.f32 %v3884_v34, %v757_v58  ;;  %vm3988_vm12 = vcmp.eq.f32.partialorder %v824_v28, 8.507059e+37 }
 0x234   : > { %3055 = vpow2.f32 %v2778_v41  ;;  %v787_v1 = vsub.f32 1.0, %v786_v14  ;;  %v826_v41 = vand.u32 2147483648, %v3882_v46  ;;  %vm835_vm7 = vweird.f32 %v3896_v39 }
 0x235   : > { %v773_v15 = vmul.f32 %v3891_v26, %v772_v3  ;;  %v3931_v29 = vadd.f32 %v3884_v34, %v758_v6  ;;  %v914_v44 = vstv %s2781_s22 }
 0x236   : > { %v3904_v53 = vpop.eup %3047  ;;  %v788_v31 = vmul.f32 %v3899_v47, %v787_v1 }
 0x237   : > { %v816_v51 = vmul.f32 %v3904_v53, %v3882_v46  ;;  %v3908_v59 = vpop.eup %3049  ;;  %v3952_v48 = vadd.f32 %v3891_v26, %v773_v15  ;;  %v763_v58 = vsel %vm3947_vm15, %v3884_v34, %v3931_v29  ;;  %vm821_vm14 = vweird.f32 %v3904_v53  ;;  %v928_v29 = vpop.permute.xlu1 %927 }
 0x238   : > { %v3052_v62 = vpop.eup %3051  ;;  %v801_v11 = vmul.f32 %v3908_v59, %v3880_v25  ;;  %v789_v3 = vadd.f32 %v3899_v47, %v788_v31  ;;  %vm806_vm5 = vweird.f32 %v3908_v59  ;;  %vm3984_vm4 = vmor %vm820_vm13, %vm821_vm14  ;;  %vm4007_vm13 = vcmp.eq.f32.partialorder %v809_v52, 8.507059e+37 }
 0x239   : > { %v817_v63 = vsub.f32 1.0, %v816_v51  ;;  %v3913_v57 = vadd.f32 1.0, %v3052_v62  ;;  %v3915_v19 = vpop.eup %3053  ;;  %vm4003_vm14 = vmor %vm790_vm1, %vm791_vm2 }
 0x23a   : > { %v3056_v37 = vpop.eup %3055  ;;  %v831_v38 = vmul.f32 %v3915_v19, %v3896_v39  ;;  %v802_v50 = vsub.f32 1.0, %v801_v11  ;;  %vm836_vm15 = vweird.f32 %v3915_v19 }
 0x23b   : > { %3057 = vrcp.f32 %v3913_v57  ;;  %v818_v49 = vmul.f32 %v3904_v53, %v817_v63  ;;  %v3935_v40 = vadd.f32 1.0, %v3056_v37  ;;  %v839_v63 = vand.u32 2147483647, %v3896_v39  ;;  %vm4022_vm2 = vmor %vm835_vm7, %vm836_vm15 }
 0x23c   : > { %v832_v22 = vsub.f32 1.0, %v831_v38  ;;  %v803_v6 = vmul.f32 %v3908_v59, %v802_v50  ;;  %v827_v37 = vor.u32 1.1754944e-38, %v826_v41  ;;  %v854_v11 = vand.u32 2147483647, %v3913_v57  ;;  %vm4035_vm7 = vmor %vm805_vm11, %vm806_vm5 }
 0x23d   : > { %3059 = vrcp.f32 %v3935_v40  ;;  %v819_v51 = vadd.f32 %v3904_v53, %v818_v49  ;;  %v856_v15 = vand.u32 2147483648, %v3913_v57  ;;  %vm4017_vm1 = vcmp.eq.f32.partialorder %v839_v63, 8.507059e+37  ;;  %vm4051_vm11 = vmor %vm775_vm3, %vm776_vm9 }
 0x23e   : > { %v833_v34 = vmul.f32 %v3915_v19, %v832_v22  ;;  %v793_v22 = vsel %vm4003_vm14, %v3899_v47, %v789_v3  ;;  %v804_v36 = vadd.f32 %v3908_v59, %v803_v6  ;;  %v841_v50 = vand.u32 2147483648, %v3896_v39 }
 0x23f   : > { %v823_v8 = vsel %vm3984_vm4, %v3904_v53, %v819_v51  ;;  %vm850_vm6 = vweird.f32 %v3913_v57  ;;  %vm855_vm0 = vcmp.eq.f32.partialorder %v854_v11, 8.507059e+37  ;;  %v857_v41 = vor.u32 1.1754944e-38, %v856_v15 }
 0x240   : > { %v834_v53 = vadd.f32 %v3915_v19, %v833_v34  ;;  %v828_v47 = vsel %vm3988_vm12, %v827_v37, %v823_v8  ;;  %v869_v51 = vand.u32 2147483647, %v3935_v40  ;;  %v871_v34 = vand.u32 2147483648, %v3935_v40 }
 0x241   : > { %v3058_v30 = vpop.eup %3057  ;;  %v798_v6 = vsel %vm3968_vm8, %v797_v24, %v793_v22  ;;  %v808_v63 = vsel %vm4035_vm7, %v3908_v59, %v804_v36  ;;  %v842_v46 = vor.u32 1.1754944e-38, %v841_v50  ;;  %vm865_vm8 = vweird.f32 %v3935_v40 }
 0x242   : > { %v846_v62 = vmul.f32 %v3058_v30, %v3913_v57  ;;  %vm851_vm4 = vweird.f32 %v3058_v30  ;;  %v838_v57 = vsel %vm4022_vm2, %v3915_v19, %v834_v53  ;;  %v879_v19 = vmul.f32 %v828_v47, %v3864_v35 }
 0x243   : > { %v3060_v38 = vpop.eup %3059  ;;  %vm852_vm14 = vmor %vm850_vm6, %vm851_vm4  ;;  %v768_v59 = vsel %vm3980_vm10, %v3937_v10, %v763_v58  ;;  %v778_v24 = vsel %vm4051_vm11, %v3891_v26, %v3952_v48  ;;  %v843_v37 = vsel %vm4017_vm1, %v842_v46, %v838_v57  ;;  %v877_v35 = vmul.f32 %v798_v6, %v3858_v42 }
 0x244   : > { %v847_v1 = vsub.f32 1.0, %v846_v62  ;;  %v861_v32 = vmul.f32 %v3060_v38, %v3935_v40  ;;  %vm866_vm6 = vweird.f32 %v3060_v38  ;;  %vm870_vm9 = vcmp.eq.f32.partialorder %v869_v51, 8.507059e+37 }
 0x245   : > { %v782_v40 = vor.u32 1.1754944e-38, %v781_v23  ;;  %v813_v10 = vsel %vm4007_vm13, %v3963_v7, %v808_v63  ;;  %v875_v26 = vmul.f32 %v768_v59, %v3852_v21  ;;  %vm780_vm3 = vcmp.eq.f32.partialorder %v779_v16, 8.507059e+37 }
 0x246   : > { %v848_v49 = vmul.f32 %v3058_v30, %v847_v1  ;;  %v862_v28 = vsub.f32 1.0, %v861_v32  ;;  %v872_v1 = vor.u32 1.1754944e-38, %v871_v34  ;;  %v880_v48 = vmul.f32 %v843_v37, %v3866_v60 }
 0x247   : > { %v783_v9 = vsel %vm780_vm3, %v782_v40, %v778_v24  ;;  %v883_v23 = vpack.c.bf16 %v877_v35, %v875_v26  ;;  %vm5789_vm5 = vcmask 261120   ;;  %v3392_v21 = vmov 2  }
 0x248   : > { %v849_v52 = vadd.f32 %v3058_v30, %v848_v49  ;;  %v863_v3 = vmul.f32 %v3060_v38, %v862_v28  ;;  %v876_v15 = vmul.f32 %v783_v9, %v3854_v45  ;;  %vm5790_vm10 = vmmov %vm5789_vm5  ;;  %2981 = vset.pattern.permute.xlu1 %v3392_v21  ;;  %2980 = vset.pattern.permute.xlu0 %v3392_v21  ;;  %vm5791_vm12 = vcmask 1043456  }
 0x249   : > { %944 = vperm.xlu1 %2981, %v3517_v0   ;;  %2979 = vset.pattern.permute.xlu2 %v3392_v21  ;;  %v915_v53 = vmul.f32 %v914_v44, %v3839_v54  ;;  %vm5792_vm15 = vcmask 1041408   ;;  %vm5794_vm4 = vcmask 31744  }
 0x24a   : > { %v853_v62 = vsel %vm852_vm14, %v3058_v30, %v849_v52  ;;  %v864_v14 = vadd.f32 %v3060_v38, %v863_v3  ;;  %956 = vperm.xlu0 %2980, %v3542_v5   ;;  %952 = vperm.xlu2 %2979, %v3527_v2   ;;  %v932_v5 = vperm.slane %v928_v29, %v3832_v55  ;;  %vm5793_vm13 = vmmov %vm5792_vm15 }
 0x24b   : > { %v858_v25 = vsel %vm855_vm0, %v857_v41, %v853_v62  ;;  %vm867_vm0 = vmor %vm865_vm8, %vm866_vm6 }
 0x24c   : > { %v881_v30 = vmul.f32 %v858_v25, %v3878_v17  ;;  %v868_v17 = vsel %vm867_vm0, %v3060_v38, %v864_v14  ;;  %v878_v38 = vmul.f32 %v813_v10, %v3860_v61  ;;  %v917_v61 = vstv %s2782_s21  ;;  %vm5795_vm1 = vmmov %vm5794_vm4 }
 0x24d   : > { %v873_v58 = vsel %vm870_vm9, %v872_v1, %v868_v17  ;;  %vm5796_vm2 = vmmov %vm5795_vm1 }
 0x24e   : > { %v885_v11 = vpack.c.bf16 %v881_v30, %v879_v19  ;;  %v882_v42 = vmul.f32 %v873_v58, %v3889_v56  ;;  %v884_v7 = vpack.c.bf16 %v878_v38, %v876_v15  ;;  %vm5797_vm14 = vmmov %vm5795_vm1 }
 0x250   : > { %893 = vmatpush.bf16.msrb.mxu0 %v885_v11  ;;  %v886_v8 = vpack.c.bf16 %v882_v42, %v880_v48 }
 0x251   : > { %1207 = vperm.xlu1 %2981, %v3641_v20  }
 0x252   : > { %906 = vmatpush.bf16.msrb.mxu1 %v886_v8  ;;  %948 = vperm.xlu2 %2979, %v3536_v4  }
 0x254   : > { %894 = vmatpush.bf16.msrb.mxu0 %v883_v23 }
 0x256   : > { %907 = vmatpush.bf16.msrb.mxu1 %v884_v7 }
 0x257   : > { %2779 = vmatmul.msk.bf16.vlgmr.msrb.gmra.mxu0 %vm5789_vm5, %v3823_v33 }
 0x259   : > { %2780 = vmatmul.msk.bf16.vlgmr.msrb.gmra.mxu1 %vm5790_vm10, %v3823_v33 }
 0x2a4   : > { %v953_v54 = vpop.permute.xlu2 %952 }
 0x2ac   : > { %v949_v39 = vpop.permute.xlu2 %948 }
 0x2bb   : > { %v945_v52 = vpop.permute.xlu1 %944 }
 0x2bc   : > { %v957_v17 = vpop.permute.xlu0 %956 }
 0x2d4   : > { %v896_v45 = vpop.f32.mrf.mxu0 }
 0x2d5   : > { %v918_v56 = vmul.f32 %v917_v61, %v896_v45 }
 0x2d6   : > { %v909_v60 = vpop.f32.mrf.mxu1 }
 0x2d7   : > { %v919_v16 = vmul.f32 %v917_v61, %v909_v60 }
 0x2d9   : > { %v922_v43 = vrot.slane %v919_v16, 4 }
 0x2db   : > { %v923_v49 = vsel %vm5791_vm12, %v918_v56, %v922_v43 }
 0x2dc   : > { %v898_v0 = vpop.f32.mrf.mxu0  ;;  %v925_v2 = vadd.f32 %v923_v49, %v915_v53 }
 0x2de   : > { %v4092_v32 = vadd.f32 %v932_v5, %v925_v2  ;;  %v911_v22 = vpop.f32.mrf.mxu1 }
 0x2e0   : > { %936 = vst [vmem:[#allocation1] ss:$2 sm:$0xff] %v4092_v32 }
 0x2e7   : > { %v937_v36 = vld.sshfl [vmem:[#allocation1] sm:$0xff pattern:$0x75316420]  ;;  %v938_v31 = vld.sshfl [vmem:[#allocation1 + $0x8] sm:$0xff pattern:$0x75316420] }
 0x2e8   : > { %v941_v20 = vpack.c.bf16 %v937_v36, %v937_v36  ;;  %v942_v50 = vpack.c.bf16 %v938_v31, %v938_v31 }
 0x2ea   : > { %v960_v18 = vsel %vm5792_vm15, %v941_v20, 0  ;;  %v963_v4 = vsel %vm5793_vm13, %v942_v50, 0 }
 0x2eb   : > { %972 = vmatpush.bf16.msra.mxu0 %v960_v18  ;;  %991 = vmatpush.bf16.msra.mxu1 %v963_v4 }
 0x2ee   : > { %2783 = vmatmul.msk.bf16.vlgmr.msra.gmra.mxu0 %vm5794_vm4, %v3550_v12  ;;  %2785 = vmatmul.msk.bf16.vlgmr.msra.gmra.mxu1 %vm5795_vm1, %v3550_v12 }
 0x2fe   : > { %2784 = vmatmul.msk.bf16.gmra.mxu0 %vm5796_vm2, %v3559_v13  ;;  %2786 = vmatmul.msk.bf16.gmra.mxu1 %vm5797_vm14, %v3559_v13 }
 0x36b   : > { %v974_v28 = vpop.f32.mrf.mxu0  ;;  %v993_v47 = vpop.f32.mrf.mxu1 }
 0x36c   : > { %v4105_v41 = vadd.f32 %v974_v28, %v945_v52  ;;  %v4107_v51 = vadd.f32 %v993_v47, %v945_v52 }
 0x36e   : > { %v2787_v34 = vmul.f32 -1.442695, %v4105_v41  ;;  %v2788_v12 = vmul.f32 -1.442695, %v4107_v51 }
 0x370   : > { %3061 = vpow2.f32 %v2787_v34 }
 0x371   : > { %3063 = vpow2.f32 %v2788_v12 }
 0x373   : > { %v976_v57 = vpop.f32.mrf.mxu0  ;;  %v995_v62 = vpop.f32.mrf.mxu1 }
 0x374   : > { %v4111_v3 = vadd.f32 %v976_v57, %v949_v39  ;;  %v4113_v6 = vadd.f32 %v995_v62, %v949_v39 }
 0x376   : > { %v2789_v13 = vmul.f32 -1.442695, %v4111_v3  ;;  %v2790_v63 = vmul.f32 -1.442695, %v4113_v6  ;;  %v3062_v46 = vpop.eup %3061 }
 0x377   : > { %v3064_v14 = vpop.eup %3063  ;;  %v4121_v59 = vadd.f32 1.0, %v3062_v46 }
 0x378   : > { %3065 = vpow2.f32 %v2789_v13  ;;  %v4125_v35 = vadd.f32 1.0, %v3064_v14 }
 0x379   : > { %3067 = vpow2.f32 %v2790_v63  ;;  %vm1040_vm7 = vweird.f32 %v4121_v59  ;;  %v1044_v31 = vand.u32 2147483647, %v4121_v59  ;;  %v1046_v20 = vand.u32 2147483648, %v4121_v59 }
 0x37a   : > { %v1059_v47 = vand.u32 2147483647, %v4125_v35  ;;  %v1061_v34 = vand.u32 2147483648, %v4125_v35  ;;  %vm1055_vm15 = vweird.f32 %v4125_v35 }
 0x37b   : > { %v979_v25 = vpop.f32.mrf.mxu0  ;;  %v998_v27 = vpop.f32.mrf.mxu1  ;;  %v4190_v13 = vor.u32 1.1754944e-38, %v1046_v20  ;;  %vm4233_vm4 = vcmp.eq.f32.partialorder %v1044_v31, 8.507059e+37 }
 0x37c   : > { %v4117_v19 = vadd.f32 %v979_v25, %v953_v54  ;;  %v4119_v30 = vadd.f32 %v998_v27, %v953_v54 }
 0x37e   : > { %v2791_v24 = vmul.f32 -1.442695, %v4117_v19  ;;  %v2792_v37 = vmul.f32 -1.442695, %v4119_v30  ;;  %v3066_v1 = vpop.eup %3065 }
 0x37f   : > { %v3068_v40 = vpop.eup %3067  ;;  %v4128_v10 = vadd.f32 1.0, %v3066_v1 }
 0x380   : > { %3069 = vpow2.f32 %v2791_v24  ;;  %v4133_v42 = vadd.f32 1.0, %v3068_v40 }
 0x381   : > { %3071 = vrcp.f32 %v4121_v59  ;;  %v1076_v50 = vand.u32 2147483648, %v4128_v10  ;;  %vm1070_vm11 = vweird.f32 %v4128_v10  ;;  %v1074_v63 = vand.u32 2147483647, %v4128_v10 }
 0x382   : > { %3073 = vpow2.f32 %v2792_v37  ;;  %v1091_v57 = vand.u32 2147483648, %v4133_v42  ;;  %v1089_v1 = vand.u32 2147483647, %v4133_v42  ;;  %vm1085_vm9 = vweird.f32 %v4133_v42 }
 0x383   : > { %v981_v11 = vpop.f32.mrf.mxu0  ;;  %3075 = vrcp.f32 %v4125_v35  ;;  %v1000_v48 = vpop.f32.mrf.mxu1  ;;  %v1077_v27 = vor.u32 1.1754944e-38, %v1076_v50  ;;  %vm4221_vm10 = vcmp.eq.f32.partialorder %v1074_v63, 8.507059e+37 }
 0x384   : > { %v4131_v26 = vadd.f32 %v981_v11, %v957_v17  ;;  %3077 = vrcp.f32 %v4128_v10  ;;  %v4142_v15 = vadd.f32 %v1000_v48, %v957_v17 }
 0x386   : > { %v3070_v58 = vpop.eup %3069  ;;  %v2793_v8 = vmul.f32 -1.442695, %v4131_v26  ;;  %v2794_v61 = vmul.f32 -1.442695, %v4142_v15 }
 0x387   : > { %v4135_v9 = vadd.f32 1.0, %v3070_v58  ;;  %v4137_v38 = vpop.eup %3071 }
 0x388   : > { %v3074_v23 = vpop.eup %3073  ;;  %v1036_v21 = vmul.f32 %v4137_v38, %v4121_v59  ;;  %vm1041_vm6 = vweird.f32 %v4137_v38  ;;  %v4216_v59 = vor.u32 1.1754944e-38, %v1091_v57 }
 0x389   : > { %3079 = vrcp.f32 %v4135_v9  ;;  %v4144_v7 = vpop.eup %3075  ;;  %v4149_v45 = vadd.f32 1.0, %v3074_v23  ;;  %vm4200_vm8 = vmor %vm1040_vm7, %vm1041_vm6  ;;  %v1104_v17 = vand.u32 2147483647, %v4135_v9  ;;  %v1106_v11 = vand.u32 2147483648, %v4135_v9 }
 0x38a   : > { %3081 = vrcp.f32 %v4133_v42  ;;  %v4152_v60 = vpop.eup %3077  ;;  %v1051_v44 = vmul.f32 %v4144_v7, %v4125_v35  ;;  %v1037_v16 = vsub.f32 1.0, %v1036_v21  ;;  %vm1056_vm0 = vweird.f32 %v4144_v7 }
 0x38b   : > { %3083 = vpow2.f32 %v2793_v8  ;;  %v1066_v53 = vmul.f32 %v4152_v60, %v4128_v10  ;;  %vm1071_vm5 = vweird.f32 %v4152_v60  ;;  %vm1100_vm12 = vweird.f32 %v4135_v9 }
 0x38c   : > { %3085 = vrcp.f32 %v4149_v45  ;;  %v1052_v49 = vsub.f32 1.0, %v1051_v44  ;;  %v1038_v5 = vmul.f32 %v4137_v38, %v1037_v16  ;;  %v1119_v44 = vand.u32 2147483647, %v4149_v45  ;;  %vm4256_vm6 = vmor %vm1070_vm11, %vm1071_vm5 }
 0x38d   : > { %3087 = vpow2.f32 %v2794_v61  ;;  %v1067_v4 = vsub.f32 1.0, %v1066_v53  ;;  %vm4241_vm2 = vcmp.eq.f32.partialorder %v1104_v17, 8.507059e+37  ;;  %v1107_v53 = vor.u32 1.1754944e-38, %v1106_v11 }
 0x38e   : > { %v1053_v28 = vmul.f32 %v4144_v7, %v1052_v49  ;;  %v4184_v39 = vadd.f32 %v4137_v38, %v1038_v5  ;;  %vm1115_vm14 = vweird.f32 %v4149_v45  ;;  %vm4270_vm11 = vcmp.eq.f32.partialorder %v1119_v44, 8.507059e+37 }
 0x38f   : > { %v4157_v56 = vpop.eup %3079  ;;  %v1068_v25 = vmul.f32 %v4152_v60, %v1067_v4  ;;  %v1197_v35 = vstv %s2798_s23 }
 0x390   : > { %v1096_v29 = vmul.f32 %v4157_v56, %v4135_v9  ;;  %v4161_v43 = vpop.eup %3081  ;;  %v4205_v37 = vadd.f32 %v4144_v7, %v1053_v28  ;;  %v1043_v58 = vsel %vm4200_vm8, %v4137_v38, %v4184_v39  ;;  %vm1101_vm3 = vweird.f32 %v4157_v56 }
 0x391   : > { %v3084_v0 = vpop.eup %3083  ;;  %v1081_v54 = vmul.f32 %v4161_v43, %v4133_v42  ;;  %v1069_v21 = vadd.f32 %v4152_v60, %v1068_v25  ;;  %vm1086_vm13 = vweird.f32 %v4161_v43  ;;  %vm4237_vm1 = vmor %vm1100_vm12, %vm1101_vm3  ;;  %vm4260_vm8 = vcmp.eq.f32.partialorder %v1089_v1, 8.507059e+37 }
 0x392   : > { %v1097_v2 = vsub.f32 1.0, %v1096_v29  ;;  %v4166_v22 = vadd.f32 1.0, %v3084_v0  ;;  %v4168_v36 = vpop.eup %3085  ;;  %v1121_v28 = vand.u32 2147483648, %v4149_v45  ;;  %v1194_v29 = vstv %s2797_s30  ;;  %s2862_s30 = sld [smem:[#allocation5 + $0x6]] }
 0x393   : > { %v3088_v18 = vpop.eup %3087  ;;  %v1111_v52 = vmul.f32 %v4168_v36, %v4149_v45  ;;  %v1082_v14 = vsub.f32 1.0, %v1081_v54  ;;  %vm1116_vm7 = vweird.f32 %v4168_v36  ;;  %v1073_v54 = vsel %vm4256_vm6, %v4152_v60, %v1069_v21 }
 0x394   : > { %3089 = vrcp.f32 %v4166_v22  ;;  %v1098_v62 = vmul.f32 %v4157_v56, %v1097_v2  ;;  %v4188_v12 = vadd.f32 1.0, %v3088_v18  ;;  %v1134_v49 = vand.u32 2147483647, %v4166_v22  ;;  %vm4275_vm5 = vmor %vm1115_vm14, %vm1116_vm7 }
 0x395   : > { %v1112_v46 = vsub.f32 1.0, %v1111_v52  ;;  %v1083_v61 = vmul.f32 %v4161_v43, %v1082_v14  ;;  %v1136_v31 = vand.u32 2147483648, %v4166_v22  ;;  %vm1130_vm12 = vweird.f32 %v4166_v22  ;;  %vm4288_vm14 = vmor %vm1085_vm9, %vm1086_vm13 }
 0x396   : > { %3091 = vrcp.f32 %v4188_v12  ;;  %v1099_v48 = vadd.f32 %v4157_v56, %v1098_v62  ;;  %v1151_v25 = vand.u32 2147483648, %v4188_v12  ;;  %v1078_v1 = vsel %vm4221_vm10, %v1077_v27, %v1073_v54  ;;  %vm4304_vm9 = vmor %vm1055_vm15, %vm1056_vm0 }
 0x397   : > { %v1113_v38 = vmul.f32 %v4168_v36, %v1112_v46  ;;  %v1084_v10 = vadd.f32 %v4161_v43, %v1083_v61  ;;  %v1137_v63 = vor.u32 1.1754944e-38, %v1136_v31  ;;  %v1149_v46 = vand.u32 2147483647, %v4188_v12 }
 0x398   : > { %v1103_v2 = vsel %vm4237_vm1, %v4157_v56, %v1099_v48  ;;  %vm1135_vm1 = vcmp.eq.f32.partialorder %v1134_v49, 8.507059e+37  ;;  %v1122_v11 = vor.u32 1.1754944e-38, %v1121_v28  ;;  %vm1145_vm10 = vweird.f32 %v4188_v12  ;;  %v1208_v49 = vpop.permute.xlu1 %1207 }
 0x399   : > { %v1114_v56 = vadd.f32 %v4168_v36, %v1113_v38  ;;  %v1108_v60 = vsel %vm4241_vm2, %v1107_v53, %v1103_v2  ;;  %v1088_v17 = vsel %vm4288_vm14, %v4161_v43, %v1084_v10  ;;  %v1048_v43 = vsel %vm4233_vm4, %v4190_v13, %v1043_v58  ;;  %v4364_v2 = vld [vmem:[%s5727_s5 + $0x8] sm:$0xff] }
 0x39a   : > { %v3090_v40 = vpop.eup %3089  ;;  %v1058_v27 = vsel %vm4304_vm9, %v4144_v7, %v4205_v37  ;;  %vm1150_vm15 = vcmp.eq.f32.partialorder %v1149_v46, 8.507059e+37  ;;  %v1093_v13 = vsel %vm4260_vm8, %v4216_v59, %v1088_v17  ;;  %v1155_v7 = vmul.f32 %v1048_v43, %v4105_v41 }
 0x39b   : > { %v1126_v23 = vmul.f32 %v3090_v40, %v4166_v22  ;;  %vm1131_vm3 = vweird.f32 %v3090_v40  ;;  %v1118_v22 = vsel %vm4275_vm5, %v4168_v36, %v1114_v56  ;;  %v1159_v36 = vmul.f32 %v1108_v60, %v4117_v19  ;;  %v4387_v60 = vld [vmem:[%s5725_s3 + $0x8] sm:$0xff] }
 0x39c   : > { %v3092_v5 = vpop.eup %3091  ;;  %vm1132_vm6 = vmor %vm1130_vm12, %vm1131_vm3  ;;  %v1123_v38 = vsel %vm4270_vm11, %v1122_v11, %v1118_v22  ;;  %v1157_v19 = vmul.f32 %v1078_v1, %v4111_v3  ;;  %vm1060_vm13 = vcmp.eq.f32.partialorder %v1059_v47, 8.507059e+37  ;;  %v1158_v44 = vmul.f32 %v1093_v13, %v4113_v6  ;;  %v4340_v6 = vld [vmem:[%s5727_s5] sm:$0xff] }
 0x39d   : > { %v1127_v0 = vsub.f32 1.0, %v1126_v23  ;;  %v1141_v4 = vmul.f32 %v3092_v5, %v4188_v12  ;;  %vm1146_vm2 = vweird.f32 %v3092_v5  ;;  %v1152_v23 = vor.u32 1.1754944e-38, %v1151_v25 }
 0x39e   : > { %vm1147_vm0 = vmor %vm1145_vm10, %vm1146_vm2  ;;  %v1062_v12 = vor.u32 1.1754944e-38, %v1061_v34  ;;  %v1160_v37 = vmul.f32 %v1123_v38, %v4119_v30  ;;  %v1163_v34 = vpack.c.bf16 %v1157_v19, %v1155_v7  ;;  %vm5820_vm4 = vcmask 261120  }
 0x39f   : > { %v1128_v18 = vmul.f32 %v3090_v40, %v1127_v0  ;;  %v1142_v62 = vsub.f32 1.0, %v1141_v4  ;;  %vm5821_vm7 = vmmov %vm5820_vm4  ;;  %v3393_v41 = vmov 3   ;;  %v4358_v0 = vld [vmem:[%s5728_s6] sm:$0xf]  ;;  %v1195_v31 = vmul.f32 %v1194_v29, %v4092_v32 }
 0x3a0   : > { %v1063_v61 = vsel %vm1060_vm13, %v1062_v12, %v1058_v27  ;;  %2984 = vset.pattern.permute.xlu1 %v3393_v41  ;;  %2983 = vset.pattern.permute.xlu0 %v3393_v41  ;;  %vm5822_vm8 = vcmask 1043456   ;;  %v1212_v56 = vperm.slane %v1208_v49, %v3832_v55  ;;  %vm5823_vm3 = vcmask 1041408   ;;  %v4378_v32 = vld [vmem:[%s5725_s3] sm:$0xff] }
 0x3a1   : > { %v1129_v57 = vadd.f32 %v3090_v40, %v1128_v18  ;;  %v1143_v24 = vmul.f32 %v3092_v5, %v1142_v62  ;;  %v1156_v9 = vmul.f32 %v1063_v61, %v4107_v51  ;;  %1224 = vperm.xlu1 %2984, %v4340_v6   ;;  %2982 = vset.pattern.permute.xlu2 %v3393_v41  ;;  %v4346_v51 = vld [vmem:[%s5727_s5 + $0x18] sm:$0xff]  ;;  %vm5824_vm11 = vmmov %vm5823_vm3  ;;  %vm5825_vm5 = vcmask 31744  }
 0x3a2   : > { %1236 = vperm.xlu0 %2983, %v4346_v51   ;;  %vm5826_vm12 = vmmov %vm5825_vm5 }
 0x3a3   : > { %v1133_v14 = vsel %vm1132_vm6, %v3090_v40, %v1129_v57  ;;  %v1144_v8 = vadd.f32 %v3092_v5, %v1143_v24  ;;  %v1164_v59 = vpack.c.bf16 %v1158_v44, %v1156_v9 }
 0x3a4   : > { %v1138_v42 = vsel %vm1135_vm1, %v1137_v63, %v1133_v14  ;;  %vm5827_vm1 = vmmov %vm5825_vm5 }
 0x3a5   : > { %v1161_v40 = vmul.f32 %v1138_v42, %v4131_v26  ;;  %v1148_v21 = vsel %vm1147_vm0, %v3092_v5, %v1144_v8  ;;  %vm5828_vm6 = vmmov %vm5827_vm1 }
 0x3a6   : > { %v1153_v58 = vsel %vm1150_vm15, %v1152_v23, %v1148_v21 }
 0x3a7   : > { %v1165_v26 = vpack.c.bf16 %v1161_v40, %v1159_v36  ;;  %v1162_v3 = vmul.f32 %v1153_v58, %v4142_v15 }
 0x3a9   : > { %1173 = vmatpush.bf16.msra.mxu2 %v1165_v26  ;;  %v1166_v16 = vpack.c.bf16 %v1162_v3, %v1160_v37  ;;  %1487 = vperm.xlu1 %2984, %v4358_v0  }
 0x3ab   : > { %1186 = vmatpush.bf16.msra.mxu3 %v1166_v16 }
 0x3ad   : > { %1174 = vmatpush.bf16.msra.mxu2 %v1163_v34 }
 0x3af   : > { %1187 = vmatpush.bf16.msra.mxu3 %v1164_v59 }
 0x3b0   : > { %2795 = vmatmul.msk.bf16.vlgmr.msra.gmra.mxu2 %vm5820_vm4, %v3823_v33 }
 0x3b2   : > { %2796 = vmatmul.msk.bf16.vlgmr.msra.gmra.mxu3 %vm5821_vm7, %v3823_v33  ;;  %v4352_v33 = vld [vmem:[%s5727_s5 + $0x10] sm:$0xff] }
 0x3b3   : > { %1232 = vperm.xlu2 %2982, %v4352_v33  }
 0x3bb   : > { %1228 = vperm.xlu2 %2982, %v4364_v2  }
 0x40d   : > { %v1233_v63 = vpop.permute.xlu2 %1232 }
 0x413   : > { %v1225_v46 = vpop.permute.xlu1 %1224 }
 0x414   : > { %v1237_v37 = vpop.permute.xlu0 %1236 }
 0x415   : > { %v1229_v1 = vpop.permute.xlu2 %1228 }
 0x433   : > { %v1176_v30 = vpop.f32.mrf.mxu2 }
 0x434   : > { %v1198_v47 = vmul.f32 %v1197_v35, %v1176_v30 }
 0x435   : > { %v1189_v15 = vpop.f32.mrf.mxu3 }
 0x436   : > { %v1199_v53 = vmul.f32 %v1197_v35, %v1189_v15 }
 0x438   : > { %v1202_v5 = vrot.slane %v1199_v53, 4 }
 0x43a   : > { %v1203_v50 = vsel %vm5822_vm8, %v1198_v47, %v1202_v5 }
 0x43b   : > { %v1178_v20 = vpop.f32.mrf.mxu2  ;;  %v1205_v18 = vadd.f32 %v1203_v50, %v1195_v31 }
 0x43d   : > { %v4370_v4 = vadd.f32 %v1212_v56, %v1205_v18  ;;  %v1191_v54 = vpop.f32.mrf.mxu3 }
 0x43f   : > { %1216 = vst [vmem:[#allocation1] ss:$2 sm:$0xff] %v4370_v4 }
 0x446   : > { %v1217_v10 = vld.sshfl [vmem:[#allocation1] sm:$0xff pattern:$0x75316420]  ;;  %v1218_v52 = vld.sshfl [vmem:[#allocation1 + $0x8] sm:$0xff pattern:$0x75316420] }
 0x447   : > { %v1221_v28 = vpack.c.bf16 %v1217_v10, %v1217_v10  ;;  %v1222_v39 = vpack.c.bf16 %v1218_v52, %v1218_v52 }
 0x449   : > { %v1240_v57 = vsel %vm5823_vm3, %v1221_v28, 0  ;;  %v1243_v62 = vsel %vm5824_vm11, %v1222_v39, 0 }
 0x44a   : > { %1252 = vmatpush.bf16.msrb.mxu2 %v1240_v57  ;;  %1271 = vmatpush.bf16.msrb.mxu3 %v1243_v62 }
 0x44d   : > { %2799 = vmatmul.msk.bf16.vlgmr.msrb.gmra.mxu2 %vm5825_vm5, %v4378_v32  ;;  %2801 = vmatmul.msk.bf16.vlgmr.msrb.gmra.mxu3 %vm5826_vm12, %v4378_v32 }
 0x45d   : > { %2800 = vmatmul.msk.bf16.gmra.mxu2 %vm5827_vm1, %v4387_v60  ;;  %2802 = vmatmul.msk.bf16.gmra.mxu3 %vm5828_vm6, %v4387_v60 }
 0x4d0   : > { %v1254_v25 = vpop.f32.mrf.mxu2  ;;  %v1273_v45 = vpop.f32.mrf.mxu3 }
 0x4d1   : > { %v4393_v22 = vadd.f32 %v1254_v25, %v1225_v46  ;;  %v4395_v14 = vadd.f32 %v1273_v45, %v1225_v46 }
 0x4d3   : > { %v2803_v24 = vmul.f32 -1.442695, %v4393_v22  ;;  %v2804_v42 = vmul.f32 -1.442695, %v4395_v14 }
 0x4d5   : > { %3093 = vpow2.f32 %v2803_v24 }
 0x4d6   : > { %3095 = vpow2.f32 %v2804_v42 }
 0x4d8   : > { %v1256_v17 = vpop.f32.mrf.mxu2  ;;  %v1275_v11 = vpop.f32.mrf.mxu3 }
 0x4d9   : > { %v4399_v48 = vadd.f32 %v1256_v17, %v1229_v1  ;;  %v4401_v36 = vadd.f32 %v1275_v11, %v1229_v1 }
 0x4db   : > { %v2805_v40 = vmul.f32 -1.442695, %v4399_v48  ;;  %v2806_v8 = vmul.f32 -1.442695, %v4401_v36  ;;  %v3094_v43 = vpop.eup %3093 }
 0x4dc   : > { %v3096_v26 = vpop.eup %3095  ;;  %v4409_v21 = vadd.f32 1.0, %v3094_v43 }
 0x4dd   : > { %3097 = vpow2.f32 %v2805_v40  ;;  %v4413_v7 = vadd.f32 1.0, %v3096_v26 }
 0x4de   : > { %3099 = vpow2.f32 %v2806_v8  ;;  %vm1320_vm14 = vweird.f32 %v4409_v21  ;;  %v1324_v46 = vand.u32 2147483647, %v4409_v21  ;;  %v1326_v25 = vand.u32 2147483648, %v4409_v21 }
 0x4df   : > { %v1339_v40 = vand.u32 2147483647, %v4413_v7  ;;  %v1341_v8 = vand.u32 2147483648, %v4413_v7  ;;  %vm1335_vm3 = vweird.f32 %v4413_v7 }
 0x4e0   : > { %v1259_v27 = vpop.f32.mrf.mxu2  ;;  %v1278_v38 = vpop.f32.mrf.mxu3  ;;  %vm4521_vm5 = vcmp.eq.f32.partialorder %v1324_v46, 8.507059e+37 }
 0x4e1   : > { %v4405_v23 = vadd.f32 %v1259_v27, %v1233_v63  ;;  %v4407_v19 = vadd.f32 %v1278_v38, %v1233_v63 }
 0x4e3   : > { %v2807_v12 = vmul.f32 -1.442695, %v4405_v23  ;;  %v2808_v13 = vmul.f32 -1.442695, %v4407_v19  ;;  %v3098_v58 = vpop.eup %3097 }
 0x4e4   : > { %v3100_v61 = vpop.eup %3099  ;;  %v4416_v44 = vadd.f32 1.0, %v3098_v58 }
 0x4e5   : > { %3101 = vpow2.f32 %v2807_v12  ;;  %v4421_v59 = vadd.f32 1.0, %v3100_v61  ;;  %v4478_v12 = vor.u32 1.1754944e-38, %v1326_v25 }
 0x4e6   : > { %3103 = vrcp.f32 %v4409_v21  ;;  %v1356_v45 = vand.u32 2147483648, %v4416_v44  ;;  %vm1350_vm9 = vweird.f32 %v4416_v44 }
 0x4e7   : > { %3105 = vpow2.f32 %v2808_v13  ;;  %v1371_v27 = vand.u32 2147483648, %v4421_v59  ;;  %v1354_v13 = vand.u32 2147483647, %v4416_v44  ;;  %vm1365_vm15 = vweird.f32 %v4421_v59 }
 0x4e8   : > { %v1261_v3 = vpop.f32.mrf.mxu2  ;;  %3107 = vrcp.f32 %v4413_v7  ;;  %v1280_v9 = vpop.f32.mrf.mxu3 }
 0x4e9   : > { %v4419_v34 = vadd.f32 %v1261_v3, %v1237_v37  ;;  %3109 = vrcp.f32 %v4416_v44  ;;  %v4430_v47 = vadd.f32 %v1280_v9, %v1237_v37  ;;  %v1357_v3 = vor.u32 1.1754944e-38, %v1356_v45 }
 0x4ea   : > { %vm4509_vm7 = vcmp.eq.f32.partialorder %v1354_v13, 8.507059e+37 }
 0x4eb   : > { %v3102_v16 = vpop.eup %3101  ;;  %v2809_v35 = vmul.f32 -1.442695, %v4419_v34  ;;  %v2810_v5 = vmul.f32 -1.442695, %v4430_v47 }
 0x4ec   : > { %v4423_v41 = vadd.f32 1.0, %v3102_v16  ;;  %v4425_v30 = vpop.eup %3103 }
 0x4ed   : > { %v3106_v15 = vpop.eup %3105  ;;  %v1316_v53 = vmul.f32 %v4425_v30, %v4409_v21  ;;  %vm1321_vm2 = vweird.f32 %v4425_v30  ;;  %v4504_v21 = vor.u32 1.1754944e-38, %v1371_v27 }
 0x4ee   : > { %3111 = vrcp.f32 %v4423_v41  ;;  %v4432_v29 = vpop.eup %3107  ;;  %v4437_v49 = vadd.f32 1.0, %v3106_v15  ;;  %vm4488_vm10 = vmor %vm1320_vm14, %vm1321_vm2  ;;  %v1384_v15 = vand.u32 2147483647, %v4423_v41  ;;  %vm1380_vm8 = vweird.f32 %v4423_v41 }
 0x4ef   : > { %3113 = vrcp.f32 %v4421_v59  ;;  %v4440_v31 = vpop.eup %3109  ;;  %v1331_v20 = vmul.f32 %v4432_v29, %v4413_v7  ;;  %v1317_v56 = vsub.f32 1.0, %v1316_v53  ;;  %v1386_v53 = vand.u32 2147483648, %v4423_v41 }
 0x4f0   : > { %3115 = vpow2.f32 %v2809_v35  ;;  %v1346_v10 = vmul.f32 %v4440_v31, %v4416_v44  ;;  %v1369_v35 = vand.u32 2147483647, %v4421_v59  ;;  %vm1336_vm0 = vweird.f32 %v4432_v29 }
 0x4f1   : > { %3117 = vrcp.f32 %v4437_v49  ;;  %v1332_v28 = vsub.f32 1.0, %v1331_v20  ;;  %v1318_v39 = vmul.f32 %v4425_v30, %v1317_v56  ;;  %vm1351_vm4 = vweird.f32 %v4440_v31 }
 0x4f2   : > { %3119 = vpow2.f32 %v2810_v5  ;;  %v1347_v1 = vsub.f32 1.0, %v1346_v10  ;;  %vm4529_vm1 = vcmp.eq.f32.partialorder %v1384_v15, 8.507059e+37  ;;  %v1387_v45 = vor.u32 1.1754944e-38, %v1386_v53  ;;  %vm4544_vm2 = vmor %vm1350_vm9, %vm1351_vm4 }
 0x4f3   : > { %v1333_v42 = vmul.f32 %v4432_v29, %v1332_v28  ;;  %v4472_v43 = vadd.f32 %v4425_v30, %v1318_v39  ;;  %v1399_v39 = vand.u32 2147483647, %v4437_v49  ;;  %vm1395_vm6 = vweird.f32 %v4437_v49 }
 0x4f4   : > { %v4445_v50 = vpop.eup %3111  ;;  %v1348_v37 = vmul.f32 %v4440_v31, %v1347_v1 }
 0x4f5   : > { %v1376_v18 = vmul.f32 %v4445_v50, %v4423_v41  ;;  %v4449_v54 = vpop.eup %3113  ;;  %v4493_v9 = vadd.f32 %v4432_v29, %v1333_v42  ;;  %v1323_v20 = vsel %vm4488_vm10, %v4425_v30, %v4472_v43  ;;  %vm1381_vm13 = vweird.f32 %v4445_v50  ;;  %v1488_v42 = vpop.permute.xlu1 %1487 }
 0x4f6   : > { %v3116_v52 = vpop.eup %3115  ;;  %v1361_v17 = vmul.f32 %v4449_v54, %v4421_v59  ;;  %vm1366_vm11 = vweird.f32 %v4449_v54  ;;  %vm4525_vm12 = vmor %vm1380_vm8, %vm1381_vm13  ;;  %vm4548_vm10 = vcmp.eq.f32.partialorder %v1369_v35, 8.507059e+37  ;;  %vm4558_vm9 = vcmp.eq.f32.partialorder %v1399_v39, 8.507059e+37 }
 0x4f7   : > { %v1377_v57 = vsub.f32 1.0, %v1376_v18  ;;  %v4454_v62 = vadd.f32 1.0, %v3116_v52  ;;  %v4456_v63 = vpop.eup %3117  ;;  %v1349_v52 = vadd.f32 %v4440_v31, %v1348_v37  ;;  %v1401_v37 = vand.u32 2147483648, %v4437_v49 }
 0x4f8   : > { %v3120_v24 = vpop.eup %3119  ;;  %v1391_v11 = vmul.f32 %v4456_v63, %v4437_v49  ;;  %v1362_v61 = vsub.f32 1.0, %v1361_v17  ;;  %vm1396_vm14 = vweird.f32 %v4456_v63 }
 0x4f9   : > { %3121 = vrcp.f32 %v4454_v62  ;;  %v1378_v38 = vmul.f32 %v4445_v50, %v1377_v57  ;;  %v4476_v26 = vadd.f32 1.0, %v3120_v24  ;;  %v1414_v1 = vand.u32 2147483647, %v4454_v62  ;;  %vm4563_vm4 = vmor %vm1395_vm6, %vm1396_vm14 }
 0x4fa   : > { %v1392_v58 = vsub.f32 1.0, %v1391_v11  ;;  %v1363_v28 = vmul.f32 %v4449_v54, %v1362_v61  ;;  %v1416_v11 = vand.u32 2147483648, %v4454_v62  ;;  %v1353_v13 = vsel %vm4544_vm2, %v4440_v31, %v1349_v52  ;;  %vm4576_vm6 = vmor %vm1365_vm15, %vm1366_vm11 }
 0x4fb   : > { %3123 = vrcp.f32 %v4476_v26  ;;  %v1379_v56 = vadd.f32 %v4445_v50, %v1378_v38  ;;  %vm1410_vm8 = vweird.f32 %v4454_v62  ;;  %v1429_v53 = vand.u32 2147483647, %v4476_v26  ;;  %vm4592_vm15 = vmor %vm1335_vm3, %vm1336_vm0 }
 0x4fc   : > { %v1393_v30 = vmul.f32 %v4456_v63, %v1392_v58  ;;  %v1364_v44 = vadd.f32 %v4449_v54, %v1363_v28  ;;  %v1417_v15 = vor.u32 1.1754944e-38, %v1416_v11  ;;  %v1358_v52 = vsel %vm4509_vm7, %v1357_v3, %v1353_v13 }
 0x4fd   : > { %v1383_v46 = vsel %vm4525_vm12, %v4445_v50, %v1379_v56  ;;  %vm1415_vm12 = vcmp.eq.f32.partialorder %v1414_v1, 8.507059e+37  ;;  %v1431_v56 = vand.u32 2147483648, %v4476_v26  ;;  %v1402_v39 = vor.u32 1.1754944e-38, %v1401_v37 }
 0x4fe   : > { %v1394_v50 = vadd.f32 %v4456_v63, %v1393_v30  ;;  %v1388_v31 = vsel %vm4529_vm1, %v1387_v45, %v1383_v46  ;;  %v1368_v28 = vsel %vm4576_vm6, %v4449_v54, %v1364_v44  ;;  %vm1425_vm7 = vweird.f32 %v4476_v26 }
 0x4ff   : > { %v3122_v5 = vpop.eup %3121  ;;  %v1328_v54 = vsel %vm4521_vm5, %v4478_v12, %v1323_v20  ;;  %v1338_v3 = vsel %vm4592_vm15, %v4432_v29, %v4493_v9  ;;  %v1432_v45 = vor.u32 1.1754944e-38, %v1431_v56  ;;  %vm1430_vm3 = vcmp.eq.f32.partialorder %v1429_v53, 8.507059e+37 }
 0x500   : > { %v1406_v10 = vmul.f32 %v3122_v5, %v4454_v62  ;;  %vm1411_vm13 = vweird.f32 %v3122_v5  ;;  %v1398_v62 = vsel %vm4563_vm4, %v4456_v63, %v1394_v50  ;;  %v1439_v63 = vmul.f32 %v1388_v31, %v4405_v23 }
 0x501   : > { %v3124_v17 = vpop.eup %3123  ;;  %vm1412_vm2 = vmor %vm1410_vm8, %vm1411_vm13  ;;  %v1403_v25 = vsel %vm4558_vm9, %v1402_v39, %v1398_v62  ;;  %v1437_v23 = vmul.f32 %v1358_v52, %v4399_v48  ;;  %v1373_v12 = vsel %vm4548_vm10, %v4504_v21, %v1368_v28  ;;  %v1435_v29 = vmul.f32 %v1328_v54, %v4393_v22  ;;  %v4624_v22 = vld [vmem:[%s5726_s4] sm:$0x3] }
 0x502   : > { %v1407_v24 = vsub.f32 1.0, %v1406_v10  ;;  %v1421_v38 = vmul.f32 %v3124_v17, %v4476_v26  ;;  %vm1426_vm1 = vweird.f32 %v3124_v17  ;;  %v1342_v26 = vor.u32 1.1754944e-38, %v1341_v8 }
 0x503   : > { %vm1427_vm0 = vmor %vm1425_vm7, %vm1426_vm1  ;;  %vm1340_vm11 = vcmp.eq.f32.partialorder %v1339_v40, 8.507059e+37  ;;  %v1440_v9 = vmul.f32 %v1403_v25, %v4407_v19  ;;  %v1438_v1 = vmul.f32 %v1373_v12, %v4401_v36  ;;  %v1443_v8 = vpack.c.bf16 %v1437_v23, %v1435_v29 }
 0x504   : > { %v1408_v27 = vmul.f32 %v3122_v5, %v1407_v24  ;;  %v1422_v35 = vsub.f32 1.0, %v1421_v38  ;;  %v1343_v57 = vsel %vm1340_vm11, %v1342_v26, %v1338_v3  ;;  %vm5851_vm5 = vcmask 261120  }
 0x505   : > { %v1436_v46 = vmul.f32 %v1343_v57, %v4395_v14  ;;  %vm5852_vm14 = vmmov %vm5851_vm5  ;;  %v3394_v36 = vmov 4   ;;  %v1477_v19 = vstv %s2814_s16  ;;  %v1474_v40 = vstv %s2813_s15  ;;  %s321_s16 = sand.u32 1, %s3369_s25  }
 0x506   : > { %v1409_v16 = vadd.f32 %v3122_v5, %v1408_v27  ;;  %v1423_v10 = vmul.f32 %v3124_v17, %v1422_v35  ;;  %2987 = vset.pattern.permute.xlu1 %v3394_v36  ;;  %2986 = vset.pattern.permute.xlu0 %v3394_v36  ;;  %v1475_v50 = vmul.f32 %v1474_v40, %v4370_v4  ;;  %vm5853_vm10 = vcmask 1043456   ;;  %s2742_s15 = sshll.u32 %s321_s16, 3 }
 0x507   : > { %v1444_v21 = vpack.c.bf16 %v1438_v1, %v1436_v46  ;;  %1504 = vperm.xlu1 %2987, %v4340_v6   ;;  %2985 = vset.pattern.permute.xlu2 %v3394_v36  ;;  %v1492_v13 = vperm.slane %v1488_v42, %v3832_v55  ;;  %vm5854_vm13 = vcmask 1041408   ;;  %vm5856_vm4 = vcmask 31744   ;;  %s323_s21 = scalar_lea.vmem [#allocation7], %s2742_s15  ;;  %s3319_s15 = scalar_lea.hbm %s5729_s7, 16 }
 0x508   : > { %v1413_v30 = vsel %vm1412_vm2, %v3122_v5, %v1409_v16  ;;  %v1424_v18 = vadd.f32 %v3124_v17, %v1423_v10  ;;  %1516 = vperm.xlu0 %2986, %v4346_v51   ;;  %1512 = vperm.xlu2 %2985, %v4352_v33   ;;  %vm5855_vm9 = vmmov %vm5854_vm13  ;;  %s2632_s22 = sshll.u32 %s323_s21, 4  ;;  %s2633_s22 = int_to_ptr.vmem [resolvable:$true] %s2632_s22 }
 0x509   : > { %v1418_v59 = vsel %vm1415_vm12, %v1417_v15, %v1413_v30  ;;  %vm5857_vm8 = vmmov %vm5856_vm4 }
 0x50a   : > { %v1441_v5 = vmul.f32 %v1418_v59, %v4419_v34  ;;  %v1428_v24 = vsel %vm1427_vm0, %v3124_v17, %v1424_v18  ;;  %vm5858_vm12 = vmmov %vm5856_vm4 }
 0x50b   : > { %v1433_v20 = vsel %vm1430_vm3, %v1432_v45, %v1428_v24  ;;  %vm5859_vm2 = vmmov %vm5856_vm4 }
 0x50c   : > { %v1445_v34 = vpack.c.bf16 %v1441_v5, %v1439_v63  ;;  %v1442_v48 = vmul.f32 %v1433_v20, %v4430_v47 }
 0x50e   : > { %1453 = vmatpush.bf16.msrb.mxu0 %v1445_v34  ;;  %v1446_v17 = vpack.c.bf16 %v1442_v48, %v1440_v9 }
 0x50f   : > { %1767 = vperm.xlu1 %2987, %v4358_v0  }
 0x510   : > { %1466 = vmatpush.bf16.msrb.mxu1 %v1446_v17  ;;  %1508 = vperm.xlu2 %2985, %v4364_v2  }
 0x512   : > { %1454 = vmatpush.bf16.msrb.mxu0 %v1443_v8 }
 0x514   : > { %1467 = vmatpush.bf16.msrb.mxu1 %v1444_v21 }
 0x515   : > { %2811 = vmatmul.msk.bf16.vlgmr.msrb.gmra.mxu0 %vm5851_vm5, %v4624_v22 }
 0x517   : > { %2812 = vmatmul.msk.bf16.vlgmr.msrb.gmra.mxu1 %vm5852_vm14, %v4624_v22 }
 0x562   : > { %v1513_v4 = vpop.permute.xlu2 %1512 }
 0x56a   : > { %v1509_v28 = vpop.permute.xlu2 %1508 }
 0x579   : > { %v1505_v56 = vpop.permute.xlu1 %1504 }
 0x57a   : > { %v1517_v48 = vpop.permute.xlu0 %1516 }
 0x592   : > { %v1456_v14 = vpop.f32.mrf.mxu0 }
 0x593   : > { %v1478_v47 = vmul.f32 %v1477_v19, %v1456_v14 }
 0x594   : > { %v1469_v7 = vpop.f32.mrf.mxu1 }
 0x595   : > { %v1479_v11 = vmul.f32 %v1477_v19, %v1469_v7 }
 0x597   : > { %v1482_v43 = vrot.slane %v1479_v11, 4 }
 0x599   : > { %v1483_v38 = vsel %vm5853_vm10, %v1478_v47, %v1482_v43 }
 0x59a   : > { %v1458_v27 = vpop.f32.mrf.mxu0  ;;  %v1485_v44 = vadd.f32 %v1483_v38, %v1475_v50 }
 0x59c   : > { %v4638_v58 = vadd.f32 %v1492_v13, %v1485_v44  ;;  %v1471_v37 = vpop.f32.mrf.mxu1 }
 0x59e   : > { %1496 = vst [vmem:[#allocation1] ss:$2 sm:$0xff] %v4638_v58 }
 0x5a5   : > { %v1497_v61 = vld.sshfl [vmem:[#allocation1] sm:$0xff pattern:$0x75316420]  ;;  %v1498_v16 = vld.sshfl [vmem:[#allocation1 + $0x8] sm:$0xff pattern:$0x75316420] }
 0x5a6   : > { %v1501_v35 = vpack.c.bf16 %v1497_v61, %v1497_v61  ;;  %v1502_v31 = vpack.c.bf16 %v1498_v16, %v1498_v16 }
 0x5a8   : > { %v1520_v15 = vsel %vm5854_vm13, %v1501_v35, 0  ;;  %v1523_v53 = vsel %vm5855_vm9, %v1502_v31, 0 }
 0x5a9   : > { %1532 = vmatpush.bf16.msra.mxu0 %v1520_v15  ;;  %1551 = vmatpush.bf16.msra.mxu1 %v1523_v53 }
 0x5ac   : > { %2815 = vmatmul.msk.bf16.vlgmr.msra.gmra.mxu0 %vm5856_vm4, %v4378_v32  ;;  %2817 = vmatmul.msk.bf16.vlgmr.msra.gmra.mxu1 %vm5857_vm8, %v4378_v32 }
 0x5bc   : > { %2816 = vmatmul.msk.bf16.gmra.mxu0 %vm5858_vm12, %v4387_v60  ;;  %2818 = vmatmul.msk.bf16.gmra.mxu1 %vm5859_vm2, %v4387_v60 }
 0x629   : > { %v1534_v49 = vpop.f32.mrf.mxu0  ;;  %v1553_v62 = vpop.f32.mrf.mxu1 }
 0x62a   : > { %v4651_v30 = vadd.f32 %v1534_v49, %v1505_v56  ;;  %v4653_v10 = vadd.f32 %v1553_v62, %v1505_v56 }
 0x62c   : > { %v2819_v52 = vmul.f32 -1.442695, %v4651_v30  ;;  %v2820_v41 = vmul.f32 -1.442695, %v4653_v10 }
 0x62e   : > { %3125 = vpow2.f32 %v2819_v52 }
 0x62f   : > { %3127 = vpow2.f32 %v2820_v41 }
 0x631   : > { %v1536_v39 = vpop.f32.mrf.mxu0  ;;  %v1555_v59 = vpop.f32.mrf.mxu1 }
 0x632   : > { %v4657_v63 = vadd.f32 %v1536_v39, %v1509_v28  ;;  %v4659_v5 = vadd.f32 %v1555_v59, %v1509_v28 }
 0x634   : > { %v2821_v18 = vmul.f32 -1.442695, %v4657_v63  ;;  %v2822_v54 = vmul.f32 -1.442695, %v4659_v5  ;;  %v3126_v3 = vpop.eup %3125 }
 0x635   : > { %v3128_v24 = vpop.eup %3127  ;;  %v4667_v26 = vadd.f32 1.0, %v3126_v3 }
 0x636   : > { %3129 = vpow2.f32 %v2821_v18  ;;  %v4671_v9 = vadd.f32 1.0, %v3128_v24 }
 0x637   : > { %3131 = vpow2.f32 %v2822_v54  ;;  %vm1600_vm6 = vweird.f32 %v4667_v26  ;;  %v1604_v49 = vand.u32 2147483647, %v4667_v26  ;;  %v1606_v62 = vand.u32 2147483648, %v4667_v26 }
 0x638   : > { %v1619_v54 = vand.u32 2147483647, %v4671_v9  ;;  %v1621_v3 = vand.u32 2147483648, %v4671_v9  ;;  %vm1615_vm13 = vweird.f32 %v4671_v9 }
 0x639   : > { %v1539_v25 = vpop.f32.mrf.mxu0  ;;  %v1558_v45 = vpop.f32.mrf.mxu1  ;;  %vm4779_vm4 = vcmp.eq.f32.partialorder %v1604_v49, 8.507059e+37 }
 0x63a   : > { %v4663_v23 = vadd.f32 %v1539_v25, %v1513_v4  ;;  %v4665_v34 = vadd.f32 %v1558_v45, %v1513_v4 }
 0x63c   : > { %v2823_v12 = vmul.f32 -1.442695, %v4663_v23  ;;  %v2824_v20 = vmul.f32 -1.442695, %v4665_v34  ;;  %v3130_v29 = vpop.eup %3129 }
 0x63d   : > { %v3132_v1 = vpop.eup %3131  ;;  %v4674_v17 = vadd.f32 1.0, %v3130_v29 }
 0x63e   : > { %3133 = vpow2.f32 %v2823_v12  ;;  %v4679_v36 = vadd.f32 1.0, %v3132_v1 }
 0x63f   : > { %3135 = vrcp.f32 %v4667_v26  ;;  %v1636_v52 = vand.u32 2147483648, %v4674_v17  ;;  %vm1630_vm15 = vweird.f32 %v4674_v17  ;;  %v1634_v29 = vand.u32 2147483647, %v4674_v17 }
 0x640   : > { %3137 = vpow2.f32 %v2824_v20  ;;  %v1651_v45 = vand.u32 2147483648, %v4679_v36  ;;  %v4736_v20 = vor.u32 1.1754944e-38, %v1606_v62  ;;  %vm1645_vm3 = vweird.f32 %v4679_v36 }
 0x641   : > { %v1541_v57 = vpop.f32.mrf.mxu0  ;;  %3139 = vrcp.f32 %v4671_v9  ;;  %v1560_v21 = vpop.f32.mrf.mxu1  ;;  %v1637_v1 = vor.u32 1.1754944e-38, %v1636_v52  ;;  %vm4767_vm14 = vcmp.eq.f32.partialorder %v1634_v29, 8.507059e+37 }
 0x642   : > { %v4677_v46 = vadd.f32 %v1541_v57, %v1517_v48  ;;  %3141 = vrcp.f32 %v4674_v17  ;;  %v4688_v40 = vadd.f32 %v1560_v21, %v1517_v48 }
 0x644   : > { %v3134_v8 = vpop.eup %3133  ;;  %v2825_v7 = vmul.f32 -1.442695, %v4677_v46  ;;  %v2826_v50 = vmul.f32 -1.442695, %v4688_v40 }
 0x645   : > { %v4681_v14 = vadd.f32 1.0, %v3134_v8  ;;  %v4683_v19 = vpop.eup %3135 }
 0x646   : > { %v3138_v47 = vpop.eup %3137  ;;  %v1596_v42 = vmul.f32 %v4683_v19, %v4667_v26  ;;  %vm1601_vm1 = vweird.f32 %v4683_v19  ;;  %v4762_v26 = vor.u32 1.1754944e-38, %v1651_v45 }
 0x647   : > { %3143 = vrcp.f32 %v4681_v14  ;;  %v4690_v11 = vpop.eup %3139  ;;  %v4695_v43 = vadd.f32 1.0, %v3138_v47  ;;  %vm4746_vm7 = vmor %vm1600_vm6, %vm1601_vm1  ;;  %v1649_v47 = vand.u32 2147483647, %v4679_v36  ;;  %vm1660_vm10 = vweird.f32 %v4681_v14 }
 0x648   : > { %3145 = vrcp.f32 %v4679_v36  ;;  %v4698_v27 = vpop.eup %3141  ;;  %v1611_v38 = vmul.f32 %v4690_v11, %v4671_v9  ;;  %v1597_v44 = vsub.f32 1.0, %v1596_v42  ;;  %v1664_v42 = vand.u32 2147483647, %v4681_v14 }
 0x649   : > { %3147 = vpow2.f32 %v2825_v7  ;;  %v1626_v16 = vmul.f32 %v4698_v27, %v4674_v17  ;;  %vm1616_vm0 = vweird.f32 %v4690_v11  ;;  %vm1631_vm5 = vweird.f32 %v4698_v27 }
 0x64a   : > { %3149 = vrcp.f32 %v4695_v43  ;;  %v1612_v31 = vsub.f32 1.0, %v1611_v38  ;;  %v1598_v15 = vmul.f32 %v4683_v19, %v1597_v44  ;;  %vm4787_vm12 = vcmp.eq.f32.partialorder %v1664_v42, 8.507059e+37  ;;  %vm4802_vm1 = vmor %vm1630_vm15, %vm1631_vm5 }
 0x64b   : > { %3151 = vpow2.f32 %v2826_v50  ;;  %v1627_v39 = vsub.f32 1.0, %v1626_v16  ;;  %v1666_v50 = vand.u32 2147483648, %v4681_v14  ;;  %vm1675_vm2 = vweird.f32 %v4695_v43 }
 0x64c   : > { %v1613_v18 = vmul.f32 %v4690_v11, %v1612_v31  ;;  %v4730_v25 = vadd.f32 %v4683_v19, %v1598_v15 }
 0x64d   : > { %v4703_v13 = vpop.eup %3143  ;;  %v1628_v57 = vmul.f32 %v4698_v27, %v1627_v39 }
 0x64e   : > { %v1656_v37 = vmul.f32 %v4703_v13, %v4681_v14  ;;  %v4707_v61 = vpop.eup %3145  ;;  %v4751_v7 = vadd.f32 %v4690_v11, %v1613_v18  ;;  %v1603_v44 = vsel %vm4746_vm7, %v4683_v19, %v4730_v25  ;;  %vm1661_vm11 = vweird.f32 %v4703_v13  ;;  %v1768_v25 = vpop.permute.xlu1 %1767 }
 0x64f   : > { %v3148_v35 = vpop.eup %3147  ;;  %v1641_v59 = vmul.f32 %v4707_v61, %v4679_v36  ;;  %v1629_v31 = vadd.f32 %v4698_v27, %v1628_v57  ;;  %vm1646_vm9 = vweird.f32 %v4707_v61  ;;  %vm4783_vm8 = vmor %vm1660_vm10, %vm1661_vm11  ;;  %vm4806_vm7 = vcmp.eq.f32.partialorder %v1649_v47, 8.507059e+37 }
 0x650   : > { %v1657_v53 = vsub.f32 1.0, %v1656_v37  ;;  %v4712_v4 = vadd.f32 1.0, %v3148_v35  ;;  %v4714_v56 = vpop.eup %3149 }
 0x651   : > { %v3152_v28 = vpop.eup %3151  ;;  %v1671_v41 = vmul.f32 %v4714_v56, %v4695_v43  ;;  %v1642_v8 = vsub.f32 1.0, %v1641_v59  ;;  %vm1676_vm6 = vweird.f32 %v4714_v56 }
 0x652   : > { %3153 = vrcp.f32 %v4712_v4  ;;  %v1658_v24 = vmul.f32 %v4703_v13, %v1657_v53  ;;  %v4734_v12 = vadd.f32 1.0, %v3152_v28  ;;  %v1679_v53 = vand.u32 2147483647, %v4695_v43  ;;  %vm4821_vm5 = vmor %vm1675_vm2, %vm1676_vm6 }
 0x653   : > { %v1672_v48 = vsub.f32 1.0, %v1671_v41  ;;  %v1643_v15 = vmul.f32 %v4707_v61, %v1642_v8  ;;  %v1667_v28 = vor.u32 1.1754944e-38, %v1666_v50  ;;  %v1694_v59 = vand.u32 2147483647, %v4712_v4  ;;  %vm4834_vm2 = vmor %vm1645_vm3, %vm1646_vm9 }
 0x654   : > { %3155 = vrcp.f32 %v4734_v12  ;;  %v1659_v37 = vadd.f32 %v4703_v13, %v1658_v24  ;;  %v1696_v18 = vand.u32 2147483648, %v4712_v4  ;;  %vm4816_vm15 = vcmp.eq.f32.partialorder %v1679_v53, 8.507059e+37  ;;  %vm4850_vm3 = vmor %vm1615_vm13, %vm1616_vm0 }
 0x655   : > { %v1673_v19 = vmul.f32 %v4714_v56, %v1672_v48  ;;  %v1633_v48 = vsel %vm4802_vm1, %v4698_v27, %v1629_v31  ;;  %v1644_v17 = vadd.f32 %v4707_v61, %v1643_v15  ;;  %v1681_v8 = vand.u32 2147483648, %v4695_v43 }
 0x656   : > { %v1663_v49 = vsel %vm4783_vm8, %v4703_v13, %v1659_v37  ;;  %vm1690_vm10 = vweird.f32 %v4712_v4  ;;  %vm1695_vm8 = vcmp.eq.f32.partialorder %v1694_v59, 8.507059e+37  ;;  %v1697_v50 = vor.u32 1.1754944e-38, %v1696_v18 }
 0x657   : > { %v1674_v13 = vadd.f32 %v4714_v56, %v1673_v19  ;;  %v1668_v27 = vsel %vm4787_vm12, %v1667_v28, %v1663_v49  ;;  %v1709_v37 = vand.u32 2147483647, %v4734_v12  ;;  %v1711_v19 = vand.u32 2147483648, %v4734_v12 }
 0x658   : > { %v3154_v38 = vpop.eup %3153  ;;  %v1638_v15 = vsel %vm4767_vm14, %v1637_v1, %v1633_v48  ;;  %v1648_v53 = vsel %vm4834_vm2, %v4707_v61, %v1644_v17  ;;  %v1682_v14 = vor.u32 1.1754944e-38, %v1681_v8  ;;  %vm1705_vm14 = vweird.f32 %v4734_v12 }
 0x659   : > { %v1686_v35 = vmul.f32 %v3154_v38, %v4712_v4  ;;  %vm1691_vm11 = vweird.f32 %v3154_v38  ;;  %v1678_v4 = vsel %vm4821_vm5, %v4714_v56, %v1674_v13  ;;  %v1719_v56 = vmul.f32 %v1668_v27, %v4663_v23 }
 0x65a   : > { %v3156_v41 = vpop.eup %3155  ;;  %vm1692_vm1 = vmor %vm1690_vm10, %vm1691_vm11  ;;  %v1608_v61 = vsel %vm4779_vm4, %v4736_v20, %v1603_v44  ;;  %v1618_v1 = vsel %vm4850_vm3, %v4690_v11, %v4751_v7  ;;  %v1683_v28 = vsel %vm4816_vm15, %v1682_v14, %v1678_v4  ;;  %v1717_v23 = vmul.f32 %v1638_v15, %v4657_v63 }
 0x65b   : > { %v1687_v39 = vsub.f32 1.0, %v1686_v35  ;;  %v1701_v29 = vmul.f32 %v3156_v41, %v4734_v12  ;;  %vm1706_vm12 = vweird.f32 %v3156_v41  ;;  %vm1710_vm13 = vcmp.eq.f32.partialorder %v1709_v37, 8.507059e+37 }
 0x65c   : > { %vm1707_vm0 = vmor %vm1705_vm14, %vm1706_vm12  ;;  %v1622_v12 = vor.u32 1.1754944e-38, %v1621_v3  ;;  %v1653_v20 = vsel %vm4806_vm7, %v4762_v26, %v1648_v53  ;;  %v1715_v11 = vmul.f32 %v1608_v61, %v4651_v30  ;;  %vm1620_vm9 = vcmp.eq.f32.partialorder %v1619_v54, 8.507059e+37 }
 0x65d   : > { %v1688_v24 = vmul.f32 %v3154_v38, %v1687_v39  ;;  %v1702_v42 = vsub.f32 1.0, %v1701_v29  ;;  %v1712_v39 = vor.u32 1.1754944e-38, %v1711_v19  ;;  %v1720_v7 = vmul.f32 %v1683_v28, %v4665_v34 }
 0x65e   : > { %v1623_v62 = vsel %vm1620_vm9, %v1622_v12, %v1618_v1  ;;  %v1723_v3 = vpack.c.bf16 %v1717_v23, %v1715_v11  ;;  %vm5882_vm4 = vcmask 261120   ;;  %v3395_v30 = vmov 5  }
 0x65f   : > { %v1689_v47 = vadd.f32 %v3154_v38, %v1688_v24  ;;  %v1703_v31 = vmul.f32 %v3156_v41, %v1702_v42  ;;  %v1716_v18 = vmul.f32 %v1623_v62, %v4653_v10  ;;  %vm5883_vm6 = vmmov %vm5882_vm4  ;;  %2990 = vset.pattern.permute.xlu1 %v3395_v30  ;;  %2989 = vset.pattern.permute.xlu0 %v3395_v30  ;;  %vm5884_vm7 = vcmask 1043456  }
 0x660   : > { %1784 = vperm.xlu1 %2990, %v4340_v6   ;;  %2988 = vset.pattern.permute.xlu2 %v3395_v30  ;;  %vm5885_vm11 = vcmask 1041408   ;;  %vm5887_vm5 = vcmask 31744  }
 0x661   : > { %v1693_v35 = vsel %vm1692_vm1, %v3154_v38, %v1689_v47  ;;  %v1704_v16 = vadd.f32 %v3156_v41, %v1703_v31  ;;  %1796 = vperm.xlu0 %2989, %v4346_v51   ;;  %1792 = vperm.xlu2 %2988, %v4352_v33   ;;  %v1772_v51 = vperm.slane %v1768_v25, %v3832_v55  ;;  %vm5886_vm15 = vmmov %vm5885_vm11 }
 0x662   : > { %v1698_v36 = vsel %vm1695_vm8, %v1697_v50, %v1693_v35  ;;  %vm5888_vm10 = vmmov %vm5887_vm5 }
 0x663   : > { %v1721_v38 = vmul.f32 %v1698_v36, %v4677_v46  ;;  %v1708_v59 = vsel %vm1707_vm0, %v3156_v41, %v1704_v16  ;;  %v1718_v41 = vmul.f32 %v1653_v20, %v4659_v5  ;;  %v1757_v5 = vstv %s2830_s17  ;;  %vm5889_vm8 = vmmov %vm5887_vm5  ;;  %s2887_s17 = sshll.u32 %s3377_s27, 3  ;;  %s2617_s27 = scalar_lea.sflag [#allocation3], %s321_s16 }
 0x664   : > { %v1713_v44 = vsel %vm1710_vm13, %v1712_v39, %v1708_v59  ;;  %vm5890_vm1 = vmmov %vm5887_vm5 }
 0x665   : > { %v1725_v46 = vpack.c.bf16 %v1721_v38, %v1719_v56  ;;  %v1722_v63 = vmul.f32 %v1713_v44, %v4688_v40  ;;  %v1724_v26 = vpack.c.bf16 %v1718_v41, %v1716_v18  ;;  %v1754_v40 = vstv %s2829_s18 }
 0x666   : > { %v1755_v13 = vmul.f32 %v1754_v40, %v4638_v58 }
 0x667   : > { %1733 = vmatpush.bf16.msra.mxu2 %v1725_v46  ;;  %v1726_v49 = vpack.c.bf16 %v1722_v63, %v1720_v7 }
 0x668   : > { %2047 = vperm.xlu1 %2990, %v4358_v0  }
 0x669   : > { %1746 = vmatpush.bf16.msra.mxu3 %v1726_v49  ;;  %1788 = vperm.xlu2 %2988, %v4364_v2  }
 0x66b   : > { %1734 = vmatpush.bf16.msra.mxu2 %v1723_v3 }
 0x66d   : > { %1747 = vmatpush.bf16.msra.mxu3 %v1724_v26 }
 0x66e   : > { %2827 = vmatmul.msk.bf16.vlgmr.msra.gmra.mxu2 %vm5882_vm4, %v4624_v22 }
 0x670   : > { %2828 = vmatmul.msk.bf16.vlgmr.msra.gmra.mxu3 %vm5883_vm6, %v4624_v22 }
 0x6bb   : > { %v1793_v58 = vpop.permute.xlu2 %1792 }
 0x6c3   : > { %v1789_v43 = vpop.permute.xlu2 %1788 }
 0x6d2   : > { %v1785_v47 = vpop.permute.xlu1 %1784 }
 0x6d3   : > { %v1797_v46 = vpop.permute.xlu0 %1796 }
 0x6f1   : > { %v1736_v10 = vpop.f32.mrf.mxu2 }
 0x6f2   : > { %v1758_v9 = vmul.f32 %v1757_v5, %v1736_v10 }
 0x6f3   : > { %v1749_v34 = vpop.f32.mrf.mxu3 }
 0x6f4   : > { %v1759_v54 = vmul.f32 %v1757_v5, %v1749_v34 }
 0x6f6   : > { %v1762_v45 = vrot.slane %v1759_v54, 4 }
 0x6f8   : > { %v1763_v24 = vsel %vm5884_vm7, %v1758_v9, %v1762_v45 }
 0x6f9   : > { %v1738_v6 = vpop.f32.mrf.mxu2  ;;  %v1765_v33 = vadd.f32 %v1763_v24, %v1755_v13 }
 0x6fb   : > { %v4891_v29 = vadd.f32 %v1772_v51, %v1765_v33  ;;  %v1751_v48 = vpop.f32.mrf.mxu3 }
 0x6fd   : > { %1776 = vst [vmem:[#allocation1] ss:$2 sm:$0xff] %v4891_v29 }
 0x704   : > { %v1777_v17 = vld.sshfl [vmem:[#allocation1] sm:$0xff pattern:$0x75316420]  ;;  %v1778_v57 = vld.sshfl [vmem:[#allocation1 + $0x8] sm:$0xff pattern:$0x75316420] }
 0x705   : > { %v1781_v0 = vpack.c.bf16 %v1777_v17, %v1777_v17  ;;  %v1782_v8 = vpack.c.bf16 %v1778_v57, %v1778_v57 }
 0x707   : > { %v1800_v21 = vsel %vm5885_vm11, %v1781_v0, 0  ;;  %v1803_v2 = vsel %vm5886_vm15, %v1782_v8, 0 }
 0x708   : > { %1812 = vmatpush.bf16.msrb.mxu2 %v1800_v21  ;;  %1831 = vmatpush.bf16.msrb.mxu3 %v1803_v2 }
 0x70b   : > { %2831 = vmatmul.msk.bf16.vlgmr.msrb.gmra.mxu2 %vm5887_vm5, %v4378_v32  ;;  %2833 = vmatmul.msk.bf16.vlgmr.msrb.gmra.mxu3 %vm5888_vm10, %v4378_v32 }
 0x71b   : > { %2832 = vmatmul.msk.bf16.gmra.mxu2 %vm5889_vm8, %v4387_v60  ;;  %2834 = vmatmul.msk.bf16.gmra.mxu3 %vm5890_vm1, %v4387_v60 }
 0x78e   : > { %v1814_v42 = vpop.f32.mrf.mxu2  ;;  %v1833_v27 = vpop.f32.mrf.mxu3 }
 0x78f   : > { %v4904_v50 = vadd.f32 %v1814_v42, %v1785_v47  ;;  %v4906_v37 = vadd.f32 %v1833_v27, %v1785_v47 }
 0x791   : > { %v2835_v19 = vmul.f32 -1.442695, %v4904_v50  ;;  %v2836_v32 = vmul.f32 -1.442695, %v4906_v37 }
 0x793   : > { %3157 = vpow2.f32 %v2835_v19 }
 0x794   : > { %3159 = vpow2.f32 %v2836_v32 }
 0x796   : > { %v1816_v4 = vpop.f32.mrf.mxu2  ;;  %v1835_v35 = vpop.f32.mrf.mxu3 }
 0x797   : > { %v4910_v31 = vadd.f32 %v1816_v4, %v1789_v43  ;;  %v4912_v15 = vadd.f32 %v1835_v35, %v1789_v43 }
 0x799   : > { %v2837_v60 = vmul.f32 -1.442695, %v4910_v31  ;;  %v2838_v53 = vmul.f32 -1.442695, %v4912_v15  ;;  %v3158_v14 = vpop.eup %3157 }
 0x79a   : > { %v3160_v16 = vpop.eup %3159  ;;  %v4920_v61 = vadd.f32 1.0, %v3158_v14 }
 0x79b   : > { %3161 = vpow2.f32 %v2837_v60  ;;  %v4924_v23 = vadd.f32 1.0, %v3160_v16 }
 0x79c   : > { %3163 = vpow2.f32 %v2838_v53  ;;  %vm1880_vm2 = vweird.f32 %v4920_v61  ;;  %v1884_v57 = vand.u32 2147483647, %v4920_v61  ;;  %v1886_v0 = vand.u32 2147483648, %v4920_v61 }
 0x79d   : > { %v1899_v27 = vand.u32 2147483647, %v4924_v23  ;;  %v1901_v19 = vand.u32 2147483648, %v4924_v23  ;;  %vm1895_vm11 = vweird.f32 %v4924_v23 }
 0x79e   : > { %v1819_v36 = vpop.f32.mrf.mxu2  ;;  %v1838_v52 = vpop.f32.mrf.mxu3  ;;  %v4989_v60 = vor.u32 1.1754944e-38, %v1886_v0  ;;  %vm5032_vm5 = vcmp.eq.f32.partialorder %v1884_v57, 8.507059e+37 }
 0x79f   : > { %v4916_v56 = vadd.f32 %v1819_v36, %v1793_v58  ;;  %v4918_v38 = vadd.f32 %v1838_v52, %v1793_v58 }
 0x7a1   : > { %v2839_v1 = vmul.f32 -1.442695, %v4916_v56  ;;  %v2840_v28 = vmul.f32 -1.442695, %v4918_v38  ;;  %v3162_v39 = vpop.eup %3161 }
 0x7a2   : > { %v3164_v12 = vpop.eup %3163  ;;  %v4927_v20 = vadd.f32 1.0, %v3162_v39 }
 0x7a3   : > { %3165 = vpow2.f32 %v2839_v1  ;;  %v4932_v63 = vadd.f32 1.0, %v3164_v12 }
 0x7a4   : > { %3167 = vrcp.f32 %v4920_v61  ;;  %v1916_v8 = vand.u32 2147483648, %v4927_v20  ;;  %vm1910_vm3 = vweird.f32 %v4927_v20  ;;  %v1914_v53 = vand.u32 2147483647, %v4927_v20 }
 0x7a5   : > { %3169 = vpow2.f32 %v2840_v28  ;;  %v1931_v4 = vand.u32 2147483648, %v4932_v63  ;;  %v1929_v39 = vand.u32 2147483647, %v4932_v63  ;;  %vm1925_vm13 = vweird.f32 %v4932_v63 }
 0x7a6   : > { %v1821_v59 = vpop.f32.mrf.mxu2  ;;  %3171 = vrcp.f32 %v4924_v23  ;;  %v1840_v7 = vpop.f32.mrf.mxu3  ;;  %v1917_v52 = vor.u32 1.1754944e-38, %v1916_v8  ;;  %vm5020_vm6 = vcmp.eq.f32.partialorder %v1914_v53, 8.507059e+37 }
 0x7a7   : > { %v4930_v11 = vadd.f32 %v1821_v59, %v1797_v46  ;;  %3173 = vrcp.f32 %v4927_v20  ;;  %v4941_v18 = vadd.f32 %v1840_v7, %v1797_v46 }
 0x7a9   : > { %v3166_v44 = vpop.eup %3165  ;;  %v2841_v49 = vmul.f32 -1.442695, %v4930_v11  ;;  %v2842_v5 = vmul.f32 -1.442695, %v4941_v18 }
 0x7aa   : > { %v4934_v62 = vadd.f32 1.0, %v3166_v44  ;;  %v4936_v41 = vpop.eup %3167 }
 0x7ab   : > { %v3170_v3 = vpop.eup %3169  ;;  %v1876_v30 = vmul.f32 %v4936_v41, %v4920_v61  ;;  %vm1881_vm12 = vweird.f32 %v4936_v41  ;;  %v5015_v61 = vor.u32 1.1754944e-38, %v1931_v4 }
 0x7ac   : > { %3175 = vrcp.f32 %v4934_v62  ;;  %v4943_v26 = vpop.eup %3171  ;;  %v4948_v10 = vadd.f32 1.0, %v3170_v3  ;;  %vm4999_vm14 = vmor %vm1880_vm2, %vm1881_vm12  ;;  %v1944_v46 = vand.u32 2147483647, %v4934_v62  ;;  %v1946_v59 = vand.u32 2147483648, %v4934_v62 }
 0x7ad   : > { %3177 = vrcp.f32 %v4932_v63  ;;  %v4951_v34 = vpop.eup %3173  ;;  %v1891_v9 = vmul.f32 %v4943_v26, %v4924_v23  ;;  %v1877_v54 = vsub.f32 1.0, %v1876_v30  ;;  %vm1896_vm0 = vweird.f32 %v4943_v26 }
 0x7ae   : > { %3179 = vpow2.f32 %v2841_v49  ;;  %v1906_v13 = vmul.f32 %v4951_v34, %v4927_v20  ;;  %vm1911_vm4 = vweird.f32 %v4951_v34  ;;  %vm1940_vm7 = vweird.f32 %v4934_v62 }
 0x7af   : > { %3181 = vrcp.f32 %v4948_v10  ;;  %v1892_v24 = vsub.f32 1.0, %v1891_v9  ;;  %v1878_v51 = vmul.f32 %v4936_v41, %v1877_v54  ;;  %v1959_v9 = vand.u32 2147483647, %v4948_v10  ;;  %vm5055_vm12 = vmor %vm1910_vm3, %vm1911_vm4 }
 0x7b0   : > { %3183 = vpow2.f32 %v2842_v5  ;;  %v1907_v2 = vsub.f32 1.0, %v1906_v13  ;;  %vm5040_vm8 = vcmp.eq.f32.partialorder %v1944_v46, 8.507059e+37  ;;  %v1947_v13 = vor.u32 1.1754944e-38, %v1946_v59 }
 0x7b1   : > { %v1893_v42 = vmul.f32 %v4943_v26, %v1892_v24  ;;  %v4983_v43 = vadd.f32 %v4936_v41, %v1878_v51  ;;  %vm1955_vm1 = vweird.f32 %v4948_v10  ;;  %vm5069_vm3 = vcmp.eq.f32.partialorder %v1959_v9, 8.507059e+37 }
 0x7b2   : > { %v4956_v40 = vpop.eup %3175  ;;  %v1908_v36 = vmul.f32 %v4951_v34, %v1907_v2  ;;  %v2037_v23 = vstv %s2846_s19 }
 0x7b3   : > { %v1936_v25 = vmul.f32 %v4956_v40, %v4934_v62  ;;  %v4960_v45 = vpop.eup %3177  ;;  %v5004_v28 = vadd.f32 %v4943_v26, %v1893_v42  ;;  %v1883_v44 = vsel %vm4999_vm14, %v4936_v41, %v4983_v43  ;;  %vm1941_vm9 = vweird.f32 %v4956_v40 }
 0x7b4   : > { %v3180_v6 = vpop.eup %3179  ;;  %v1921_v58 = vmul.f32 %v4960_v45, %v4932_v63  ;;  %v1909_v30 = vadd.f32 %v4951_v34, %v1908_v36  ;;  %vm1926_vm15 = vweird.f32 %v4960_v45  ;;  %vm5036_vm10 = vmor %vm1940_vm7, %vm1941_vm9  ;;  %vm5059_vm14 = vcmp.eq.f32.partialorder %v1929_v39, 8.507059e+37 }
 0x7b5   : > { %v1937_v33 = vsub.f32 1.0, %v1936_v25  ;;  %v4965_v48 = vadd.f32 1.0, %v3180_v6  ;;  %v4967_v17 = vpop.eup %3181  ;;  %v1961_v42 = vand.u32 2147483648, %v4948_v10  ;;  %v2034_v25 = vstv %s2845_s20  ;;  %s2630_s20 = scalar_lea.hbm %s5729_s7, %s2887_s17 }
 0x7b6   : > { %v3184_v21 = vpop.eup %3183  ;;  %v1951_v47 = vmul.f32 %v4967_v17, %v4948_v10  ;;  %v1922_v16 = vsub.f32 1.0, %v1921_v58  ;;  %vm1956_vm2 = vweird.f32 %v4967_v17  ;;  %v1913_v58 = vsel %vm5055_vm12, %v4951_v34, %v1909_v30  ;;  %s2634_s23 = sshll.u32 %s2630_s20, 4  ;;  %s2635_s23 = int_to_ptr.hbm [resolvable:$true] %s2634_s23 }
 0x7b7   : > { %3185 = vrcp.f32 %v4965_v48  ;;  %v1938_v35 = vmul.f32 %v4956_v40, %v1937_v33  ;;  %v4987_v32 = vadd.f32 1.0, %v3184_v21  ;;  %v1974_v24 = vand.u32 2147483647, %v4965_v48  ;;  %vm5074_vm4 = vmor %vm1955_vm1, %vm1956_vm2 }
 0x7b8   : > { %v1952_v14 = vsub.f32 1.0, %v1951_v47  ;;  %v1923_v5 = vmul.f32 %v4960_v45, %v1922_v16  ;;  %v1976_v57 = vand.u32 2147483648, %v4965_v48  ;;  %vm1970_vm7 = vweird.f32 %v4965_v48  ;;  %vm5087_vm1 = vmor %vm1925_vm13, %vm1926_vm15 }
 0x7b9   : > { %3187 = vrcp.f32 %v4987_v32  ;;  %v1939_v7 = vadd.f32 %v4956_v40, %v1938_v35  ;;  %v1991_v36 = vand.u32 2147483648, %v4987_v32  ;;  %v1918_v39 = vsel %vm5020_vm6, %v1917_v52, %v1913_v58  ;;  %vm5103_vm13 = vmor %vm1895_vm11, %vm1896_vm0 }
 0x7ba   : > { %v1953_v41 = vmul.f32 %v4967_v17, %v1952_v14  ;;  %v1924_v20 = vadd.f32 %v4960_v45, %v1923_v5  ;;  %v1977_v53 = vor.u32 1.1754944e-38, %v1976_v57  ;;  %v1989_v14 = vand.u32 2147483647, %v4987_v32 }
 0x7bb   : > { %v1943_v33 = vsel %vm5036_vm10, %v4956_v40, %v1939_v7  ;;  %vm1975_vm10 = vcmp.eq.f32.partialorder %v1974_v24, 8.507059e+37  ;;  %v1962_v59 = vor.u32 1.1754944e-38, %v1961_v42  ;;  %vm1985_vm6 = vweird.f32 %v4987_v32  ;;  %v2048_v24 = vpop.permute.xlu1 %2047 }
 0x7bc   : > { %v1954_v40 = vadd.f32 %v4967_v17, %v1953_v41  ;;  %v1948_v34 = vsel %vm5040_vm8, %v1947_v13, %v1943_v33  ;;  %v1928_v46 = vsel %vm5087_vm1, %v4960_v45, %v1924_v20  ;;  %v1888_v45 = vsel %vm5032_vm5, %v4989_v60, %v1883_v44  ;;  %v5163_v33 = vld [vmem:[%s5727_s5 + $0x8] sm:$0xff] }
 0x7bd   : > { %v3186_v12 = vpop.eup %3185  ;;  %v1898_v52 = vsel %vm5103_vm13, %v4943_v26, %v5004_v28  ;;  %vm1990_vm11 = vcmp.eq.f32.partialorder %v1989_v14, 8.507059e+37  ;;  %v1933_v60 = vsel %vm5059_vm14, %v5015_v61, %v1928_v46  ;;  %v1995_v26 = vmul.f32 %v1888_v45, %v4904_v50 }
 0x7be   : > { %v1966_v3 = vmul.f32 %v3186_v12, %v4965_v48  ;;  %vm1971_vm9 = vweird.f32 %v3186_v12  ;;  %v1958_v48 = vsel %vm5074_vm4, %v4967_v17, %v1954_v40  ;;  %v1999_v17 = vmul.f32 %v1948_v34, %v4916_v56  ;;  %v5186_v34 = vld [vmem:[%s5725_s3 + $0x8] sm:$0xff] }
 0x7bf   : > { %v3188_v51 = vpop.eup %3187  ;;  %vm1972_vm12 = vmor %vm1970_vm7, %vm1971_vm9  ;;  %v1963_v41 = vsel %vm5069_vm3, %v1962_v59, %v1958_v48  ;;  %v1997_v56 = vmul.f32 %v1918_v39, %v4910_v31  ;;  %vm1900_vm15 = vcmp.eq.f32.partialorder %v1899_v27, 8.507059e+37  ;;  %v1998_v9 = vmul.f32 %v1933_v60, %v4912_v15  ;;  %v5139_v15 = vld [vmem:[%s5727_s5] sm:$0xff] }
 0x7c0   : > { %v1967_v6 = vsub.f32 1.0, %v1966_v3  ;;  %v1981_v2 = vmul.f32 %v3188_v51, %v4987_v32  ;;  %vm1986_vm8 = vweird.f32 %v3188_v51  ;;  %v1992_v3 = vor.u32 1.1754944e-38, %v1991_v36 }
 0x7c1   : > { %vm1987_vm0 = vmor %vm1985_vm6, %vm1986_vm8  ;;  %v1902_v32 = vor.u32 1.1754944e-38, %v1901_v19  ;;  %v2000_v28 = vmul.f32 %v1963_v41, %v4918_v38  ;;  %v2003_v19 = vpack.c.bf16 %v1997_v56, %v1995_v26  ;;  %vm5913_vm5 = vcmask 261120  }
 0x7c2   : > { %v1968_v21 = vmul.f32 %v3186_v12, %v1967_v6  ;;  %v1982_v35 = vsub.f32 1.0, %v1981_v2  ;;  %vm5914_vm2 = vmmov %vm5913_vm5  ;;  %v3396_v50 = vmov 6   ;;  %v5157_v6 = vld [vmem:[%s5728_s6] sm:$0xf]  ;;  %v2035_v57 = vmul.f32 %v2034_v25, %v4891_v29 }
 0x7c3   : > { %v1903_v5 = vsel %vm1900_vm15, %v1902_v32, %v1898_v52  ;;  %2993 = vset.pattern.permute.xlu1 %v3396_v50  ;;  %2992 = vset.pattern.permute.xlu0 %v3396_v50  ;;  %vm5915_vm14 = vcmask 1043456   ;;  %v2052_v40 = vperm.slane %v2048_v24, %v3832_v55  ;;  %vm5916_vm9 = vcmask 1041408   ;;  %v5177_v29 = vld [vmem:[%s5725_s3] sm:$0xff] }
 0x7c4   : > { %v1969_v4 = vadd.f32 %v3186_v12, %v1968_v21  ;;  %v1983_v1 = vmul.f32 %v3188_v51, %v1982_v35  ;;  %v1996_v62 = vmul.f32 %v1903_v5, %v4906_v37  ;;  %2064 = vperm.xlu1 %2993, %v5139_v15   ;;  %2991 = vset.pattern.permute.xlu2 %v3396_v50  ;;  %v5145_v37 = vld [vmem:[%s5727_s5 + $0x18] sm:$0xff]  ;;  %vm5917_vm3 = vmmov %vm5916_vm9  ;;  %vm5918_vm4 = vcmask 31744  }
 0x7c5   : > { %2076 = vperm.xlu0 %2992, %v5145_v37   ;;  %vm5919_vm7 = vmmov %vm5918_vm4 }
 0x7c6   : > { %v1973_v16 = vsel %vm1972_vm12, %v3186_v12, %v1969_v4  ;;  %v1984_v49 = vadd.f32 %v3188_v51, %v1983_v1  ;;  %v2004_v61 = vpack.c.bf16 %v1998_v9, %v1996_v62  ;;  %vm5921_vm12 = vmmov %vm5918_vm4 }
 0x7c7   : > { %v1978_v63 = vsel %vm1975_vm10, %v1977_v53, %v1973_v16  ;;  %vm5920_vm10 = vmmov %vm5918_vm4 }
 0x7c8   : > { %v2001_v12 = vmul.f32 %v1978_v63, %v4930_v11  ;;  %v1988_v30 = vsel %vm1987_vm0, %v3188_v51, %v1984_v49 }
 0x7c9   : > { %v1993_v44 = vsel %vm1990_vm11, %v1992_v3, %v1988_v30 }
 0x7ca   : > { %v2005_v11 = vpack.c.bf16 %v2001_v12, %v1999_v17  ;;  %v2002_v31 = vmul.f32 %v1993_v44, %v4941_v18 }
 0x7cc   : > { %2013 = vmatpush.bf16.msrb.mxu0 %v2005_v11  ;;  %v2006_v54 = vpack.c.bf16 %v2002_v31, %v2000_v28  ;;  %2327 = vperm.xlu1 %2993, %v5157_v6  }
 0x7ce   : > { %2026 = vmatpush.bf16.msrb.mxu1 %v2006_v54 }
 0x7d0   : > { %2014 = vmatpush.bf16.msrb.mxu0 %v2003_v19 }
 0x7d2   : > { %2027 = vmatpush.bf16.msrb.mxu1 %v2004_v61 }
 0x7d3   : > { %2843 = vmatmul.msk.bf16.vlgmr.msrb.gmra.mxu0 %vm5913_vm5, %v4624_v22 }
 0x7d5   : > { %2844 = vmatmul.msk.bf16.vlgmr.msrb.gmra.mxu1 %vm5914_vm2, %v4624_v22  ;;  %v5151_v22 = vld [vmem:[%s5727_s5 + $0x10] sm:$0xff] }
 0x7d6   : > { %2072 = vperm.xlu2 %2991, %v5151_v22  }
 0x7de   : > { %2068 = vperm.xlu2 %2991, %v5163_v33  }
 0x830   : > { %v2073_v53 = vpop.permute.xlu2 %2072 }
 0x836   : > { %v2065_v14 = vpop.permute.xlu1 %2064 }
 0x837   : > { %v2077_v28 = vpop.permute.xlu0 %2076 }
 0x838   : > { %v2069_v39 = vpop.permute.xlu2 %2068 }
 0x850   : > { %v2016_v38 = vpop.f32.mrf.mxu0 }
 0x851   : > { %v2038_v27 = vmul.f32 %v2037_v23, %v2016_v38 }
 0x852   : > { %v2029_v18 = vpop.f32.mrf.mxu1 }
 0x853   : > { %v2039_v13 = vmul.f32 %v2037_v23, %v2029_v18 }
 0x855   : > { %v2042_v51 = vrot.slane %v2039_v13, 4 }
 0x857   : > { %v2043_v8 = vsel %vm5915_vm14, %v2038_v27, %v2042_v51 }
 0x858   : > { %v2018_v0 = vpop.f32.mrf.mxu0  ;;  %v2045_v21 = vadd.f32 %v2043_v8, %v2035_v57 }
 0x85a   : > { %v5169_v2 = vadd.f32 %v2052_v40, %v2045_v21  ;;  %v2031_v58 = vpop.f32.mrf.mxu1 }
 0x85c   : > { %2056 = vst [vmem:[#allocation1] ss:$2 sm:$0xff] %v5169_v2 }
 0x863   : > { %v2057_v20 = vld.sshfl [vmem:[#allocation1] sm:$0xff pattern:$0x75316420]  ;;  %v2058_v47 = vld.sshfl [vmem:[#allocation1 + $0x8] sm:$0xff pattern:$0x75316420] }
 0x864   : > { %v2061_v42 = vpack.c.bf16 %v2057_v20, %v2057_v20  ;;  %v2062_v43 = vpack.c.bf16 %v2058_v47, %v2058_v47 }
 0x866   : > { %v2080_v4 = vsel %vm5916_vm9, %v2061_v42, 0  ;;  %v2083_v35 = vsel %vm5917_vm3, %v2062_v43, 0 }
 0x867   : > { %2092 = vmatpush.bf16.msra.mxu0 %v2080_v4  ;;  %2111 = vmatpush.bf16.msra.mxu1 %v2083_v35 }
 0x86a   : > { %2847 = vmatmul.msk.bf16.vlgmr.msra.gmra.mxu0 %vm5918_vm4, %v5177_v29  ;;  %2849 = vmatmul.msk.bf16.vlgmr.msra.gmra.mxu1 %vm5919_vm7, %v5177_v29 }
 0x87a   : > { %2848 = vmatmul.msk.bf16.gmra.mxu0 %vm5920_vm10, %v5186_v34  ;;  %2850 = vmatmul.msk.bf16.gmra.mxu1 %vm5921_vm12, %v5186_v34 }
 0x8e7   : > { %v2094_v36 = vpop.f32.mrf.mxu0  ;;  %v2113_v10 = vpop.f32.mrf.mxu1 }
 0x8e8   : > { %v5192_v48 = vadd.f32 %v2094_v36, %v2065_v14  ;;  %v5194_v16 = vadd.f32 %v2113_v10, %v2065_v14 }
 0x8ea   : > { %v2851_v1 = vmul.f32 -1.442695, %v5192_v48  ;;  %v2852_v63 = vmul.f32 -1.442695, %v5194_v16 }
 0x8ec   : > { %3189 = vpow2.f32 %v2851_v1 }
 0x8ed   : > { %3191 = vpow2.f32 %v2852_v63 }
 0x8ef   : > { %v2096_v46 = vpop.f32.mrf.mxu0  ;;  %v2115_v59 = vpop.f32.mrf.mxu1 }
 0x8f0   : > { %v5198_v7 = vadd.f32 %v2096_v46, %v2069_v39  ;;  %v5200_v17 = vadd.f32 %v2115_v59, %v2069_v39 }
 0x8f2   : > { %v2853_v12 = vmul.f32 -1.442695, %v5198_v7  ;;  %v2854_v49 = vmul.f32 -1.442695, %v5200_v17  ;;  %v3190_v45 = vpop.eup %3189 }
 0x8f3   : > { %v3192_v11 = vpop.eup %3191  ;;  %v5208_v30 = vadd.f32 1.0, %v3190_v45 }
 0x8f4   : > { %3193 = vpow2.f32 %v2853_v12  ;;  %v5212_v26 = vadd.f32 1.0, %v3192_v11 }
 0x8f5   : > { %3195 = vpow2.f32 %v2854_v49  ;;  %vm2160_vm1 = vweird.f32 %v5208_v30  ;;  %v2164_v14 = vand.u32 2147483647, %v5208_v30  ;;  %v2166_v36 = vand.u32 2147483648, %v5208_v30 }
 0x8f6   : > { %v2179_v12 = vand.u32 2147483647, %v5212_v26  ;;  %v2181_v49 = vand.u32 2147483648, %v5212_v26  ;;  %vm2175_vm9 = vweird.f32 %v5212_v26 }
 0x8f7   : > { %v2099_v52 = vpop.f32.mrf.mxu0  ;;  %v2118_v41 = vpop.f32.mrf.mxu1  ;;  %vm5320_vm4 = vcmp.eq.f32.partialorder %v2164_v14, 8.507059e+37 }
 0x8f8   : > { %v5204_v3 = vadd.f32 %v2099_v52, %v2073_v53  ;;  %v5206_v56 = vadd.f32 %v2118_v41, %v2073_v53 }
 0x8fa   : > { %v2855_v32 = vmul.f32 -1.442695, %v5204_v3  ;;  %v2856_v60 = vmul.f32 -1.442695, %v5206_v56  ;;  %v3194_v44 = vpop.eup %3193 }
 0x8fb   : > { %v3196_v5 = vpop.eup %3195  ;;  %v5215_v9 = vadd.f32 1.0, %v3194_v44 }
 0x8fc   : > { %3197 = vpow2.f32 %v2855_v32  ;;  %v5220_v61 = vadd.f32 1.0, %v3196_v5  ;;  %v5277_v32 = vor.u32 1.1754944e-38, %v2166_v36 }
 0x8fd   : > { %3199 = vrcp.f32 %v5208_v30  ;;  %v2196_v10 = vand.u32 2147483648, %v5215_v9  ;;  %vm2190_vm13 = vweird.f32 %v5215_v9 }
 0x8fe   : > { %3201 = vpow2.f32 %v2856_v60  ;;  %v2211_v52 = vand.u32 2147483648, %v5220_v61  ;;  %v2194_v60 = vand.u32 2147483647, %v5215_v9  ;;  %vm2205_vm11 = vweird.f32 %v5220_v61 }
 0x8ff   : > { %v2101_v31 = vpop.f32.mrf.mxu0  ;;  %3203 = vrcp.f32 %v5212_v26  ;;  %v2120_v62 = vpop.f32.mrf.mxu1 }
 0x900   : > { %v5218_v19 = vadd.f32 %v2101_v31, %v2077_v28  ;;  %3205 = vrcp.f32 %v5215_v9  ;;  %v5229_v27 = vadd.f32 %v2120_v62, %v2077_v28  ;;  %v2197_v31 = vor.u32 1.1754944e-38, %v2196_v10 }
 0x901   : > { %vm5308_vm2 = vcmp.eq.f32.partialorder %v2194_v60, 8.507059e+37 }
 0x902   : > { %v3198_v54 = vpop.eup %3197  ;;  %v2857_v23 = vmul.f32 -1.442695, %v5218_v19  ;;  %v2858_v51 = vmul.f32 -1.442695, %v5229_v27 }
 0x903   : > { %v5222_v50 = vadd.f32 1.0, %v3198_v54  ;;  %v5224_v38 = vpop.eup %3199 }
 0x904   : > { %v3202_v18 = vpop.eup %3201  ;;  %v2156_v13 = vmul.f32 %v5224_v38, %v5208_v30  ;;  %vm2161_vm8 = vweird.f32 %v5224_v38  ;;  %v5303_v30 = vor.u32 1.1754944e-38, %v2211_v52 }
 0x905   : > { %3207 = vrcp.f32 %v5222_v50  ;;  %v5231_v25 = vpop.eup %3203  ;;  %v5236_v24 = vadd.f32 1.0, %v3202_v18  ;;  %vm5287_vm6 = vmor %vm2160_vm1, %vm2161_vm8  ;;  %v2224_v18 = vand.u32 2147483647, %v5222_v50  ;;  %vm2220_vm14 = vweird.f32 %v5222_v50 }
 0x906   : > { %3209 = vrcp.f32 %v5220_v61  ;;  %v5239_v57 = vpop.eup %3205  ;;  %v2171_v0 = vmul.f32 %v5231_v25, %v5212_v26  ;;  %v2157_v40 = vsub.f32 1.0, %v2156_v13  ;;  %v2226_v13 = vand.u32 2147483648, %v5222_v50 }
 0x907   : > { %3211 = vpow2.f32 %v2857_v23  ;;  %v2186_v20 = vmul.f32 %v5239_v57, %v5215_v9  ;;  %v2209_v23 = vand.u32 2147483647, %v5220_v61  ;;  %vm2176_vm0 = vweird.f32 %v5231_v25 }
 0x908   : > { %3213 = vrcp.f32 %v5236_v24  ;;  %v2172_v42 = vsub.f32 1.0, %v2171_v0  ;;  %v2158_v43 = vmul.f32 %v5224_v38, %v2157_v40  ;;  %vm2191_vm5 = vweird.f32 %v5239_v57 }
 0x909   : > { %3215 = vpow2.f32 %v2858_v51  ;;  %v2187_v39 = vsub.f32 1.0, %v2186_v20  ;;  %vm5328_vm10 = vcmp.eq.f32.partialorder %v2224_v18, 8.507059e+37  ;;  %v2227_v10 = vor.u32 1.1754944e-38, %v2226_v13  ;;  %vm5343_vm8 = vmor %vm2190_vm13, %vm2191_vm5 }
 0x90a   : > { %v2173_v63 = vmul.f32 %v5231_v25, %v2172_v42  ;;  %v5271_v45 = vadd.f32 %v5224_v38, %v2158_v43  ;;  %v2239_v43 = vand.u32 2147483647, %v5236_v24  ;;  %vm2235_vm12 = vweird.f32 %v5236_v24 }
 0x90b   : > { %v5244_v8 = vpop.eup %3207  ;;  %v2188_v28 = vmul.f32 %v5239_v57, %v2187_v39 }
 0x90c   : > { %v2216_v21 = vmul.f32 %v5244_v8, %v5222_v50  ;;  %v5248_v58 = vpop.eup %3209  ;;  %v5292_v62 = vadd.f32 %v5231_v25, %v2173_v63  ;;  %v2163_v0 = vsel %vm5287_vm6, %v5224_v38, %v5271_v45  ;;  %vm2221_vm15 = vweird.f32 %v5244_v8  ;;  %v2328_v63 = vpop.permute.xlu1 %2327 }
 0x90d   : > { %v3212_v47 = vpop.eup %3211  ;;  %v2201_v46 = vmul.f32 %v5248_v58, %v5220_v61  ;;  %vm2206_vm3 = vweird.f32 %v5248_v58  ;;  %vm5324_vm7 = vmor %vm2220_vm14, %vm2221_vm15  ;;  %vm5347_vm6 = vcmp.eq.f32.partialorder %v2209_v23, 8.507059e+37  ;;  %vm5357_vm13 = vcmp.eq.f32.partialorder %v2239_v43, 8.507059e+37 }
 0x90e   : > { %v2217_v4 = vsub.f32 1.0, %v2216_v21  ;;  %v5253_v35 = vadd.f32 1.0, %v3212_v47  ;;  %v5255_v53 = vpop.eup %3213  ;;  %v2189_v47 = vadd.f32 %v5239_v57, %v2188_v28  ;;  %v2241_v28 = vand.u32 2147483648, %v5236_v24 }
 0x90f   : > { %v3216_v1 = vpop.eup %3215  ;;  %v2231_v59 = vmul.f32 %v5255_v53, %v5236_v24  ;;  %v2202_v5 = vsub.f32 1.0, %v2201_v46  ;;  %vm2236_vm1 = vweird.f32 %v5255_v53 }
 0x910   : > { %3217 = vrcp.f32 %v5253_v35  ;;  %v2218_v41 = vmul.f32 %v5244_v8, %v2217_v4  ;;  %v5275_v11 = vadd.f32 1.0, %v3216_v1  ;;  %v2254_v39 = vand.u32 2147483647, %v5253_v35  ;;  %vm5362_vm5 = vmor %vm2235_vm12, %vm2236_vm1 }
 0x911   : > { %v2232_v44 = vsub.f32 1.0, %v2231_v59  ;;  %v2203_v42 = vmul.f32 %v5248_v58, %v2202_v5  ;;  %v2256_v59 = vand.u32 2147483648, %v5253_v35  ;;  %v2193_v60 = vsel %vm5343_vm8, %v5239_v57, %v2189_v47  ;;  %vm5375_vm12 = vmor %vm2205_vm11, %vm2206_vm3 }
 0x912   : > { %3219 = vrcp.f32 %v5275_v11  ;;  %v2219_v40 = vadd.f32 %v5244_v8, %v2218_v41  ;;  %vm2250_vm14 = vweird.f32 %v5253_v35  ;;  %v2269_v13 = vand.u32 2147483647, %v5275_v11  ;;  %vm5391_vm11 = vmor %vm2175_vm9, %vm2176_vm0 }
 0x913   : > { %v2233_v38 = vmul.f32 %v5255_v53, %v2232_v44  ;;  %v2204_v9 = vadd.f32 %v5248_v58, %v2203_v42  ;;  %v2257_v18 = vor.u32 1.1754944e-38, %v2256_v59  ;;  %v2198_v47 = vsel %vm5308_vm2, %v2197_v31, %v2193_v60 }
 0x914   : > { %v2223_v14 = vsel %vm5324_vm7, %v5244_v8, %v2219_v40  ;;  %vm2255_vm7 = vcmp.eq.f32.partialorder %v2254_v39, 8.507059e+37  ;;  %v2271_v40 = vand.u32 2147483648, %v5275_v11  ;;  %v2242_v43 = vor.u32 1.1754944e-38, %v2241_v28 }
 0x915   : > { %v2234_v8 = vadd.f32 %v5255_v53, %v2233_v38  ;;  %v2228_v57 = vsel %vm5328_vm10, %v2227_v10, %v2223_v14  ;;  %v2208_v42 = vsel %vm5375_vm12, %v5248_v58, %v2204_v9  ;;  %vm2265_vm2 = vweird.f32 %v5275_v11 }
 0x916   : > { %v3218_v51 = vpop.eup %3217  ;;  %v2168_v58 = vsel %vm5320_vm4, %v5277_v32, %v2163_v0  ;;  %v2178_v31 = vsel %vm5391_vm11, %v5231_v25, %v5292_v62  ;;  %v2272_v10 = vor.u32 1.1754944e-38, %v2271_v40  ;;  %vm2270_vm9 = vcmp.eq.f32.partialorder %v2269_v13, 8.507059e+37 }
 0x917   : > { %v2246_v20 = vmul.f32 %v3218_v51, %v5253_v35  ;;  %vm2251_vm15 = vweird.f32 %v3218_v51  ;;  %v2238_v35 = vsel %vm5362_vm5, %v5255_v53, %v2234_v8  ;;  %v2279_v53 = vmul.f32 %v2228_v57, %v5204_v3 }
 0x918   : > { %v3220_v46 = vpop.eup %3219  ;;  %vm2252_vm8 = vmor %vm2250_vm14, %vm2251_vm15  ;;  %v2243_v36 = vsel %vm5357_vm13, %v2242_v43, %v2238_v35  ;;  %v2277_v3 = vmul.f32 %v2198_v47, %v5198_v7  ;;  %v2213_v32 = vsel %vm5347_vm6, %v5303_v30, %v2208_v42  ;;  %v2275_v25 = vmul.f32 %v2168_v58, %v5192_v48  ;;  %v5423_v48 = vld [vmem:[%s5726_s4] sm:$0x3] }
 0x919   : > { %v2247_v1 = vsub.f32 1.0, %v2246_v20  ;;  %v2261_v41 = vmul.f32 %v3220_v46, %v5275_v11  ;;  %vm2266_vm10 = vweird.f32 %v3220_v46  ;;  %v2182_v11 = vor.u32 1.1754944e-38, %v2181_v49 }
 0x91a   : > { %vm2267_vm0 = vmor %vm2265_vm2, %vm2266_vm10  ;;  %vm2180_vm3 = vcmp.eq.f32.partialorder %v2179_v12, 8.507059e+37  ;;  %v2280_v62 = vmul.f32 %v2243_v36, %v5206_v56  ;;  %v2278_v39 = vmul.f32 %v2213_v32, %v5200_v17  ;;  %v2283_v49 = vpack.c.bf16 %v2277_v3, %v2275_v25 }
 0x91b   : > { %v2248_v52 = vmul.f32 %v3218_v51, %v2247_v1  ;;  %v2262_v23 = vsub.f32 1.0, %v2261_v41  ;;  %v2183_v4 = vsel %vm2180_vm3, %v2182_v11, %v2178_v31  ;;  %vm5944_vm4 = vcmask 261120  }
 0x91c   : > { %v2276_v14 = vmul.f32 %v2183_v4, %v5194_v16  ;;  %vm5945_vm1 = vmmov %vm5944_vm4  ;;  %v3397_v17 = vmov 7   ;;  %v2317_v56 = vstv %s2862_s30  ;;  %v2314_v12 = vstv %s2861_s8  ;;  %s3313_s30 = sshra.s32 %s2635_s23, 4  ;;  %s3314_s30 = int_to_ptr.hbm [resolvable:$true] %s3313_s30 }
 0x91d   : > { %v2249_v54 = vadd.f32 %v3218_v51, %v2248_v52  ;;  %v2263_v20 = vmul.f32 %v3220_v46, %v2262_v23  ;;  %2996 = vset.pattern.permute.xlu1 %v3397_v17  ;;  %2995 = vset.pattern.permute.xlu0 %v3397_v17  ;;  %v2315_v8 = vmul.f32 %v2314_v12, %v5169_v2  ;;  %vm5946_vm6 = vcmask 1043456   ;;  %s3315_s8 = scalar_lea.hbm %s3314_s30, 8  ;;  %p3320_p5 = scmp.lt.s32.totalorder %s3314_s30, %s5729_s7 }
 0x91e   : > { %v2284_v30 = vpack.c.bf16 %v2278_v39, %v2276_v14  ;;  %2344 = vperm.xlu1 %2996, %v5139_v15   ;;  %2994 = vset.pattern.permute.xlu2 %v3397_v17  ;;  %vm5947_vm15 = vcmask 1041408   ;;  %vm5949_vm5 = vcmask 31744   ;;  %p3316_p1 = scmp.ne.s32.totalorder %s3314_s30, %s3315_s8  ;;  %p3321_p6 = scmp.lt.s32.totalorder %s3319_s15, %s3315_s8 }
 0x91f   : > { %v2253_v38 = vsel %vm2252_vm8, %v3218_v51, %v2249_v54  ;;  %v2264_v21 = vadd.f32 %v3220_v46, %v2263_v20  ;;  %2356 = vperm.xlu0 %2995, %v5145_v37   ;;  %2352 = vperm.xlu2 %2994, %v5151_v22   ;;  %v2332_v37 = vperm.slane %v2328_v63, %v3832_v55  ;;  %vm5948_vm13 = vmmov %vm5947_vm15 }
 0x920   : > { %v2258_v61 = vsel %vm2255_vm7, %v2257_v18, %v2253_v38  ;;  %vm5950_vm14 = vmmov %vm5949_vm5  ;;  %p3317_p2 = pnand %p3316_p1, %p3478_p4  ;;  %p3322_p7 = por %p3321_p6, %p3320_p5 }
 0x921   : > { %v2281_v51 = vmul.f32 %v2258_v61, %v5218_v19  ;;  %v2268_v1 = vsel %vm2267_vm0, %v3220_v46, %v2264_v21  ;;  %vm5951_vm7 = vmmov %vm5949_vm5 }
 0x922   : > { %v2273_v0 = vsel %vm2270_vm9, %v2272_v10, %v2268_v1  ;;  %vm5952_vm8 = vmmov %vm5949_vm5  ;;  %p3318_p3 = pneg %p3317_p2 }
 0x923   : > { %v2285_v19 = vpack.c.bf16 %v2281_v51, %v2279_v53  ;;  %v2282_v7 = vmul.f32 %v2273_v0, %v5229_v27 }
 0x924   : > { %p3323_p9 = pnand %p3322_p7, %p3318_p3 }
 0x925   : > { %2293 = vmatpush.bf16.msra.mxu2 %v2285_v19  ;;  %v2286_v46 = vpack.c.bf16 %v2282_v7, %v2280_v62 }
 0x926   : > { %2607 = vperm.xlu1 %2996, %v5157_v6  }
 0x927   : > { %2306 = vmatpush.bf16.msra.mxu3 %v2286_v46  ;;  %2348 = vperm.xlu2 %2994, %v5163_v33  }
 0x929   : > { %2294 = vmatpush.bf16.msra.mxu2 %v2283_v49 }
 0x92b   : > { %2307 = vmatpush.bf16.msra.mxu3 %v2284_v30 }
 0x92c   : > { %2859 = vmatmul.msk.bf16.vlgmr.msra.gmra.mxu2 %vm5944_vm4, %v5423_v48 }
 0x92e   : > { %2860 = vmatmul.msk.bf16.vlgmr.msra.gmra.mxu3 %vm5945_vm1, %v5423_v48 }
 0x979   : > { %v2353_v2 = vpop.permute.xlu2 %2352 }
 0x981   : > { %v2349_v24 = vpop.permute.xlu2 %2348 }
 0x990   : > { %v2345_v54 = vpop.permute.xlu1 %2344 }
 0x991   : > { %v2357_v19 = vpop.permute.xlu0 %2356 }
 0x9af   : > { %v2296_v16 = vpop.f32.mrf.mxu2 }
 0x9b0   : > { %v2318_v27 = vmul.f32 %v2317_v56, %v2296_v16 }
 0x9b1   : > { %v2309_v26 = vpop.f32.mrf.mxu3 }
 0x9b2   : > { %v2319_v59 = vmul.f32 %v2317_v56, %v2309_v26 }
 0x9b4   : > { %v2322_v45 = vrot.slane %v2319_v59, 4 }
 0x9b6   : > { %v2323_v52 = vsel %vm5946_vm6, %v2318_v27, %v2322_v45 }
 0x9b7   : > { %v2298_v15 = vpop.f32.mrf.mxu2  ;;  %v2325_v22 = vadd.f32 %v2323_v52, %v2315_v8 }
 0x9b9   : > { %v5437_v41 = vadd.f32 %v2332_v37, %v2325_v22  ;;  %v2311_v60 = vpop.f32.mrf.mxu3 }
 0x9bb   : > { %2336 = vst [vmem:[#allocation1] ss:$2 sm:$0xff] %v5437_v41 }
 0x9c2   : > { %v2337_v9 = vld.sshfl [vmem:[#allocation1] sm:$0xff pattern:$0x75316420]  ;;  %v2338_v44 = vld.sshfl [vmem:[#allocation1 + $0x8] sm:$0xff pattern:$0x75316420] }
 0x9c3   : > { %v2341_v6 = vpack.c.bf16 %v2337_v9, %v2337_v9  ;;  %v2342_v28 = vpack.c.bf16 %v2338_v44, %v2338_v44 }
 0x9c5   : > { %v2360_v5 = vsel %vm5947_vm15, %v2341_v6, 0  ;;  %v2363_v33 = vsel %vm5948_vm13, %v2342_v28, 0 }
 0x9c6   : > { %2372 = vmatpush.bf16.msrb.mxu2 %v2360_v5  ;;  %2391 = vmatpush.bf16.msrb.mxu3 %v2363_v33 }
 0x9c9   : > { %2863 = vmatmul.msk.bf16.vlgmr.msrb.gmra.mxu2 %vm5949_vm5, %v5177_v29  ;;  %2865 = vmatmul.msk.bf16.vlgmr.msrb.gmra.mxu3 %vm5950_vm14, %v5177_v29 }
 0x9d9   : > { %2864 = vmatmul.msk.bf16.gmra.mxu2 %vm5951_vm7, %v5186_v34  ;;  %2866 = vmatmul.msk.bf16.gmra.mxu3 %vm5952_vm8, %v5186_v34 }
 0xa4c   : > { %v2374_v23 = vpop.f32.mrf.mxu2  ;;  %v2393_v57 = vpop.f32.mrf.mxu3 }
 0xa4d   : > { %v5450_v18 = vadd.f32 %v2374_v23, %v2345_v54  ;;  %v5452_v13 = vadd.f32 %v2393_v57, %v2345_v54 }
 0xa4f   : > { %v2867_v40 = vmul.f32 -1.442695, %v5450_v18  ;;  %v2868_v29 = vmul.f32 -1.442695, %v5452_v13 }
 0xa51   : > { %3221 = vpow2.f32 %v2867_v40 }
 0xa52   : > { %3223 = vpow2.f32 %v2868_v29 }
 0xa54   : > { %v2376_v35 = vpop.f32.mrf.mxu2  ;;  %v2395_v38 = vpop.f32.mrf.mxu3 }
 0xa55   : > { %v5456_v20 = vadd.f32 %v2376_v35, %v2349_v24  ;;  %v5458_v47 = vadd.f32 %v2395_v38, %v2349_v24 }
 0xa57   : > { %v2869_v34 = vmul.f32 -1.442695, %v5456_v20  ;;  %v2870_v42 = vmul.f32 -1.442695, %v5458_v47  ;;  %v3222_v43 = vpop.eup %3221 }
 0xa58   : > { %v3224_v21 = vpop.eup %3223  ;;  %v5466_v58 = vadd.f32 1.0, %v3222_v43 }
 0xa59   : > { %3225 = vpow2.f32 %v2869_v34  ;;  %v5470_v3 = vadd.f32 1.0, %v3224_v21 }
 0xa5a   : > { %3227 = vpow2.f32 %v2870_v42  ;;  %vm2440_vm12 = vweird.f32 %v5466_v58  ;;  %v2444_v44 = vand.u32 2147483647, %v5466_v58  ;;  %v2446_v6 = vand.u32 2147483648, %v5466_v58 }
 0xa5b   : > { %v2459_v57 = vand.u32 2147483647, %v5470_v3  ;;  %v2461_v40 = vand.u32 2147483648, %v5470_v3  ;;  %vm2455_vm15 = vweird.f32 %v5470_v3 }
 0xa5c   : > { %v2379_v61 = vpop.f32.mrf.mxu2  ;;  %v2398_v50 = vpop.f32.mrf.mxu3  ;;  %v5535_v34 = vor.u32 1.1754944e-38, %v2446_v6  ;;  %vm5578_vm5 = vcmp.eq.f32.partialorder %v2444_v44, 8.507059e+37 }
 0xa5d   : > { %v5462_v53 = vadd.f32 %v2379_v61, %v2353_v2  ;;  %v5464_v51 = vadd.f32 %v2398_v50, %v2353_v2 }
 0xa5f   : > { %v2871_v31 = vmul.f32 -1.442695, %v5462_v53  ;;  %v2872_v36 = vmul.f32 -1.442695, %v5464_v51  ;;  %v3226_v10 = vpop.eup %3225 }
 0xa60   : > { %v3228_v11 = vpop.eup %3227  ;;  %v5473_v32 = vadd.f32 1.0, %v3226_v10 }
 0xa61   : > { %3229 = vpow2.f32 %v2871_v31  ;;  %v5478_v7 = vadd.f32 1.0, %v3228_v11 }
 0xa62   : > { %3231 = vrcp.f32 %v5466_v58  ;;  %v2476_v28 = vand.u32 2147483648, %v5473_v32  ;;  %vm2470_vm11 = vweird.f32 %v5473_v32  ;;  %v2474_v42 = vand.u32 2147483647, %v5473_v32 }
 0xa63   : > { %3233 = vpow2.f32 %v2872_v36  ;;  %v2491_v35 = vand.u32 2147483648, %v5478_v7  ;;  %v2489_v10 = vand.u32 2147483647, %v5478_v7  ;;  %vm2485_vm9 = vweird.f32 %v5478_v7 }
 0xa64   : > { %v2381_v1 = vpop.f32.mrf.mxu2  ;;  %3235 = vrcp.f32 %v5470_v3  ;;  %v2400_v62 = vpop.f32.mrf.mxu3  ;;  %v2477_v50 = vor.u32 1.1754944e-38, %v2476_v28  ;;  %vm5566_vm1 = vcmp.eq.f32.partialorder %v2474_v42, 8.507059e+37 }
 0xa65   : > { %v5476_v25 = vadd.f32 %v2381_v1, %v2357_v19  ;;  %3237 = vrcp.f32 %v5473_v32  ;;  %v5487_v14 = vadd.f32 %v2400_v62, %v2357_v19 }
 0xa67   : > { %v3230_v0 = vpop.eup %3229  ;;  %v2873_v46 = vmul.f32 -1.442695, %v5476_v25  ;;  %v2874_v56 = vmul.f32 -1.442695, %v5487_v14 }
 0xa68   : > { %v5480_v4 = vadd.f32 1.0, %v3230_v0  ;;  %v5482_v39 = vpop.eup %3231 }
 0xa69   : > { %v3234_v49 = vpop.eup %3233  ;;  %v2436_v17 = vmul.f32 %v5482_v39, %v5466_v58  ;;  %vm2441_vm10 = vweird.f32 %v5482_v39  ;;  %v5561_v58 = vor.u32 1.1754944e-38, %v2491_v35 }
 0xa6a   : > { %3239 = vrcp.f32 %v5480_v4  ;;  %v5489_v30 = vpop.eup %3235  ;;  %v5494_v16 = vadd.f32 1.0, %v3234_v49  ;;  %vm5545_vm2 = vmor %vm2440_vm12, %vm2441_vm10  ;;  %v2504_v19 = vand.u32 2147483647, %v5480_v4  ;;  %v2506_v1 = vand.u32 2147483648, %v5480_v4 }
 0xa6b   : > { %3241 = vrcp.f32 %v5478_v7  ;;  %v5497_v26 = vpop.eup %3237  ;;  %v2451_v27 = vmul.f32 %v5489_v30, %v5470_v3  ;;  %v2437_v59 = vsub.f32 1.0, %v2436_v17  ;;  %vm2456_vm0 = vweird.f32 %v5489_v30 }
 0xa6c   : > { %3243 = vpow2.f32 %v2873_v46  ;;  %v2466_v8 = vmul.f32 %v5497_v26, %v5473_v32  ;;  %vm2471_vm4 = vweird.f32 %v5497_v26  ;;  %vm2500_vm6 = vweird.f32 %v5480_v4 }
 0xa6d   : > { %3245 = vrcp.f32 %v5494_v16  ;;  %v2452_v52 = vsub.f32 1.0, %v2451_v27  ;;  %v2438_v37 = vmul.f32 %v5482_v39, %v2437_v59  ;;  %v2519_v27 = vand.u32 2147483647, %v5494_v16  ;;  %vm5601_vm10 = vmor %vm2470_vm11, %vm2471_vm4 }
 0xa6e   : > { %3247 = vpow2.f32 %v2874_v56  ;;  %v2467_v33 = vsub.f32 1.0, %v2466_v8  ;;  %vm5586_vm7 = vcmp.eq.f32.partialorder %v2504_v19, 8.507059e+37  ;;  %v2507_v8 = vor.u32 1.1754944e-38, %v2506_v1 }
 0xa6f   : > { %v2453_v23 = vmul.f32 %v5489_v30, %v2452_v52  ;;  %v5529_v24 = vadd.f32 %v5482_v39, %v2438_v37  ;;  %vm2515_vm8 = vweird.f32 %v5494_v16  ;;  %vm5615_vm11 = vcmp.eq.f32.partialorder %v2519_v27, 8.507059e+37 }
 0xa70   : > { %v5502_v12 = vpop.eup %3239  ;;  %v2468_v61 = vmul.f32 %v5497_v26, %v2467_v33 }
 0xa71   : > { %v2496_v63 = vmul.f32 %v5502_v12, %v5480_v4  ;;  %v5506_v45 = vpop.eup %3241  ;;  %v5550_v36 = vadd.f32 %v5489_v30, %v2453_v23  ;;  %v2443_v0 = vsel %vm5545_vm2, %v5482_v39, %v5529_v24  ;;  %vm2501_vm3 = vweird.f32 %v5502_v12  ;;  %v2608_v4 = vpop.permute.xlu1 %2607 }
 0xa72   : > { %v3244_v15 = vpop.eup %3243  ;;  %v2481_v2 = vmul.f32 %v5506_v45, %v5478_v7  ;;  %v2469_v17 = vadd.f32 %v5497_v26, %v2468_v61  ;;  %vm2486_vm13 = vweird.f32 %v5506_v45  ;;  %vm5582_vm14 = vmor %vm2500_vm6, %vm2501_vm3  ;;  %vm5605_vm2 = vcmp.eq.f32.partialorder %v2489_v10, 8.507059e+37 }
 0xa73   : > { %v2497_v22 = vsub.f32 1.0, %v2496_v63  ;;  %v5511_v60 = vadd.f32 1.0, %v3244_v15  ;;  %v5513_v9 = vpop.eup %3245  ;;  %v2521_v23 = vand.u32 2147483648, %v5494_v16 }
 0xa74   : > { %v3248_v5 = vpop.eup %3247  ;;  %v2511_v54 = vmul.f32 %v5513_v9, %v5494_v16  ;;  %v2482_v21 = vsub.f32 1.0, %v2481_v2  ;;  %vm2516_vm12 = vweird.f32 %v5513_v9  ;;  %v2473_v2 = vsel %vm5601_vm10, %v5497_v26, %v2469_v17 }
 0xa75   : > { %3249 = vrcp.f32 %v5511_v60  ;;  %v2498_v38 = vmul.f32 %v5502_v12, %v2497_v22  ;;  %v5533_v29 = vadd.f32 1.0, %v3248_v5  ;;  %v2534_v52 = vand.u32 2147483647, %v5511_v60  ;;  %vm5620_vm4 = vmor %vm2515_vm8, %vm2516_vm12 }
 0xa76   : > { %v2512_v43 = vsub.f32 1.0, %v2511_v54  ;;  %v2483_v56 = vmul.f32 %v5506_v45, %v2482_v21  ;;  %v2536_v44 = vand.u32 2147483648, %v5511_v60  ;;  %vm2530_vm6 = vweird.f32 %v5511_v60  ;;  %vm5633_vm8 = vmor %vm2485_vm9, %vm2486_vm13 }
 0xa77   : > { %3251 = vrcp.f32 %v5533_v29  ;;  %v2499_v62 = vadd.f32 %v5502_v12, %v2498_v38  ;;  %v2551_v61 = vand.u32 2147483648, %v5533_v29  ;;  %v2478_v10 = vsel %vm5566_vm1, %v2477_v50, %v2473_v2  ;;  %vm5649_vm9 = vmor %vm2455_vm15, %vm2456_vm0 }
 0xa78   : > { %v2513_v39 = vmul.f32 %v5513_v9, %v2512_v43  ;;  %v2484_v32 = vadd.f32 %v5506_v45, %v2483_v56  ;;  %v2537_v42 = vor.u32 1.1754944e-38, %v2536_v44  ;;  %v2549_v43 = vand.u32 2147483647, %v5533_v29 }
 0xa79   : > { %v2503_v22 = vsel %vm5582_vm14, %v5502_v12, %v2499_v62  ;;  %vm2535_vm14 = vcmp.eq.f32.partialorder %v2534_v52, 8.507059e+37  ;;  %v2522_v1 = vor.u32 1.1754944e-38, %v2521_v23  ;;  %vm2545_vm1 = vweird.f32 %v5533_v29 }
 0xa7a   : > { %v2514_v12 = vadd.f32 %v5513_v9, %v2513_v39  ;;  %v2508_v26 = vsel %vm5586_vm7, %v2507_v8, %v2503_v22  ;;  %v2488_v19 = vsel %vm5633_vm8, %v5506_v45, %v2484_v32  ;;  %v2448_v45 = vsel %vm5578_vm5, %v5535_v34, %v2443_v0 }
 0xa7b   : > { %v3250_v11 = vpop.eup %3249  ;;  %v2458_v50 = vsel %vm5649_vm9, %v5489_v30, %v5550_v36  ;;  %vm2550_vm15 = vcmp.eq.f32.partialorder %v2549_v43, 8.507059e+37  ;;  %v2493_v34 = vsel %vm5605_vm2, %v5561_v58, %v2488_v19  ;;  %v2555_v30 = vmul.f32 %v2448_v45, %v5450_v18 }
 0xa7c   : > { %v2526_v49 = vmul.f32 %v3250_v11, %v5511_v60  ;;  %vm2531_vm3 = vweird.f32 %v3250_v11  ;;  %v2518_v60 = vsel %vm5620_vm4, %v5513_v9, %v2514_v12  ;;  %v2559_v9 = vmul.f32 %v2508_v26, %v5462_v53 }
 0xa7d   : > { %v3252_v37 = vpop.eup %3251  ;;  %vm2532_vm10 = vmor %vm2530_vm6, %vm2531_vm3  ;;  %v2523_v39 = vsel %vm5615_vm11, %v2522_v1, %v2518_v60  ;;  %v2557_v53 = vmul.f32 %v2478_v10, %v5456_v20  ;;  %vm2460_vm13 = vcmp.eq.f32.partialorder %v2459_v57, 8.507059e+37  ;;  %v2558_v27 = vmul.f32 %v2493_v34, %v5458_v47 }
 0xa7e   : > { %v2527_v15 = vsub.f32 1.0, %v2526_v49  ;;  %v2541_v33 = vmul.f32 %v3252_v37, %v5533_v29  ;;  %vm2546_vm7 = vweird.f32 %v3252_v37  ;;  %v2552_v49 = vor.u32 1.1754944e-38, %v2551_v61 }
 0xa7f   : > { %vm2547_vm0 = vmor %vm2545_vm1, %vm2546_vm7  ;;  %v2462_v29 = vor.u32 1.1754944e-38, %v2461_v40  ;;  %v2560_v36 = vmul.f32 %v2523_v39, %v5464_v51  ;;  %v2563_v59 = vpack.c.bf16 %v2557_v53, %v2555_v30  ;;  %vm5975_vm5 = vcmask 261120  }
 0xa80   : > { %v2528_v5 = vmul.f32 %v3250_v11, %v2527_v15  ;;  %v2542_v38 = vsub.f32 1.0, %v2541_v33  ;;  %vm5976_vm12 = vmmov %vm5975_vm5  ;;  %v2597_v47 = vstv %s2878_s10  ;;  %vm5977_vm2 = vcmask 1043456  }
 0xa81   : > { %v2463_v56 = vsel %vm2460_vm13, %v2462_v29, %v2458_v50  ;;  %v2612_v52 = vperm.slane %v2608_v4, %v3832_v55 }
 0xa82   : > { %v2529_v35 = vadd.f32 %v3250_v11, %v2528_v5  ;;  %v2543_v31 = vmul.f32 %v3252_v37, %v2542_v38  ;;  %v2556_v58 = vmul.f32 %v2463_v56, %v5452_v13  ;;  %v2594_v13 = vstv %s2877_s12 }
 0xa83   : > { %v2595_v8 = vmul.f32 %v2594_v13, %v5437_v41 }
 0xa84   : > { %v2533_v21 = vsel %vm2532_vm10, %v3250_v11, %v2529_v35  ;;  %v2544_v46 = vadd.f32 %v3252_v37, %v2543_v31  ;;  %v2564_v18 = vpack.c.bf16 %v2558_v27, %v2556_v58 }
 0xa85   : > { %v2538_v7 = vsel %vm2535_vm14, %v2537_v42, %v2533_v21 }
 0xa86   : > { %v2561_v11 = vmul.f32 %v2538_v7, %v5476_v25  ;;  %v2548_v17 = vsel %vm2547_vm0, %v3252_v37, %v2544_v46 }
 0xa87   : > { %v2553_v0 = vsel %vm2550_vm15, %v2552_v49, %v2548_v17 }
 0xa88   : > { %v2565_v25 = vpack.c.bf16 %v2561_v11, %v2559_v9  ;;  %v2562_v20 = vmul.f32 %v2553_v0, %v5487_v14 }
 0xa8a   : > { %2573 = vmatpush.bf16.msrb.mxu0 %v2565_v25  ;;  %v2566_v40 = vpack.c.bf16 %v2562_v20, %v2560_v36 }
 0xa8c   : > { %2586 = vmatpush.bf16.msrb.mxu1 %v2566_v40 }
 0xa8e   : > { %2574 = vmatpush.bf16.msrb.mxu0 %v2563_v59 }
 0xa90   : > { %2587 = vmatpush.bf16.msrb.mxu1 %v2564_v18 }
 0xa91   : > { %2875 = vmatmul.msk.bf16.vlgmr.msrb.gmra.mxu0 %vm5975_vm5, %v5423_v48 }
 0xa93   : > { %2876 = vmatmul.msk.bf16.vlgmr.msrb.gmra.mxu1 %vm5976_vm12, %v5423_v48 }
 0xb0e   : > { %v2576_v51 = vpop.f32.mrf.mxu0 }
 0xb0f   : > { %v2598_v57 = vmul.f32 %v2597_v47, %v2576_v51 }
 0xb10   : > { %v2589_v3 = vpop.f32.mrf.mxu1 }
 0xb11   : > { %v2599_v14 = vmul.f32 %v2597_v47, %v2589_v3 }
 0xb13   : > { %v2602_v63 = vrot.slane %v2599_v14, 4 }
 0xb15   : > { %v2603_v15 = vsel %vm5977_vm2, %v2598_v57, %v2602_v63 }
 0xb16   : > { %v2578_v48 = vpop.f32.mrf.mxu0  ;;  %v2605_v37 = vadd.f32 %v2603_v15, %v2595_v8 }
 0xb18   : > { %v2591_v22 = vpop.f32.mrf.mxu1  ;;  %v2614_v44 = vadd.f32 %v2612_v52, %v2605_v37 }
 0xb1a   : > { %2615 = vst [vmem:[%s323_s21] sm:$0xff] %v2614_v44 }
 0xb1b   : > { %3326 = shalt.err (!%p3323_p9)
}
 0xb1c   : > { %2896 = dma.vmem_to_hbm [thread:$0]  (%p3478_p4), %s2633_s22, 128, %s2635_s23, %s2617_s27  }
 0xb1d PF: > { %p2913_p10 = scmp.ge.s32.totalorder %s3385_s29, 2  ;;  %s2646_s16 = sand.u32 1, %s3365_s24  }
 0xb1e   : > { %s2647_s19 = scalar_lea.sflag [#allocation3], %s2646_s16 }
 0xb1f   : > { %p2906_p11 = pnand %p2913_p10, %p3485_p8 }
 0xb21   : > { %p2907_p12 = pneg %p2906_p11 }
 0xb23   : > { %3360 = dma.done.wait (%p2907_p12), %s2647_s19, 128  }
 0xb24   : > { %3362 = vsyncadd (%p2907_p12), %s2647_s19, 4294967168  ;;  %s22_s29 = sadd.s32 1, %s3385_s29   ;;  %s5978_s24 = smov %s3369_s25 }
 0xb25   : > { %p19_p13 = scmp.ge.s32.totalorder %s22_s29, 4   ;;  %s5979_s25 = smov %s3373_s26 }
 0xb26   : > { %s5980_s26 = smov %s3491_s14  ;;  %s5981_s27 = smov %s3381_s28 }
 0xb27   : > { %s5982_s28 = smov %s5984_s9  ;;  %21 = sbr.rel (!%p19_p13) target bundleno = 6 (0x6), region = 92 }
 0xb2c   :  { %2653 = vsyncpa [#allocation3], 1 }
 0xb2d   :  { %2655 = vsyncpa [#allocation3 + $0x1], 1 }
 0xb2e   :  { %2656 = vsyncpa [#allocation4], 1 }
 0xb2f   :  { %2658 = vsyncpa [#allocation4 + $0x1], 1 }
 0xb30   :  { %2659 = vsyncpa [#allocation6], 1 }

</bundles_post_ra>
